<compile_context>
chip_gen: v6e
topology: v6e:2x2x1
jax: 0.10.0
libtpu: 0.0.40
codegen_flags: <defaults>
</compile_context>

<pallas_src>
from functools import partial

import numpy as np
import jax
import jax.numpy as jnp
from jax import lax
from jax.experimental import pallas as pl
from jax.experimental.pallas import tpu as pltpu

EPS = 1e-5
LANE = 128   # TPU lane width; classifier output is padded to this


def _aux_head_kernel(x_ref, w1_ref, g1_ref, b1_ref, w2_ref, g2_ref, b2_ref,
                     wfc_ref, bfc_ref, o_ref):
    """Fused AuxiliaryHeadCIFAR forward.  All tensors float32, channels-last.

    x_ref   : (N, 8, 8, C)       input activations (NHWC)
    w1_ref  : (C, 128)           1x1 conv weight   (PyTorch (128,C,1,1) -> (C,128))
    g1/b1   : (1, 128)           BatchNorm2d(128) gamma / beta
    w2_ref  : (2, 2, 128, 768)   2x2 conv weight   (PyTorch (768,128,2,2) -> (kh,kw,ci,co))
    g2/b2   : (1, 768)           BatchNorm2d(768) gamma / beta
    wfc_ref : (768, LANE)        classifier weight, zero-padded to LANE columns
    bfc_ref : (1, LANE)          classifier bias,   zero-padded
    o_ref   : (N, LANE)          padded logits (lane-dense store)
    """
    x = x_ref[...]
    n = x.shape[0]
    c1 = w1_ref.shape[1]          # 128
    c2 = w2_ref.shape[-1]         # 768

    # --- ReLU + AvgPool2d(5, stride=3, padding=0): 8x8 -> 2x2 ------------------
    # padding=0 => every window holds exactly 25 in-bounds elements, so
    # count_include_pad=False reduces to a constant 1/25 scale.
    y = jnp.maximum(x, 0.0)
    inv25 = jnp.float32(1.0 / 25.0)
    pooled = []                                            # 4 lane-dense (N, C) tiles
    for oy in range(2):
        for ox in range(2):
            win = y[:, 3 * oy:3 * oy + 5, 3 * ox:3 * ox + 5, :]      # (N,5,5,C)
            s = jnp.sum(jnp.sum(win, axis=1), axis=1)                # (N, C)
            pooled.append(s * inv25)

    # --- Conv2d(C, 128, 1, bias=False): one MXU matmul per pooled pixel --------
    w1 = w1_ref[...]
    h1 = [jnp.dot(p, w1, preferred_element_type=jnp.float32) for p in pooled]

    # --- BatchNorm2d(128), training mode, stats over N*2*2 rows ----------------
    sum1 = jnp.zeros((1, c1), jnp.float32)
    sq1 = jnp.zeros((1, c1), jnp.float32)
    for h in h1:
        sum1 = sum1 + jnp.sum(h, axis=0, keepdims=True)
        sq1 = sq1 + jnp.sum(h * h, axis=0, keepdims=True)
    cnt1 = jnp.float32(4 * n)
    mean1 = sum1 / cnt1
    var1 = sq1 / cnt1 - mean1 * mean1                      # biased variance
    scale1 = g1_ref[...] * lax.rsqrt(var1 + EPS)           # gamma folded into scale
    shift1 = b1_ref[...] - mean1 * scale1
    r1 = [jnp.maximum(h * scale1 + shift1, 0.0) for h in h1]          # BN + ReLU

    # --- Conv2d(128, 768, 2, bias=False): 2x2 valid conv on a 2x2 map == ------
    # sum over the 4 taps of (N,128)@(128,768) matmuls, accumulated in place.
    h2 = jnp.zeros((n, c2), jnp.float32)
    for oy in range(2):
        for ox in range(2):
            h2 = h2 + jnp.dot(r1[oy * 2 + ox], w2_ref[oy, ox],
                              preferred_element_type=jnp.float32)

    # --- BatchNorm2d(768) (spatial is 1x1, stats over batch only) + ReLU -------
    mean2 = jnp.mean(h2, axis=0, keepdims=True)
    var2 = jnp.mean(h2 * h2, axis=0, keepdims=True) - mean2 * mean2
    scale2 = g2_ref[...] * lax.rsqrt(var2 + EPS)
    shift2 = b2_ref[...] - mean2 * scale2
    r2 = jnp.maximum(h2 * scale2 + shift2, 0.0)

    # --- Linear(768, num_classes) (padded to LANE columns, lane-dense store) ---
    logits = jnp.dot(r2, wfc_ref[...], preferred_element_type=jnp.float32) \
             + bfc_ref[...]
    o_ref[...] = logits.astype(o_ref.dtype)


@partial(jax.jit, static_argnames=("num_classes",))
def auxiliary_head_cifar(x_nchw, params, num_classes):
    """AuxiliaryHeadCIFAR.forward(x).  x_nchw: (N, C, 8, 8) f32 -> (N, num_classes)."""
    # Single tiny pre-pool transpose (N*C*64 elements).  In a production model the
    # activations should already be NHWC end-to-end so this op disappears.
    x = jnp.transpose(x_nchw, (0, 2, 3, 1)).astype(jnp.float32)       # (N,8,8,C)
    n, h, w, c = x.shape
    assert (h, w) == (8, 8), "AuxiliaryHeadCIFAR assumes 8x8 input"

    # Re-layout the PyTorch-shaped parameters into kernel (lane-dense) layouts.
    w1 = jnp.transpose(params["conv1_w"][:, :, 0, 0], (1, 0)).astype(jnp.float32)     # (C,128)
    g1 = params["bn1_g"].reshape(1, -1).astype(jnp.float32)
    b1 = params["bn1_b"].reshape(1, -1).astype(jnp.float32)
    w2 = jnp.transpose(params["conv2_w"], (2, 3, 1, 0)).astype(jnp.float32)           # (2,2,128,768)
    g2 = params["bn2_g"].reshape(1, -1).astype(jnp.float32)
    b2 = params["bn2_b"].reshape(1, -1).astype(jnp.float32)

    ncls = num_classes
    ncls_pad = ((ncls + LANE - 1) // LANE) * LANE
    wfc = jnp.zeros((params["fc_w"].shape[1], ncls_pad), jnp.float32)
    wfc = wfc.at[:, :ncls].set(params["fc_w"].T.astype(jnp.float32))                  # (768, pad)
    bfc = jnp.zeros((1, ncls_pad), jnp.float32).at[0, :ncls].set(
        params["fc_b"].astype(jnp.float32))

    args = (x, w1, g1, b1, w2, g2, b2, wfc, bfc)
    out = pl.pallas_call(
        _aux_head_kernel,
        out_shape=jax.ShapeDtypeStruct((n, ncls_pad), jnp.float32),
        in_specs=[pl.BlockSpec(memory_space=pltpu.MemorySpace.VMEM)] * len(args),
        out_specs=pl.BlockSpec(memory_space=pltpu.MemorySpace.VMEM),
    )(*args)
    return out[:, :ncls]


def _ref_bn_train(v, g, b):
    # nn.BatchNorm2d training mode: batch stats, biased variance, eps=1e-5, affine.
    mu = jnp.mean(v, axis=(0, 2, 3), keepdims=True)
    var = jnp.mean((v - mu) ** 2, axis=(0, 2, 3), keepdims=True)
    return (v - mu) * lax.rsqrt(var + EPS) * g.reshape(1, -1, 1, 1) \
           + b.reshape(1, -1, 1, 1)


def _ref_aux_head(x_nchw, params):
    """Pure-JAX reference mirroring the PyTorch module (NCHW, lax conv/pool)."""
    hp = lax.Precision.HIGHEST
    x = jnp.maximum(x_nchw.astype(jnp.float32), 0.0)
    # AvgPool2d(5, stride=3, padding=0, count_include_pad=False): no padding,
    # so every window divides by exactly 25.
    x = lax.reduce_window(x, 0.0, lax.add, (1, 1, 5, 5), (1, 1, 3, 3), "VALID") / 25.0
    x = lax.conv_general_dilated(x, params["conv1_w"], (1, 1), "VALID",
                                 dimension_numbers=("NCHW", "OIHW", "NCHW"),
                                 precision=hp)
    x = jnp.maximum(_ref_bn_train(x, params["bn1_g"], params["bn1_b"]), 0.0)
    x = lax.conv_general_dilated(x, params["conv2_w"], (1, 1), "VALID",
                                 dimension_numbers=("NCHW", "OIHW", "NCHW"),
                                 precision=hp)
    x = jnp.maximum(_ref_bn_train(x, params["bn2_g"], params["bn2_b"]), 0.0)
    x = x.reshape(x.shape[0], -1)                                      # (N, 768)
    return jnp.dot(x, params["fc_w"].T, precision=hp) + params["fc_b"]


if __name__ == "__main__":
    N, C, NUM_CLASSES = 4, 128, 10
    key = jax.random.PRNGKey(0)
    ks = jax.random.split(key, 10)

    params = {
        "conv1_w": 0.10 * jax.random.normal(ks[0], (128, C, 1, 1), jnp.float32),
        "bn1_g":   1.0 + 0.1 * jax.random.normal(ks[1], (128,), jnp.float32),
        "bn1_b":   0.10 * jax.random.normal(ks[2], (128,), jnp.float32),
        "conv2_w": 0.05 * jax.random.normal(ks[3], (768, 128, 2, 2), jnp.float32),
        "bn2_g":   1.0 + 0.1 * jax.random.normal(ks[4], (768,), jnp.float32),
        "bn2_b":   0.10 * jax.random.normal(ks[5], (768,), jnp.float32),
        "fc_w":    0.05 * jax.random.normal(ks[6], (NUM_CLASSES, 768), jnp.float32),
        "fc_b":    0.05 * jax.random.normal(ks[7], (NUM_CLASSES,), jnp.float32),
    }
    x = jax.random.normal(ks[8], (N, C, 8, 8), jnp.float32)            # NCHW

    out = auxiliary_head_cifar(x, params, NUM_CLASSES)
    out = jax.block_until_ready(out)
    assert out.shape == (N, NUM_CLASSES) and out.dtype == jnp.float32

    ref = _ref_aux_head(x, params)
    np.testing.assert_allclose(np.asarray(out), np.asarray(ref),
                               rtol=1e-2, atol=1e-2)
    print("KERNEL_OK")
</pallas_src>

<mosaic_0001>
module attributes {stable_mosaic.version = 11 : i64} {
  func.func @_aux_head_kernel(%arg0: memref<4x8x8x128xf32, #tpu.memory_space<vmem>>, %arg1: memref<128x128xf32, #tpu.memory_space<vmem>>, %arg2: memref<1x128xf32, #tpu.memory_space<vmem>>, %arg3: memref<1x128xf32, #tpu.memory_space<vmem>>, %arg4: memref<2x2x128x768xf32, #tpu.memory_space<vmem>>, %arg5: memref<1x768xf32, #tpu.memory_space<vmem>>, %arg6: memref<1x768xf32, #tpu.memory_space<vmem>>, %arg7: memref<768x128xf32, #tpu.memory_space<vmem>>, %arg8: memref<1x128xf32, #tpu.memory_space<vmem>>, %arg9: memref<4x128xf32, #tpu.memory_space<vmem>>) attributes {dimension_semantics = [], scalar_prefetch = 0 : i64, scratch_operands = 0 : i64, tpu.core_type = #tpu.core_type<tc>} {
    %c0 = arith.constant 0 : index
    %c0_0 = arith.constant 0 : index
    %c0_1 = arith.constant 0 : index
    %c0_2 = arith.constant 0 : index
    %0 = vector.load %arg0[%c0, %c0_0, %c0_1, %c0_2] : memref<4x8x8x128xf32, #tpu.memory_space<vmem>>, vector<4x8x8x128xf32>
    %cst = arith.constant 0.000000e+00 : f32
    %1 = vector.broadcast %cst : f32 to vector<4x8x8x128xf32>
    %2 = arith.maximumf %0, %1 : vector<4x8x8x128xf32>
    %3 = vector.extract_strided_slice %2 {offsets = [0, 0, 0, 0], sizes = [4, 5, 5, 128], strides = [1, 1, 1, 1]} : vector<4x8x8x128xf32> to vector<4x5x5x128xf32>
    %cst_3 = arith.constant dense<0.000000e+00> : vector<4x5x128xf32>
    %4 = vector.multi_reduction <add>, %3, %cst_3 [1] : vector<4x5x5x128xf32> to vector<4x5x128xf32>
    %cst_4 = arith.constant dense<0.000000e+00> : vector<4x128xf32>
    %5 = vector.multi_reduction <add>, %4, %cst_4 [1] : vector<4x5x128xf32> to vector<4x128xf32>
    %cst_5 = arith.constant 4.000000e-02 : f32
    %6 = vector.broadcast %cst_5 : f32 to vector<4x128xf32>
    %7 = arith.mulf %5, %6 : vector<4x128xf32>
    %8 = vector.extract_strided_slice %2 {offsets = [0, 0, 3, 0], sizes = [4, 5, 5, 128], strides = [1, 1, 1, 1]} : vector<4x8x8x128xf32> to vector<4x5x5x128xf32>
    %cst_6 = arith.constant dense<0.000000e+00> : vector<4x5x128xf32>
    %9 = vector.multi_reduction <add>, %8, %cst_6 [1] : vector<4x5x5x128xf32> to vector<4x5x128xf32>
    %cst_7 = arith.constant dense<0.000000e+00> : vector<4x128xf32>
    %10 = vector.multi_reduction <add>, %9, %cst_7 [1] : vector<4x5x128xf32> to vector<4x128xf32>
    %cst_8 = arith.constant 4.000000e-02 : f32
    %11 = vector.broadcast %cst_8 : f32 to vector<4x128xf32>
    %12 = arith.mulf %10, %11 : vector<4x128xf32>
    %13 = vector.extract_strided_slice %2 {offsets = [0, 3, 0, 0], sizes = [4, 5, 5, 128], strides = [1, 1, 1, 1]} : vector<4x8x8x128xf32> to vector<4x5x5x128xf32>
    %cst_9 = arith.constant dense<0.000000e+00> : vector<4x5x128xf32>
    %14 = vector.multi_reduction <add>, %13, %cst_9 [1] : vector<4x5x5x128xf32> to vector<4x5x128xf32>
    %cst_10 = arith.constant dense<0.000000e+00> : vector<4x128xf32>
    %15 = vector.multi_reduction <add>, %14, %cst_10 [1] : vector<4x5x128xf32> to vector<4x128xf32>
    %cst_11 = arith.constant 4.000000e-02 : f32
    %16 = vector.broadcast %cst_11 : f32 to vector<4x128xf32>
    %17 = arith.mulf %15, %16 : vector<4x128xf32>
    %18 = vector.extract_strided_slice %2 {offsets = [0, 3, 3, 0], sizes = [4, 5, 5, 128], strides = [1, 1, 1, 1]} : vector<4x8x8x128xf32> to vector<4x5x5x128xf32>
    %cst_12 = arith.constant dense<0.000000e+00> : vector<4x5x128xf32>
    %19 = vector.multi_reduction <add>, %18, %cst_12 [1] : vector<4x5x5x128xf32> to vector<4x5x128xf32>
    %cst_13 = arith.constant dense<0.000000e+00> : vector<4x128xf32>
    %20 = vector.multi_reduction <add>, %19, %cst_13 [1] : vector<4x5x128xf32> to vector<4x128xf32>
    %cst_14 = arith.constant 4.000000e-02 : f32
    %21 = vector.broadcast %cst_14 : f32 to vector<4x128xf32>
    %22 = arith.mulf %20, %21 : vector<4x128xf32>
    %c0_15 = arith.constant 0 : index
    %c0_16 = arith.constant 0 : index
    %23 = vector.load %arg1[%c0_15, %c0_16] : memref<128x128xf32, #tpu.memory_space<vmem>>, vector<128x128xf32>
    %cst_17 = arith.constant dense<0.000000e+00> : vector<4x128xf32>
    %24 = tpu.matmul %7, %23, %cst_17 {dimension_numbers = #tpu.dot_dimension_numbers<[1], [0], [0], [1], [0, 0, 1, 1], [], []>} : vector<4x128xf32>, vector<128x128xf32>, vector<4x128xf32> -> vector<4x128xf32>
    %cst_18 = arith.constant dense<0.000000e+00> : vector<4x128xf32>
    %25 = tpu.matmul %12, %23, %cst_18 {dimension_numbers = #tpu.dot_dimension_numbers<[1], [0], [0], [1], [0, 0, 1, 1], [], []>} : vector<4x128xf32>, vector<128x128xf32>, vector<4x128xf32> -> vector<4x128xf32>
    %cst_19 = arith.constant dense<0.000000e+00> : vector<4x128xf32>
    %26 = tpu.matmul %17, %23, %cst_19 {dimension_numbers = #tpu.dot_dimension_numbers<[1], [0], [0], [1], [0, 0, 1, 1], [], []>} : vector<4x128xf32>, vector<128x128xf32>, vector<4x128xf32> -> vector<4x128xf32>
    %cst_20 = arith.constant dense<0.000000e+00> : vector<4x128xf32>
    %27 = tpu.matmul %22, %23, %cst_20 {dimension_numbers = #tpu.dot_dimension_numbers<[1], [0], [0], [1], [0, 0, 1, 1], [], []>} : vector<4x128xf32>, vector<128x128xf32>, vector<4x128xf32> -> vector<4x128xf32>
    %cst_21 = arith.constant 0.000000e+00 : f32
    %28 = vector.broadcast %cst_21 : f32 to vector<1x128xf32>
    %cst_22 = arith.constant 0.000000e+00 : f32
    %29 = vector.broadcast %cst_22 : f32 to vector<1x128xf32>
    %cst_23 = arith.constant dense<0.000000e+00> : vector<128xf32>
    %30 = vector.multi_reduction <add>, %24, %cst_23 [0] : vector<4x128xf32> to vector<128xf32>
    %31 = vector.shape_cast %30 : vector<128xf32> to vector<1x128xf32>
    %32 = arith.addf %28, %31 : vector<1x128xf32>
    %33 = arith.mulf %24, %24 : vector<4x128xf32>
    %cst_24 = arith.constant dense<0.000000e+00> : vector<128xf32>
    %34 = vector.multi_reduction <add>, %33, %cst_24 [0] : vector<4x128xf32> to vector<128xf32>
    %35 = vector.shape_cast %34 : vector<128xf32> to vector<1x128xf32>
    %36 = arith.addf %29, %35 : vector<1x128xf32>
    %cst_25 = arith.constant dense<0.000000e+00> : vector<128xf32>
    %37 = vector.multi_reduction <add>, %25, %cst_25 [0] : vector<4x128xf32> to vector<128xf32>
    %38 = vector.shape_cast %37 : vector<128xf32> to vector<1x128xf32>
    %39 = arith.addf %32, %38 : vector<1x128xf32>
    %40 = arith.mulf %25, %25 : vector<4x128xf32>
    %cst_26 = arith.constant dense<0.000000e+00> : vector<128xf32>
    %41 = vector.multi_reduction <add>, %40, %cst_26 [0] : vector<4x128xf32> to vector<128xf32>
    %42 = vector.shape_cast %41 : vector<128xf32> to vector<1x128xf32>
    %43 = arith.addf %36, %42 : vector<1x128xf32>
    %cst_27 = arith.constant dense<0.000000e+00> : vector<128xf32>
    %44 = vector.multi_reduction <add>, %26, %cst_27 [0] : vector<4x128xf32> to vector<128xf32>
    %45 = vector.shape_cast %44 : vector<128xf32> to vector<1x128xf32>
    %46 = arith.addf %39, %45 : vector<1x128xf32>
    %47 = arith.mulf %26, %26 : vector<4x128xf32>
    %cst_28 = arith.constant dense<0.000000e+00> : vector<128xf32>
    %48 = vector.multi_reduction <add>, %47, %cst_28 [0] : vector<4x128xf32> to vector<128xf32>
    %49 = vector.shape_cast %48 : vector<128xf32> to vector<1x128xf32>
    %50 = arith.addf %43, %49 : vector<1x128xf32>
    %cst_29 = arith.constant dense<0.000000e+00> : vector<128xf32>
    %51 = vector.multi_reduction <add>, %27, %cst_29 [0] : vector<4x128xf32> to vector<128xf32>
    %52 = vector.shape_cast %51 : vector<128xf32> to vector<1x128xf32>
    %53 = arith.addf %46, %52 : vector<1x128xf32>
    %54 = arith.mulf %27, %27 : vector<4x128xf32>
    %cst_30 = arith.constant dense<0.000000e+00> : vector<128xf32>
    %55 = vector.multi_reduction <add>, %54, %cst_30 [0] : vector<4x128xf32> to vector<128xf32>
    %56 = vector.shape_cast %55 : vector<128xf32> to vector<1x128xf32>
    %57 = arith.addf %50, %56 : vector<1x128xf32>
    %cst_31 = arith.constant 1.600000e+01 : f32
    %58 = vector.broadcast %cst_31 : f32 to vector<1x128xf32>
    %59 = arith.divf %53, %58 : vector<1x128xf32>
    %cst_32 = arith.constant 1.600000e+01 : f32
    %60 = vector.broadcast %cst_32 : f32 to vector<1x128xf32>
    %61 = arith.divf %57, %60 : vector<1x128xf32>
    %62 = arith.mulf %59, %59 : vector<1x128xf32>
    %63 = arith.subf %61, %62 : vector<1x128xf32>
    %c0_33 = arith.constant 0 : index
    %c0_34 = arith.constant 0 : index
    %64 = vector.load %arg2[%c0_33, %c0_34] : memref<1x128xf32, #tpu.memory_space<vmem>>, vector<1x128xf32>
    %cst_35 = arith.constant 9.99999974E-6 : f32
    %65 = vector.broadcast %cst_35 : f32 to vector<1x128xf32>
    %66 = arith.addf %63, %65 : vector<1x128xf32>
    %67 = math.rsqrt %66 : vector<1x128xf32>
    %68 = arith.mulf %64, %67 : vector<1x128xf32>
    %c0_36 = arith.constant 0 : index
    %c0_37 = arith.constant 0 : index
    %69 = vector.load %arg3[%c0_36, %c0_37] : memref<1x128xf32, #tpu.memory_space<vmem>>, vector<1x128xf32>
    %70 = arith.mulf %59, %68 : vector<1x128xf32>
    %71 = arith.subf %69, %70 : vector<1x128xf32>
    %72 = vector.broadcast %68 : vector<1x128xf32> to vector<4x128xf32>
    %73 = arith.mulf %24, %72 : vector<4x128xf32>
    %74 = vector.broadcast %71 : vector<1x128xf32> to vector<4x128xf32>
    %75 = arith.addf %73, %74 : vector<4x128xf32>
    %cst_38 = arith.constant 0.000000e+00 : f32
    %76 = vector.broadcast %cst_38 : f32 to vector<4x128xf32>
    %77 = arith.maximumf %75, %76 : vector<4x128xf32>
    %78 = vector.broadcast %68 : vector<1x128xf32> to vector<4x128xf32>
    %79 = arith.mulf %25, %78 : vector<4x128xf32>
    %80 = vector.broadcast %71 : vector<1x128xf32> to vector<4x128xf32>
    %81 = arith.addf %79, %80 : vector<4x128xf32>
    %cst_39 = arith.constant 0.000000e+00 : f32
    %82 = vector.broadcast %cst_39 : f32 to vector<4x128xf32>
    %83 = arith.maximumf %81, %82 : vector<4x128xf32>
    %84 = vector.broadcast %68 : vector<1x128xf32> to vector<4x128xf32>
    %85 = arith.mulf %26, %84 : vector<4x128xf32>
    %86 = vector.broadcast %71 : vector<1x128xf32> to vector<4x128xf32>
    %87 = arith.addf %85, %86 : vector<4x128xf32>
    %cst_40 = arith.constant 0.000000e+00 : f32
    %88 = vector.broadcast %cst_40 : f32 to vector<4x128xf32>
    %89 = arith.maximumf %87, %88 : vector<4x128xf32>
    %90 = vector.broadcast %68 : vector<1x128xf32> to vector<4x128xf32>
    %91 = arith.mulf %27, %90 : vector<4x128xf32>
    %92 = vector.broadcast %71 : vector<1x128xf32> to vector<4x128xf32>
    %93 = arith.addf %91, %92 : vector<4x128xf32>
    %cst_41 = arith.constant 0.000000e+00 : f32
    %94 = vector.broadcast %cst_41 : f32 to vector<4x128xf32>
    %95 = arith.maximumf %93, %94 : vector<4x128xf32>
    %cst_42 = arith.constant 0.000000e+00 : f32
    %96 = vector.broadcast %cst_42 : f32 to vector<4x768xf32>
    %c0_43 = arith.constant 0 : index
    %c0_44 = arith.constant 0 : index
    %c0_45 = arith.constant 0 : index
    %c0_46 = arith.constant 0 : index
    %97 = vector.load %arg4[%c0_43, %c0_44, %c0_45, %c0_46] : memref<2x2x128x768xf32, #tpu.memory_space<vmem>>, vector<1x1x128x768xf32>
    %98 = vector.shape_cast %97 : vector<1x1x128x768xf32> to vector<128x768xf32>
    %cst_47 = arith.constant dense<0.000000e+00> : vector<4x768xf32>
    %99 = tpu.matmul %77, %98, %cst_47 {dimension_numbers = #tpu.dot_dimension_numbers<[1], [0], [0], [1], [0, 0, 1, 1], [], []>} : vector<4x128xf32>, vector<128x768xf32>, vector<4x768xf32> -> vector<4x768xf32>
    %100 = arith.addf %96, %99 : vector<4x768xf32>
    %c0_48 = arith.constant 0 : index
    %c1 = arith.constant 1 : index
    %c0_49 = arith.constant 0 : index
    %c0_50 = arith.constant 0 : index
    %101 = vector.load %arg4[%c0_48, %c1, %c0_49, %c0_50] : memref<2x2x128x768xf32, #tpu.memory_space<vmem>>, vector<1x1x128x768xf32>
    %102 = vector.shape_cast %101 : vector<1x1x128x768xf32> to vector<128x768xf32>
    %cst_51 = arith.constant dense<0.000000e+00> : vector<4x768xf32>
    %103 = tpu.matmul %83, %102, %cst_51 {dimension_numbers = #tpu.dot_dimension_numbers<[1], [0], [0], [1], [0, 0, 1, 1], [], []>} : vector<4x128xf32>, vector<128x768xf32>, vector<4x768xf32> -> vector<4x768xf32>
    %104 = arith.addf %100, %103 : vector<4x768xf32>
    %c1_52 = arith.constant 1 : index
    %c0_53 = arith.constant 0 : index
    %c0_54 = arith.constant 0 : index
    %c0_55 = arith.constant 0 : index
    %105 = vector.load %arg4[%c1_52, %c0_53, %c0_54, %c0_55] : memref<2x2x128x768xf32, #tpu.memory_space<vmem>>, vector<1x1x128x768xf32>
    %106 = vector.shape_cast %105 : vector<1x1x128x768xf32> to vector<128x768xf32>
    %cst_56 = arith.constant dense<0.000000e+00> : vector<4x768xf32>
    %107 = tpu.matmul %89, %106, %cst_56 {dimension_numbers = #tpu.dot_dimension_numbers<[1], [0], [0], [1], [0, 0, 1, 1], [], []>} : vector<4x128xf32>, vector<128x768xf32>, vector<4x768xf32> -> vector<4x768xf32>
    %108 = arith.addf %104, %107 : vector<4x768xf32>
    %c1_57 = arith.constant 1 : index
    %c1_58 = arith.constant 1 : index
    %c0_59 = arith.constant 0 : index
    %c0_60 = arith.constant 0 : index
    %109 = vector.load %arg4[%c1_57, %c1_58, %c0_59, %c0_60] : memref<2x2x128x768xf32, #tpu.memory_space<vmem>>, vector<1x1x128x768xf32>
    %110 = vector.shape_cast %109 : vector<1x1x128x768xf32> to vector<128x768xf32>
    %cst_61 = arith.constant dense<0.000000e+00> : vector<4x768xf32>
    %111 = tpu.matmul %95, %110, %cst_61 {dimension_numbers = #tpu.dot_dimension_numbers<[1], [0], [0], [1], [0, 0, 1, 1], [], []>} : vector<4x128xf32>, vector<128x768xf32>, vector<4x768xf32> -> vector<4x768xf32>
    %112 = arith.addf %108, %111 : vector<4x768xf32>
    %cst_62 = arith.constant dense<0.000000e+00> : vector<768xf32>
    %113 = vector.multi_reduction <add>, %112, %cst_62 [0] : vector<4x768xf32> to vector<768xf32>
    %114 = vector.shape_cast %113 : vector<768xf32> to vector<1x768xf32>
    %cst_63 = arith.constant 4.000000e+00 : f32
    %115 = vector.broadcast %cst_63 : f32 to vector<1x768xf32>
    %116 = arith.divf %114, %115 : vector<1x768xf32>
    %117 = arith.mulf %112, %112 : vector<4x768xf32>
    %cst_64 = arith.constant dense<0.000000e+00> : vector<768xf32>
    %118 = vector.multi_reduction <add>, %117, %cst_64 [0] : vector<4x768xf32> to vector<768xf32>
    %119 = vector.shape_cast %118 : vector<768xf32> to vector<1x768xf32>
    %cst_65 = arith.constant 4.000000e+00 : f32
    %120 = vector.broadcast %cst_65 : f32 to vector<1x768xf32>
    %121 = arith.divf %119, %120 : vector<1x768xf32>
    %122 = arith.mulf %116, %116 : vector<1x768xf32>
    %123 = arith.subf %121, %122 : vector<1x768xf32>
    %c0_66 = arith.constant 0 : index
    %c0_67 = arith.constant 0 : index
    %124 = vector.load %arg5[%c0_66, %c0_67] : memref<1x768xf32, #tpu.memory_space<vmem>>, vector<1x768xf32>
    %cst_68 = arith.constant 9.99999974E-6 : f32
    %125 = vector.broadcast %cst_68 : f32 to vector<1x768xf32>
    %126 = arith.addf %123, %125 : vector<1x768xf32>
    %127 = math.rsqrt %126 : vector<1x768xf32>
    %128 = arith.mulf %124, %127 : vector<1x768xf32>
    %c0_69 = arith.constant 0 : index
    %c0_70 = arith.constant 0 : index
    %129 = vector.load %arg6[%c0_69, %c0_70] : memref<1x768xf32, #tpu.memory_space<vmem>>, vector<1x768xf32>
    %130 = arith.mulf %116, %128 : vector<1x768xf32>
    %131 = arith.subf %129, %130 : vector<1x768xf32>
    %132 = vector.broadcast %128 : vector<1x768xf32> to vector<4x768xf32>
    %133 = arith.mulf %112, %132 : vector<4x768xf32>
    %134 = vector.broadcast %131 : vector<1x768xf32> to vector<4x768xf32>
    %135 = arith.addf %133, %134 : vector<4x768xf32>
    %cst_71 = arith.constant 0.000000e+00 : f32
    %136 = vector.broadcast %cst_71 : f32 to vector<4x768xf32>
    %137 = arith.maximumf %135, %136 : vector<4x768xf32>
    %c0_72 = arith.constant 0 : index
    %c0_73 = arith.constant 0 : index
    %138 = vector.load %arg7[%c0_72, %c0_73] : memref<768x128xf32, #tpu.memory_space<vmem>>, vector<768x128xf32>
    %cst_74 = arith.constant dense<0.000000e+00> : vector<4x128xf32>
    %139 = tpu.matmul %137, %138, %cst_74 {dimension_numbers = #tpu.dot_dimension_numbers<[1], [0], [0], [1], [0, 0, 1, 1], [], []>} : vector<4x768xf32>, vector<768x128xf32>, vector<4x128xf32> -> vector<4x128xf32>
    %c0_75 = arith.constant 0 : index
    %c0_76 = arith.constant 0 : index
    %140 = vector.load %arg8[%c0_75, %c0_76] : memref<1x128xf32, #tpu.memory_space<vmem>>, vector<1x128xf32>
    %141 = vector.broadcast %140 : vector<1x128xf32> to vector<4x128xf32>
    %142 = arith.addf %139, %141 : vector<4x128xf32>
    %c0_77 = arith.constant 0 : index
    %c0_78 = arith.constant 0 : index
    %143 = vector.load %arg9[%c0_77, %c0_78] : memref<4x128xf32, #tpu.memory_space<vmem>>, vector<4x128xf32>
    tpu.vector_store %arg9[%c0_77, %c0_78], %142 {strides = array<i32>} : memref<4x128xf32, #tpu.memory_space<vmem>>, vector<4x128xf32>,
    return
  }
}

</mosaic_0001>

<bundles_post_ra>
// kernel: auxiliary_head_cifar.1
= control target key start
LH: loop header
LB: loop body
LE: loop exit
PB: predicated region body
PF: predicated region fallthrough
CT: control target
= control target key end

     0   :  { %v3347_v1 = vmov 0.0   ;;  %vm97_vm0 = vcmask 1044480   ;;  %vm166_vm1 = vcmask 1047555   ;;  %s5707_s0 = inlined_call_operand.vmem [shape: f32[4,8,8,128], index: 0, kind: input, shape index: {}]   ;;  %s5708_s1 = inlined_call_operand.vmem [shape: f32[128,128], index: 1, kind: input, shape index: {}]   ;;  %s5709_s2 = inlined_call_operand.vmem [shape: f32[1,128], index: 2, kind: input, shape index: {}]   ;;  %s5710_s3 = inlined_call_operand.vmem [shape: f32[1,128], index: 3, kind: input, shape index: {}]   ;;  %s5711_s4 = inlined_call_operand.vmem [shape: f32[2,2,128,768], index: 4, kind: input, shape index: {}]   ;;  %s5712_s5 = inlined_call_operand.vmem [shape: f32[1,768], index: 5, kind: input, shape index: {}]   ;;  %s5713_s6 = inlined_call_operand.vmem [shape: f32[1,768], index: 6, kind: input, shape index: {}]   ;;  %s5714_s7 = inlined_call_operand.vmem [shape: f32[768,128], index: 7, kind: input, shape index: {}]   ;;  %s5715_s8 = inlined_call_operand.vmem [shape: f32[1,128], index: 8, kind: input, shape index: {}]   ;;  %s5716_s9 = inlined_call_operand.hbm [shape: f32[4,128], index: 9, kind: output, shape index: {}]  }
   0x1   :  { %v3404_v0 = vld [vmem:[%s5708_s1 + $0x78] sm:$0xff]  ;;  %3167 = vmatprep.subr.mxu0 %v3347_v1  ;;  %3202 = vmatprep.subr.mxu1 %v3347_v1  ;;  %v3411_v2 = vld [vmem:[%s5708_s1 + $0x70] sm:$0xff]  ;;  %v3420_v3 = vld [vmem:[%s5708_s1 + $0x68] sm:$0xff] }
   0x2   :  { %3168 = vmatpush3.msra.mxu0 %v3404_v0  ;;  %3203 = vmatpush3.msra.mxu1 %v3404_v0  ;;  %v3427_v4 = vld [vmem:[%s5708_s1 + $0x60] sm:$0xff]  ;;  %v3434_v5 = vld [vmem:[%s5708_s1 + $0x58] sm:$0xff]  ;;  %v3444_v7 = vld [vmem:[%s5707_s0 + $0x8] sm:$0xff] }
   0x3   :  { %3169 = vmatprep.subr.mxu0 %v3347_v1  ;;  %3204 = vmatprep.subr.mxu1 %v3347_v1  ;;  %v3439_v6 = vld [vmem:[%s5707_s0] sm:$0xff]  ;;  %v3451_v8 = vld [vmem:[%s5707_s0 + $0x10] sm:$0xff]  ;;  %v3456_v9 = vld [vmem:[%s5707_s0 + $0x18] sm:$0xff]  ;;  %v5719_v12 = vmax.f32 %v3444_v7, 0.0 }
   0x4   :  { %3170 = vmatpush3.msra.mxu0 %v3411_v2  ;;  %3205 = vmatpush3.msra.mxu1 %v3411_v2  ;;  %v3461_v10 = vld [vmem:[%s5707_s0 + $0x20] sm:$0xff]  ;;  %v65_v11 = vmax.f32 %v3439_v6, 0.0  ;;  %v3470_v13 = vld [vmem:[%s5708_s1 + $0x50] sm:$0xff]  ;;  %v3475_v14 = vld [vmem:[%s5707_s0 + $0x28] sm:$0xff]  ;;  %v5717_v17 = vmax.f32 %v3451_v8, 0.0  ;;  %v5718_v18 = vmax.f32 %v3456_v9, 0.0 }
   0x5   :  { %3171 = vmatprep.subr.mxu0 %v3347_v1  ;;  %3206 = vmatprep.subr.mxu1 %v3347_v1  ;;  %v3480_v15 = vld [vmem:[%s5707_s0 + $0x40] sm:$0xff]  ;;  %v3485_v16 = vld [vmem:[%s5707_s0 + $0x48] sm:$0xff]  ;;  %v5725_v19 = vmax.f32 %v3461_v10, 0.0  ;;  %v3495_v20 = vld [vmem:[%s5707_s0 + $0x50] sm:$0xff]  ;;  %v5733_v23 = vmax.f32 %v3475_v14, 0.0  ;;  %v99_v58 = vsel %vm97_vm0, %v5719_v12, 0.0 }
   0x6   :  { %3172 = vmatpush3.msra.mxu0 %v3420_v3  ;;  %3207 = vmatpush3.msra.mxu1 %v3420_v3  ;;  %v3500_v21 = vld [vmem:[%s5707_s0 + $0x58] sm:$0xff]  ;;  %v3505_v22 = vld [vmem:[%s5707_s0 + $0x60] sm:$0xff]  ;;  %v5720_v24 = vmax.f32 %v3480_v15, 0.0  ;;  %v5724_v25 = vmax.f32 %v3485_v16, 0.0  ;;  %v3515_v26 = vld [vmem:[%s5708_s1 + $0x48] sm:$0xff]  ;;  %v5721_v30 = vmax.f32 %v3495_v20, 0.0 }
   0x7   :  { %3173 = vmatprep.subr.mxu0 %v3347_v1  ;;  %3208 = vmatprep.subr.mxu1 %v3347_v1  ;;  %v3520_v27 = vld [vmem:[%s5707_s0 + $0x68] sm:$0xff]  ;;  %v3525_v28 = vld [vmem:[%s5707_s0 + $0x80] sm:$0xff]  ;;  %v5722_v31 = vmax.f32 %v3500_v21, 0.0  ;;  %v5723_v32 = vmax.f32 %v3505_v22, 0.0  ;;  %v3540_v33 = vld [vmem:[%s5707_s0 + $0x90] sm:$0xff]  ;;  %v98_v56 = vsel %vm97_vm0, %v65_v11, 0.0 }
   0x8   :  { %3174 = vmatpush3.msra.mxu0 %v3427_v4  ;;  %3209 = vmatpush3.msra.mxu1 %v3427_v4  ;;  %v3530_v29 = vld [vmem:[%s5707_s0 + $0x88] sm:$0xff]  ;;  %v3545_v34 = vld [vmem:[%s5707_s0 + $0x98] sm:$0xff]  ;;  %v3550_v35 = vld [vmem:[%s5707_s0 + $0xa0] sm:$0xff]  ;;  %v5734_v36 = vmax.f32 %v3520_v27, 0.0  ;;  %v81_v37 = vmax.f32 %v3525_v28, 0.0  ;;  %v5726_v42 = vmax.f32 %v3540_v33, 0.0  ;;  %v100_v62 = vadd.f32 %v99_v58, %v98_v56 }
   0x9   :  { %3175 = vmatprep.subr.mxu0 %v3347_v1  ;;  %3210 = vmatprep.subr.mxu1 %v3347_v1  ;;  %v5727_v38 = vmax.f32 %v3530_v29, 0.0  ;;  %v3560_v39 = vld [vmem:[%s5707_s0 + $0xa8] sm:$0xff]  ;;  %v3565_v40 = vld [vmem:[%s5707_s0 + $0xc0] sm:$0xff]  ;;  %v5729_v43 = vmax.f32 %v3545_v34, 0.0  ;;  %v5728_v44 = vmax.f32 %v3550_v35, 0.0  ;;  %v3580_v45 = vld [vmem:[%s5707_s0 + $0xd0] sm:$0xff] }
   0xa   :  { %3176 = vmatpush3.msra.mxu0 %v3434_v5  ;;  %3211 = vmatpush3.msra.mxu1 %v3434_v5  ;;  %v3570_v41 = vld [vmem:[%s5707_s0 + $0xc8] sm:$0xff]  ;;  %v3585_v46 = vld [vmem:[%s5707_s0 + $0xd8] sm:$0xff]  ;;  %v3590_v47 = vld [vmem:[%s5707_s0 + $0xe0] sm:$0xff]  ;;  %v5737_v48 = vmax.f32 %v3560_v39, 0.0  ;;  %v89_v49 = vmax.f32 %v3565_v40, 0.0  ;;  %v5731_v53 = vmax.f32 %v3580_v45, 0.0 }
   0xb   :  { %3177 = vmatprep.subr.mxu0 %v3347_v1  ;;  %3212 = vmatprep.subr.mxu1 %v3347_v1  ;;  %v5730_v50 = vmax.f32 %v3570_v41, 0.0  ;;  %v3600_v51 = vld [vmem:[%s5708_s1 + $0x40] sm:$0xff]  ;;  %v3605_v52 = vld [vmem:[%s5707_s0 + $0xe8] sm:$0xff]  ;;  %v5732_v54 = vmax.f32 %v3585_v46, 0.0  ;;  %v5735_v55 = vmax.f32 %v3590_v47, 0.0  ;;  %v101_v59 = vsel %vm97_vm0, %v5717_v17, 0.0 }
   0xc   :  { %3178 = vmatpush3.msra.mxu0 %v3470_v13  ;;  %3213 = vmatpush3.msra.mxu1 %v3470_v13  ;;  %v5736_v57 = vmax.f32 %v3605_v52, 0.0  ;;  %v103_v60 = vsel %vm97_vm0, %v5718_v18, 0.0  ;;  %v3630_v61 = vld [vmem:[%s5708_s1 + $0x38] sm:$0xff]  ;;  %v105_v63 = vsel %vm97_vm0, %v5725_v19, 0.0  ;;  %v107_v17 = vsel %vm97_vm0, %v5720_v24, 0.0 }
   0xd   :  { %3179 = vmatprep.subr.mxu0 %v3347_v1  ;;  %3214 = vmatprep.subr.mxu1 %v3347_v1  ;;  %v108_v18 = vsel %vm97_vm0, %v5724_v25, 0.0  ;;  %v110_v56 = vsel %vm97_vm0, %v5721_v30, 0.0  ;;  %v112_v58 = vsel %vm97_vm0, %v5722_v31, 0.0  ;;  %v114_v24 = vsel %vm97_vm0, %v5723_v32, 0.0 }
   0xe   :  { %3180 = vmatpush3.msra.mxu0 %v3515_v26  ;;  %3215 = vmatpush3.msra.mxu1 %v3515_v26  ;;  %v109_v12 = vadd.f32 %v108_v18, %v107_v17  ;;  %v3657_v17 = vld [vmem:[%s5708_s1 + $0x30] sm:$0xff]  ;;  %v102_v18 = vadd.f32 %v101_v59, %v100_v62  ;;  %v116_v30 = vsel %vm97_vm0, %v81_v37, 0.0  ;;  %v117_v31 = vsel %vm97_vm0, %v5727_v38, 0.0 }
   0xf   :  { %3181 = vmatprep.subr.mxu0 %v3347_v1  ;;  %3216 = vmatprep.subr.mxu1 %v3347_v1  ;;  %v119_v32 = vsel %vm97_vm0, %v5726_v42, 0.0 }
  0x10   :  { %3182 = vmatpush3.msra.mxu0 %v3600_v51  ;;  %3217 = vmatpush3.msra.mxu1 %v3600_v51 }
  0x11   :  { %3183 = vmatprep.subr.mxu0 %v3347_v1  ;;  %3218 = vmatprep.subr.mxu1 %v3347_v1 }
  0x12   :  { %14 = vsyncpa [#allocation3], 0  ;;  %3184 = vmatpush3.msra.mxu0 %v3630_v61  ;;  %3219 = vmatpush3.msra.mxu1 %v3630_v61  ;;  %v111_v25 = vadd.f32 %v110_v56, %v109_v12  ;;  %v118_v19 = vadd.f32 %v117_v31, %v116_v30  ;;  %v121_v59 = vsel %vm97_vm0, %v5729_v43, 0.0  ;;  %v123_v62 = vsel %vm97_vm0, %v5728_v44, 0.0  ;;  %v3681_v42 = vld [vmem:[%s5708_s1 + $0x28] sm:$0xff]  ;;  %v3771_v6 = vld [vmem:[%s5708_s1] sm:$0xff] }
  0x13   :  { %3185 = vmatprep.subr.mxu0 %v3347_v1  ;;  %3220 = vmatprep.subr.mxu1 %v3347_v1  ;;  %v104_v38 = vadd.f32 %v103_v60, %v102_v18  ;;  %v125_v12 = vsel %vm97_vm0, %v89_v49, 0.0  ;;  %v126_v30 = vsel %vm97_vm0, %v5730_v50, 0.0  ;;  %v128_v31 = vsel %vm97_vm0, %v5731_v53, 0.0  ;;  %v3702_v50 = vld [vmem:[%s5708_s1 + $0x20] sm:$0xff]  ;;  %s3350_s13 = smov [#allocation2]  }
  0x14   :  { %3186 = vmatpush3.msra.mxu0 %v3657_v17  ;;  %3221 = vmatpush3.msra.mxu1 %v3657_v17  ;;  %v113_v56 = vadd.f32 %v112_v58, %v111_v25  ;;  %v120_v44 = vadd.f32 %v119_v32, %v118_v19  ;;  %v127_v43 = vadd.f32 %v126_v30, %v125_v12  ;;  %v130_v18 = vsel %vm97_vm0, %v5732_v54, 0.0 }
  0x15   :  { %3187 = vmatprep.subr.mxu0 %v3347_v1  ;;  %3222 = vmatprep.subr.mxu1 %v3347_v1  ;;  %v106_v53 = vadd.f32 %v105_v63, %v104_v38  ;;  %v132_v25 = vsel %vm97_vm0, %v5735_v55, 0.0  ;;  %v247_v19 = vadd.f32 %v105_v63, %v103_v60  ;;  %v248_v32 = vsel %vm97_vm0, %v5733_v23, 0.0  ;;  %v3720_v60 = vld [vmem:[%s5708_s1 + $0x18] sm:$0xff] }
  0x16   :  { %3188 = vmatpush3.msra.mxu0 %v3681_v42  ;;  %3223 = vmatpush3.msra.mxu1 %v3681_v42  ;;  %v115_v12 = vadd.f32 %v114_v24, %v113_v56  ;;  %v122_v30 = vadd.f32 %v121_v59, %v120_v44  ;;  %v129_v54 = vadd.f32 %v128_v31, %v127_v43  ;;  %v255_v38 = vsel %vm97_vm0, %v5734_v36, 0.0 }
  0x17   :  { %3189 = vmatprep.subr.mxu0 %v3347_v1  ;;  %3224 = vmatprep.subr.mxu1 %v3347_v1  ;;  %v134_v63 = vsel %vm97_vm0, %v106_v53, 0.0  ;;  %v3723_v23 = vadd.f32 %v248_v32, %v247_v19  ;;  %v254_v56 = vadd.f32 %v114_v24, %v112_v58  ;;  %v261_v44 = vadd.f32 %v123_v62, %v121_v59  ;;  %v3733_v53 = vld [vmem:[%s5708_s1 + $0x10] sm:$0xff] }
  0x18   :  { %3190 = vmatpush3.msra.mxu0 %v3702_v50  ;;  %3225 = vmatpush3.msra.mxu1 %v3702_v50  ;;  %v124_v43 = vadd.f32 %v123_v62, %v122_v30  ;;  %v131_v31 = vadd.f32 %v130_v18, %v129_v54  ;;  %v135_v36 = vrot.slane %v134_v63, 4  ;;  %v141_v55 = vsel %vm97_vm0, %v115_v12, 0.0  ;;  %v3750_v30 = vld [vmem:[%s5708_s1 + $0x8] sm:$0xff] }
  0x19   :  { %3191 = vmatprep.subr.mxu0 %v3347_v1  ;;  %3226 = vmatprep.subr.mxu1 %v3347_v1  ;;  %v142_v24 = vrot.slane %v141_v55, 4  ;;  %v3735_v58 = vadd.f32 %v255_v38, %v254_v56  ;;  %v262_v59 = vsel %vm97_vm0, %v5737_v48, 0.0  ;;  %v268_v54 = vadd.f32 %v132_v25, %v130_v18 }
  0x1a   :  { %3192 = vmatpush3.msra.mxu0 %v3720_v60  ;;  %3227 = vmatpush3.msra.mxu1 %v3720_v60  ;;  %v133_v62 = vadd.f32 %v132_v25, %v131_v31  ;;  %v136_v19 = vadd.f32 %v135_v36, %v134_v63  ;;  %v148_v32 = vsel %vm97_vm0, %v124_v43, 0.0  ;;  %v3743_v12 = vadd.f32 %v262_v59, %v261_v44 }
  0x1b   :  { %3193 = vmatprep.subr.mxu0 %v3347_v1  ;;  %3228 = vmatprep.subr.mxu1 %v3347_v1  ;;  %v143_v18 = vadd.f32 %v142_v24, %v141_v55  ;;  %v149_v38 = vrot.slane %v148_v32, 4  ;;  %v269_v25 = vsel %vm97_vm0, %v5736_v57, 0.0  ;;  %v167_v36 = vsel %vm166_vm1, %v65_v11, 0.0 }
  0x1c   :  { %3194 = vmatpush3.msra.mxu0 %v3733_v53  ;;  %3229 = vmatpush3.msra.mxu1 %v3733_v53  ;;  %v137_v63 = vrot.slane %v136_v19, 2  ;;  %v155_v56 = vsel %vm97_vm0, %v133_v62, 0.0  ;;  %v3761_v44 = vadd.f32 %v269_v25, %v268_v54  ;;  %vm399_vm2 = vcmask 1041409  }
  0x1d   :  { %v5738_v55 = vmax.f32 %v3444_v7, 0.0  ;;  %3195 = vmatprep.subr.mxu0 %v3347_v1  ;;  %3230 = vmatprep.subr.mxu1 %v3347_v1  ;;  %v144_v11 = vrot.slane %v143_v18, 2  ;;  %v150_v31 = vadd.f32 %v149_v38, %v148_v32  ;;  %v156_v24 = vrot.slane %v155_v56, 4 }
  0x1e   :  { %3196 = vmatpush3.msra.mxu0 %v3750_v30  ;;  %3231 = vmatpush3.msra.mxu1 %v3750_v30  ;;  %v138_v7 = vadd.f32 %v137_v63, %v136_v19  ;;  %vm401_vm3 = vcmask 1042434   ;;  %v5739_v54 = vmax.f32 %v3451_v8, 0.0  ;;  %v5740_v25 = vmax.f32 %v3456_v9, 0.0 }
  0x1f   :  { %v168_v43 = vsel %vm166_vm1, %v5738_v55, 0.0  ;;  %v5741_v57 = vmax.f32 %v3461_v10, 0.0  ;;  %3197 = vmatprep.subr.mxu0 %v3347_v1  ;;  %3232 = vmatprep.subr.mxu1 %v3347_v1  ;;  %v145_v38 = vadd.f32 %v144_v11, %v143_v18  ;;  %v151_v19 = vrot.slane %v150_v31, 2 }
  0x20   :  { %v169_v59 = vadd.f32 %v168_v43, %v167_v36  ;;  %v170_v62 = vsel %vm166_vm1, %v5739_v54, 0.0  ;;  %v3781_v55 = vsel %vm166_vm1, %v5740_v25, 0.0  ;;  %v157_v36 = vadd.f32 %v156_v24, %v155_v56  ;;  %3198 = vmatpush3.msra.mxu0 %v3771_v6  ;;  %3233 = vmatpush3.msra.mxu1 %v3771_v6 }
  0x21   :  { %v174_v32 = vsel %vm166_vm1, %v5741_v57, 0.0  ;;  %vm3348_vm4 = vmmov 0   ;;  %v139_v8 = vrot.slane %v138_v7, 1  ;;  %vm403_vm5 = vcmask 1043459   ;;  %3237 = vmatprep.subr.mxu0 %v3347_v1  ;;  %3272 = vmatprep.subr.mxu1 %v3347_v1 }
  0x22   :  { %v171_v63 = vadd.f32 %v170_v62, %v169_v59  ;;  %3199 = vmatprep.mubr.msk.f32.mxu0 %vm3348_vm4, %v3347_v1  ;;  %v5742_v9 = vmax.f32 %v3480_v15, 0.0  ;;  %v5743_v57 = vmax.f32 %v3485_v16, 0.0  ;;  %v5744_v18 = vmax.f32 %v3495_v20, 0.0  ;;  %3234 = vmatprep.mubr.msk.f32.mxu1 %vm3348_vm4, %v3347_v1 }
  0x23   :  { %v146_v11 = vrot.slane %v145_v38, 1  ;;  %v152_v24 = vadd.f32 %v151_v19, %v150_v31  ;;  %v158_v59 = vrot.slane %v157_v36, 2  ;;  %v140_v54 = vadd.f32 %v139_v8, %v138_v7 }
  0x24   :  { %v176_v10 = vsel %vm166_vm1, %v5742_v9, 0.0  ;;  %v177_v43 = vsel %vm166_vm1, %v5743_v57, 0.0  ;;  %v179_v56 = vsel %vm166_vm1, %v5744_v18, 0.0  ;;  %v173_v15 = vadd.f32 %v3781_v55, %v171_v63 }
  0x25   :  { %v178_v62 = vadd.f32 %v177_v43, %v176_v10  ;;  %v5745_v16 = vmax.f32 %v3500_v21, 0.0  ;;  %v5746_v20 = vmax.f32 %v3505_v22, 0.0  ;;  %v147_v57 = vadd.f32 %v146_v11, %v145_v38 }
  0x26   :  { %v153_v18 = vrot.slane %v152_v24, 1  ;;  %v159_v31 = vadd.f32 %v158_v59, %v157_v36  ;;  %v175_v19 = vadd.f32 %v174_v32, %v173_v15  ;;  %v162_v48 = vmul.f32 0.04, %v140_v54 }
  0x27   :  { %v181_v25 = vsel %vm166_vm1, %v5745_v16, 0.0  ;;  %v183_v9 = vsel %vm166_vm1, %v5746_v20, 0.0  ;;  %v180_v63 = vadd.f32 %v179_v56, %v178_v62  ;;  %v185_v21 = vsel %vm166_vm1, %v81_v37, 0.0 }
  0x28   :  { %v5747_v7 = vmax.f32 %v3530_v29, 0.0  ;;  %v154_v8 = vadd.f32 %v153_v18, %v152_v24  ;;  %v160_v10 = vrot.slane %v159_v31, 1  ;;  %v163_v43 = vmul.f32 0.04, %v147_v57 }
  0x29   :  { %v182_v20 = vadd.f32 %v181_v25, %v180_v63  ;;  %v5748_v38 = vmax.f32 %v3540_v33, 0.0  ;;  %v5749_v11 = vmax.f32 %v3545_v34, 0.0  ;;  %v5750_v28 = vmax.f32 %v3550_v35, 0.0 }
  0x2a   :  { %v186_v22 = vsel %vm166_vm1, %v5747_v7, 0.0  ;;  %v161_v29 = vadd.f32 %v160_v10, %v159_v31  ;;  %v164_v59 = vmul.f32 0.04, %v154_v8  ;;  %v400_v24 = vsel %vm399_vm2, %v163_v43, %v162_v48 }
  0x2b   :  { %v187_v16 = vadd.f32 %v186_v22, %v185_v21  ;;  %v188_v36 = vsel %vm166_vm1, %v5748_v38, 0.0  ;;  %v190_v56 = vsel %vm166_vm1, %v5749_v11, 0.0  ;;  %v192_v37 = vsel %vm166_vm1, %v5750_v28, 0.0 }
  0x2c   :  { %v184_v54 = vadd.f32 %v183_v9, %v182_v20  ;;  %v194_v33 = vsel %vm166_vm1, %v89_v49, 0.0  ;;  %v5751_v62 = vmax.f32 %v3570_v41, 0.0  ;;  %v5752_v57 = vmax.f32 %v3580_v45, 0.0 }
  0x2d   :  { %v189_v15 = vadd.f32 %v188_v36, %v187_v16  ;;  %v165_v18 = vmul.f32 0.04, %v161_v29  ;;  %v402_v31 = vsel %vm401_vm3, %v164_v59, %v400_v24  ;;  %v5753_v48 = vmax.f32 %v3585_v46, 0.0 }
  0x2e   :  { %v195_v34 = vsel %vm166_vm1, %v5751_v62, 0.0  ;;  %v197_v35 = vsel %vm166_vm1, %v5752_v57, 0.0  ;;  %v5754_v40 = vmax.f32 %v3590_v47, 0.0  ;;  %v207_v41 = vrot.slane %v175_v19, 3 }
  0x2f   :  { %v191_v63 = vadd.f32 %v190_v56, %v189_v15  ;;  %v196_v21 = vadd.f32 %v195_v34, %v194_v33  ;;  %v199_v7 = vsel %vm166_vm1, %v5753_v48, 0.0  ;;  %v208_v22 = vrot.slane %v184_v54, 3  ;;  %v3883_v34 = vld [vmem:[%s5707_s0 + $0x70] sm:$0xff] }
  0x30   :  { %v201_v49 = vsel %vm166_vm1, %v5754_v40, 0.0  ;;  %v404_v8 = vsel %vm403_vm5, %v165_v18, %v402_v31  ;;  %v307_v43 = vadd.f32 %v174_v32, %v3781_v55  ;;  %v215_v16 = vsel %vm97_vm0, %v207_v41, 0.0  ;;  %v3897_v48 = vld [vmem:[%s5707_s0 + $0xb0] sm:$0xff] }
  0x31   :  { %v193_v45 = vadd.f32 %v192_v37, %v191_v63  ;;  %v198_v10 = vadd.f32 %v197_v35, %v196_v21  ;;  %3200 = vmatmul.mubr.f32.vlgmr.msra.gmra.mxu0 %v404_v8  ;;  %v222_v20 = vsel %vm97_vm0, %v208_v22, 0.0  ;;  %v5755_v46 = vmax.f32 %v3475_v14, 0.0  ;;  %v3892_v21 = vld [vmem:[%s5707_s0 + $0x78] sm:$0xff] }
  0x32   :  { %v314_v47 = vadd.f32 %v183_v9, %v181_v25  ;;  %v216_v19 = vrot.slane %v215_v16, 4  ;;  %v223_v28 = vrot.slane %v222_v20, 4  ;;  %3238 = vmatpush3.msra.mxu0 %v3404_v0  ;;  %3269 = vmatprep.mubr.msk.f32.mxu0 %vm3348_vm4, %v3347_v1  ;;  %v5756_v32 = vmax.f32 %v3520_v27, 0.0  ;;  %v3868_v27 = vld [vmem:[%s5707_s0 + $0x30] sm:$0xff] }
  0x33   :  { %v308_v38 = vsel %vm166_vm1, %v5755_v46, 0.0  ;;  %v200_v36 = vadd.f32 %v199_v7, %v198_v10  ;;  %v209_v11 = vrot.slane %v193_v45, 3  ;;  %v321_v59 = vadd.f32 %v192_v37, %v190_v56  ;;  %3239 = vmatprep.subr.mxu0 %v3347_v1 }
  0x34   :  { %v3854_v55 = vadd.f32 %v308_v38, %v307_v43  ;;  %v315_v29 = vsel %vm166_vm1, %v5756_v32, 0.0  ;;  %v5757_v14 = vmax.f32 %v3560_v39, 0.0  ;;  %v217_v24 = vadd.f32 %v216_v19, %v215_v16  ;;  %3240 = vmatpush3.msra.mxu0 %v3411_v2  ;;  %v3873_v39 = vld [vmem:[%s5707_s0 + $0x38] sm:$0xff] }
  0x35   :  { %v202_v9 = vadd.f32 %v201_v49, %v200_v36  ;;  %v224_v15 = vadd.f32 %v223_v28, %v222_v20  ;;  %v229_v54 = vsel %vm97_vm0, %v209_v11, 0.0  ;;  %v3875_v37 = vadd.f32 %v315_v29, %v314_v47  ;;  %3241 = vmatprep.subr.mxu0 %v3347_v1  ;;  %v3919_v43 = vld [vmem:[%s5707_s0 + $0xf8] sm:$0xff] }
  0x36   :  { %v322_v25 = vsel %vm166_vm1, %v5757_v14, 0.0  ;;  %v230_v56 = vrot.slane %v229_v54, 4  ;;  %v328_v62 = vadd.f32 %v201_v49, %v199_v7  ;;  %v218_v35 = vrot.slane %v217_v24, 2  ;;  %3242 = vmatpush3.msra.mxu0 %v3420_v3  ;;  %v3910_v49 = vld [vmem:[%s5707_s0 + $0xf0] sm:$0xff] }
  0x37   :  { %v3877_v33 = vadd.f32 %v322_v25, %v321_v59  ;;  %v210_v57 = vrot.slane %v202_v9, 3  ;;  %v225_v18 = vrot.slane %v224_v15, 2  ;;  %v5758_v31 = vmax.f32 %v3605_v52, 0.0  ;;  %3243 = vmatprep.subr.mxu0 %v3347_v1  ;;  %v3905_v52 = vld [vmem:[%s5707_s0 + $0xb8] sm:$0xff] }
  0x38   :  { %v231_v7 = vadd.f32 %v230_v56, %v229_v54  ;;  %v71_v41 = vmax.f32 %v3868_v27, 0.0  ;;  %v72_v22 = vmax.f32 %v3873_v39, 0.0  ;;  %v219_v8 = vadd.f32 %v218_v35, %v217_v24  ;;  %3244 = vmatpush3.msra.mxu0 %v3427_v4 }
  0x39   :  { %v329_v63 = vsel %vm166_vm1, %v5758_v31, 0.0  ;;  %v226_v45 = vadd.f32 %v225_v18, %v224_v15  ;;  %v236_v10 = vsel %vm97_vm0, %v210_v57, 0.0  ;;  %v79_v16 = vmax.f32 %v3883_v34, 0.0  ;;  %3245 = vmatprep.subr.mxu0 %v3347_v1 }
  0x3a   :  { %v3899_v40 = vadd.f32 %v329_v63, %v328_v62  ;;  %v232_v20 = vrot.slane %v231_v7, 2  ;;  %v237_v46 = vrot.slane %v236_v10, 4  ;;  %v80_v38 = vmax.f32 %v3892_v21, 0.0  ;;  %3246 = vmatpush3.msra.mxu0 %v3434_v5 }
  0x3b   :  { %v87_v47 = vmax.f32 %v3897_v48, 0.0  ;;  %v220_v36 = vrot.slane %v219_v8, 1  ;;  %v227_v11 = vrot.slane %v226_v45, 1  ;;  %v88_v19 = vmax.f32 %v3905_v52, 0.0  ;;  %3247 = vmatprep.subr.mxu0 %v3347_v1 }
  0x3c   :  { %v95_v28 = vmax.f32 %v3910_v49, 0.0  ;;  %v233_v32 = vadd.f32 %v232_v20, %v231_v7  ;;  %v238_v29 = vadd.f32 %v237_v46, %v236_v10  ;;  %v96_v59 = vmax.f32 %v3919_v43, 0.0  ;;  %3248 = vmatpush3.msra.mxu0 %v3470_v13 }
  0x3d   :  { %v250_v14 = vsel %vm97_vm0, %v71_v41, 0.0  ;;  %v221_v25 = vadd.f32 %v220_v36, %v219_v8  ;;  %v228_v9 = vadd.f32 %v227_v11, %v226_v45  ;;  %v252_v15 = vsel %vm97_vm0, %v72_v22, 0.0  ;;  %3249 = vmatprep.subr.mxu0 %v3347_v1 }
  0x3e   :  { %v251_v24 = vadd.f32 %v250_v14, %v3723_v23  ;;  %v234_v54 = vrot.slane %v233_v32, 1  ;;  %v239_v27 = vrot.slane %v238_v29, 2  ;;  %v257_v56 = vsel %vm97_vm0, %v79_v16, 0.0  ;;  %3250 = vmatpush3.msra.mxu0 %v3515_v26 }
  0x3f   :  { %v259_v62 = vsel %vm97_vm0, %v80_v38, 0.0  ;;  %v243_v57 = vmul.f32 0.04, %v221_v25  ;;  %v244_v35 = vmul.f32 0.04, %v228_v9  ;;  %v258_v18 = vadd.f32 %v257_v56, %v3735_v58  ;;  %3251 = vmatprep.subr.mxu0 %v3347_v1 }
  0x40   :  { %v253_v23 = vadd.f32 %v252_v15, %v251_v24  ;;  %v235_v31 = vadd.f32 %v234_v54, %v233_v32  ;;  %v240_v63 = vadd.f32 %v239_v27, %v238_v29  ;;  %v264_v7 = vsel %vm97_vm0, %v87_v47, 0.0  ;;  %3252 = vmatpush3.msra.mxu0 %v3600_v51 }
  0x41   :  { %v266_v8 = vsel %vm97_vm0, %v88_v19, 0.0  ;;  %v480_v45 = vsel %vm399_vm2, %v244_v35, %v243_v57  ;;  %v260_v10 = vadd.f32 %v259_v62, %v258_v18  ;;  %v265_v20 = vadd.f32 %v264_v7, %v3743_v12  ;;  %3253 = vmatprep.subr.mxu0 %v3347_v1 }
  0x42   :  { %v271_v58 = vsel %vm97_vm0, %v95_v28, 0.0  ;;  %v241_v46 = vrot.slane %v240_v63, 1  ;;  %v245_v36 = vmul.f32 0.04, %v235_v31  ;;  %v273_v32 = vsel %vm97_vm0, %v96_v59, 0.0  ;;  %3254 = vmatpush3.msra.mxu0 %v3630_v61 }
  0x43   :  { %v272_v11 = vadd.f32 %v271_v58, %v3761_v44  ;;  %v267_v29 = vadd.f32 %v266_v8, %v265_v20  ;;  %v275_v14 = vsel %vm97_vm0, %v253_v23, 0.0  ;;  %v282_v12 = vsel %vm97_vm0, %v260_v10, 0.0  ;;  %3255 = vmatprep.subr.mxu0 %v3347_v1 }
  0x44   :  { %v310_v25 = vsel %vm166_vm1, %v71_v41, 0.0  ;;  %v242_v9 = vadd.f32 %v241_v46, %v240_v63  ;;  %v481_v24 = vsel %vm401_vm3, %v245_v36, %v480_v45  ;;  %v276_v44 = vrot.slane %v275_v14, 4  ;;  %3256 = vmatpush3.msra.mxu0 %v3657_v17 }
  0x45   :  { %v274_v15 = vadd.f32 %v273_v32, %v272_v11  ;;  %v283_v54 = vrot.slane %v282_v12, 4  ;;  %v289_v27 = vsel %vm97_vm0, %v267_v29, 0.0  ;;  %v311_v56 = vadd.f32 %v310_v25, %v3854_v55  ;;  %3257 = vmatprep.subr.mxu0 %v3347_v1 }
  0x46   :  { %v312_v62 = vsel %vm166_vm1, %v72_v22, 0.0  ;;  %v246_v57 = vmul.f32 0.04, %v242_v9  ;;  %v277_v41 = vadd.f32 %v276_v44, %v275_v14  ;;  %v290_v35 = vrot.slane %v289_v27, 4  ;;  %3258 = vmatpush3.msra.mxu0 %v3681_v42 }
  0x47   :  { %v296_v23 = vsel %vm97_vm0, %v274_v15, 0.0  ;;  %v284_v18 = vadd.f32 %v283_v54, %v282_v12  ;;  %v313_v63 = vadd.f32 %v312_v62, %v311_v56  ;;  %v317_v55 = vsel %vm166_vm1, %v79_v16, 0.0  ;;  %3259 = vmatprep.subr.mxu0 %v3347_v1 }
  0x48   :  { %v297_v31 = vrot.slane %v296_v23, 4  ;;  %v482_v39 = vsel %vm403_vm5, %v246_v57, %v481_v24  ;;  %v278_v22 = vrot.slane %v277_v41, 2  ;;  %v291_v7 = vadd.f32 %v290_v35, %v289_v27  ;;  %3260 = vmatpush3.msra.mxu0 %v3702_v50 }
  0x49   :  { %v318_v8 = vadd.f32 %v317_v55, %v3875_v37  ;;  %3235 = vmatmul.mubr.f32.vlgmr.msra.gmra.mxu1 %v482_v39  ;;  %v285_v45 = vrot.slane %v284_v18, 2  ;;  %v319_v20 = vsel %vm166_vm1, %v80_v38, 0.0  ;;  %v324_v34 = vsel %vm166_vm1, %v87_v47, 0.0  ;;  %3261 = vmatprep.subr.mxu0 %v3347_v1 }
  0x4a   :  { %v298_v10 = vadd.f32 %v297_v31, %v296_v23  ;;  %3273 = vmatpush3.msra.mxu1 %v3404_v0  ;;  %v279_v16 = vadd.f32 %v278_v22, %v277_v41  ;;  %v292_v58 = vrot.slane %v291_v7, 2  ;;  %v325_v46 = vadd.f32 %v324_v34, %v3877_v33  ;;  %3262 = vmatpush3.msra.mxu0 %v3720_v60 }
  0x4b   :  { %v320_v37 = vadd.f32 %v319_v20, %v318_v8  ;;  %3274 = vmatprep.subr.mxu1 %v3347_v1  ;;  %v286_v21 = vadd.f32 %v285_v45, %v284_v18  ;;  %v326_v48 = vsel %vm166_vm1, %v88_v19, 0.0  ;;  %v331_v0 = vsel %vm166_vm1, %v95_v28, 0.0  ;;  %3263 = vmatprep.subr.mxu0 %v3347_v1 }
  0x4c   :  { %v299_v36 = vrot.slane %v298_v10, 2  ;;  %3275 = vmatpush3.msra.mxu1 %v3411_v2  ;;  %v280_v38 = vrot.slane %v279_v16, 1  ;;  %v293_v33 = vadd.f32 %v292_v58, %v291_v7  ;;  %v327_v47 = vadd.f32 %v326_v48, %v325_v46  ;;  %3264 = vmatpush3.msra.mxu0 %v3733_v53 }
  0x4d   :  { %v332_v11 = vadd.f32 %v331_v0, %v3899_v40  ;;  %3276 = vmatprep.subr.mxu1 %v3347_v1  ;;  %v287_v52 = vrot.slane %v286_v21, 1  ;;  %v333_v49 = vsel %vm166_vm1, %v96_v59, 0.0  ;;  %v339_v19 = vrot.slane %v313_v63, 3  ;;  %3265 = vmatprep.subr.mxu0 %v3347_v1 }
  0x4e   :  { %v300_v32 = vadd.f32 %v299_v36, %v298_v10  ;;  %3277 = vmatpush3.msra.mxu1 %v3420_v3  ;;  %v281_v2 = vadd.f32 %v280_v38, %v279_v16  ;;  %v294_v28 = vrot.slane %v293_v33, 1  ;;  %v340_v14 = vrot.slane %v320_v37, 3  ;;  %3266 = vmatpush3.msra.mxu0 %v3750_v30 }
  0x4f   :  { %v334_v29 = vadd.f32 %v333_v49, %v332_v11  ;;  %3278 = vmatprep.subr.mxu1 %v3347_v1  ;;  %v288_v40 = vadd.f32 %v287_v52, %v286_v21  ;;  %v341_v25 = vrot.slane %v327_v47, 3  ;;  %v347_v43 = vsel %vm97_vm0, %v339_v19, 0.0  ;;  %3267 = vmatprep.subr.mxu0 %v3347_v1  ;;  %v2792_v47 = vld [vmem:[%s5711_s4 + $0x5b8] sm:$0xff]  ;;  %v2789_v11 = vld [vmem:[%s5711_s4 + $0x5a0] sm:$0xff]  ;;  %v2791_v52 = vld [vmem:[%s5711_s4 + $0x5b0] sm:$0xff] }
  0x50   :  { %v301_v12 = vrot.slane %v300_v32, 1  ;;  %3279 = vmatpush3.msra.mxu1 %v3427_v4  ;;  %v295_v3 = vadd.f32 %v294_v28, %v293_v33  ;;  %v303_v59 = vmul.f32 0.04, %v281_v2  ;;  %v348_v24 = vrot.slane %v347_v43, 4  ;;  %3268 = vmatpush3.msra.mxu0 %v3771_v6  ;;  %v2786_v49 = vld [vmem:[%s5711_s4 + $0x588] sm:$0xff]  ;;  %v2783_v19 = vld [vmem:[%s5711_s4 + $0x570] sm:$0xff] }
  0x51   :  { %v342_v9 = vrot.slane %v334_v29, 3  ;;  %3280 = vmatprep.subr.mxu1 %v3347_v1  ;;  %v304_v44 = vmul.f32 0.04, %v288_v40  ;;  %v354_v54 = vsel %vm97_vm0, %v340_v14, 0.0  ;;  %v361_v27 = vsel %vm97_vm0, %v341_v25, 0.0  ;;  %3304 = vmatprep.mubr.msk.f32.mxu1 %vm3348_vm4, %v3347_v1  ;;  %v2785_v2 = vld [vmem:[%s5711_s4 + $0x580] sm:$0xff] }
  0x52   :  { %v302_v15 = vadd.f32 %v301_v12, %v300_v32  ;;  %3281 = vmatpush3.msra.mxu1 %v3434_v5  ;;  %v305_v4 = vmul.f32 0.04, %v295_v3  ;;  %v349_v56 = vadd.f32 %v348_v24, %v347_v43  ;;  %v355_v62 = vrot.slane %v354_v54, 4  ;;  %v2784_v32 = vld [vmem:[%s5711_s4 + $0x578] sm:$0xff]  ;;  %v2778_v28 = vld [vmem:[%s5711_s4 + $0x548] sm:$0xff]  ;;  %v2777_v14 = vld [vmem:[%s5711_s4 + $0x540] sm:$0xff] }
  0x53   :  { %v362_v57 = vrot.slane %v361_v27, 4  ;;  %3282 = vmatprep.subr.mxu1 %v3347_v1  ;;  %v558_v35 = vsel %vm399_vm2, %v304_v44, %v303_v59  ;;  %v368_v23 = vsel %vm97_vm0, %v342_v9, 0.0  ;;  %v2780_v29 = vld [vmem:[%s5711_s4 + $0x558] sm:$0xff]  ;;  %v2779_v40 = vld [vmem:[%s5711_s4 + $0x550] sm:$0xff]  ;;  %v2774_v25 = vld [vmem:[%s5711_s4 + $0x528] sm:$0xff]  ;;  %vm710_vm6 = vcmask 1043456  }
  0x54   :  { %v306_v41 = vmul.f32 0.04, %v302_v15  ;;  %3283 = vmatpush3.msra.mxu1 %v3470_v13  ;;  %v559_v18 = vsel %vm401_vm3, %v305_v4, %v558_v35  ;;  %v350_v31 = vrot.slane %v349_v56, 2  ;;  %v356_v5 = vadd.f32 %v355_v62, %v354_v54  ;;  %v2772_v12 = vld [vmem:[%s5711_s4 + $0x518] sm:$0xff]  ;;  %v2771_v43 = vld [vmem:[%s5711_s4 + $0x510] sm:$0xff]  ;;  %v2773_v3 = vld [vmem:[%s5711_s4 + $0x520] sm:$0xff] }
  0x55   :  { %v363_v63 = vadd.f32 %v362_v57, %v361_v27  ;;  %3284 = vmatprep.subr.mxu1 %v3347_v1  ;;  %v369_v39 = vrot.slane %v368_v23, 4  ;;  %v2766_v59 = vld [vmem:[%s5711_s4 + $0x4e8] sm:$0xff]  ;;  %v2768_v9 = vld [vmem:[%s5711_s4 + $0x4f8] sm:$0xff]  ;;  %v2765_v24 = vld [vmem:[%s5711_s4 + $0x4e0] sm:$0xff] }
  0x56   :  { %v560_v55 = vsel %vm403_vm5, %v306_v41, %v559_v18  ;;  %3285 = vmatpush3.msra.mxu1 %v3515_v26  ;;  %v351_v22 = vadd.f32 %v350_v31, %v349_v56  ;;  %v357_v7 = vrot.slane %v356_v5, 2  ;;  %v2767_v15 = vld [vmem:[%s5711_s4 + $0x4f0] sm:$0xff]  ;;  %v2760_v44 = vld [vmem:[%s5711_s4 + $0x4b8] sm:$0xff]  ;;  %v2762_v54 = vld [vmem:[%s5711_s4 + $0x4c8] sm:$0xff] }
  0x57   :  { %3270 = vmatmul.mubr.f32.vlgmr.msra.gmra.mxu0 %v560_v55  ;;  %v364_v8 = vrot.slane %v363_v63, 2  ;;  %3286 = vmatprep.subr.mxu1 %v3347_v1  ;;  %v370_v45 = vadd.f32 %v369_v39, %v368_v23  ;;  %v2759_v27 = vld [vmem:[%s5711_s4 + $0x4b0] sm:$0xff]  ;;  %v2761_v4 = vld [vmem:[%s5711_s4 + $0x4c0] sm:$0xff]  ;;  %v2754_v56 = vld [vmem:[%s5711_s4 + $0x488] sm:$0xff] }
  0x58   :  { %1072 = vmatprep.mubr.f32.mxu0 %v3347_v1  ;;  %3287 = vmatpush3.msra.mxu1 %v3600_v51  ;;  %v352_v13 = vrot.slane %v351_v22, 1  ;;  %v358_v10 = vadd.f32 %v357_v7, %v356_v5  ;;  %v2756_v62 = vld [vmem:[%s5711_s4 + $0x498] sm:$0xff]  ;;  %v2753_v57 = vld [vmem:[%s5711_s4 + $0x480] sm:$0xff]  ;;  %v2755_v41 = vld [vmem:[%s5711_s4 + $0x490] sm:$0xff] }
  0x59   :  { %v365_v20 = vadd.f32 %v364_v8, %v363_v63  ;;  %3288 = vmatprep.subr.mxu1 %v3347_v1  ;;  %v371_v34 = vrot.slane %v370_v45, 2  ;;  %v2748_v35 = vld [vmem:[%s5711_s4 + $0x458] sm:$0xff]  ;;  %v2750_v23 = vld [vmem:[%s5711_s4 + $0x468] sm:$0xff]  ;;  %v2747_v18 = vld [vmem:[%s5711_s4 + $0x450] sm:$0xff] }
  0x5a   :  { %3289 = vmatpush3.msra.mxu1 %v3630_v61  ;;  %v353_v26 = vadd.f32 %v352_v13, %v351_v22  ;;  %v359_v16 = vrot.slane %v358_v10, 1  ;;  %v2749_v31 = vld [vmem:[%s5711_s4 + $0x460] sm:$0xff]  ;;  %v2742_v5 = vld [vmem:[%s5711_s4 + $0x428] sm:$0xff]  ;;  %v2744_v63 = vld [vmem:[%s5711_s4 + $0x438] sm:$0xff] }
  0x5b   :  { %v366_v58 = vrot.slane %v365_v20, 1  ;;  %3290 = vmatprep.subr.mxu1 %v3347_v1  ;;  %v372_v37 = vadd.f32 %v371_v34, %v370_v45  ;;  %v2741_v55 = vld [vmem:[%s5711_s4 + $0x420] sm:$0xff]  ;;  %v2743_v39 = vld [vmem:[%s5711_s4 + $0x430] sm:$0xff]  ;;  %v2736_v22 = vld [vmem:[%s5711_s4 + $0x3f8] sm:$0xff] }
  0x5c   :  { %3291 = vmatpush3.msra.mxu1 %v3657_v17  ;;  %v360_v46 = vadd.f32 %v359_v16, %v358_v10  ;;  %v375_v36 = vmul.f32 0.04, %v353_v26  ;;  %v2738_v7 = vld [vmem:[%s5711_s4 + $0x408] sm:$0xff]  ;;  %v2735_v8 = vld [vmem:[%s5711_s4 + $0x3f0] sm:$0xff]  ;;  %v2737_v45 = vld [vmem:[%s5711_s4 + $0x400] sm:$0xff] }
  0x5d   :  { %v367_v21 = vadd.f32 %v366_v58, %v365_v20  ;;  %3292 = vmatprep.subr.mxu1 %v3347_v1  ;;  %v373_v51 = vrot.slane %v372_v37, 1  ;;  %v2730_v13 = vld [vmem:[%s5711_s4 + $0x3c8] sm:$0xff]  ;;  %v2732_v10 = vld [vmem:[%s5711_s4 + $0x3d8] sm:$0xff]  ;;  %v2729_v20 = vld [vmem:[%s5711_s4 + $0x3c0] sm:$0xff] }
  0x5e   :  { %3293 = vmatpush3.msra.mxu1 %v3681_v42  ;;  %v376_v48 = vmul.f32 0.04, %v360_v46  ;;  %v2731_v34 = vld [vmem:[%s5711_s4 + $0x3d0] sm:$0xff]  ;;  %v2724_v26 = vld [vmem:[%s5711_s4 + $0x398] sm:$0xff]  ;;  %v2726_v16 = vld [vmem:[%s5711_s4 + $0x3a8] sm:$0xff] }
  0x5f   :  { %3294 = vmatprep.subr.mxu1 %v3347_v1  ;;  %v374_v61 = vadd.f32 %v373_v51, %v372_v37  ;;  %v377_v0 = vmul.f32 0.04, %v367_v21  ;;  %v2723_v58 = vld [vmem:[%s5711_s4 + $0x390] sm:$0xff]  ;;  %v2725_v37 = vld [vmem:[%s5711_s4 + $0x3a0] sm:$0xff]  ;;  %v2718_v46 = vld [vmem:[%s5711_s4 + $0x368] sm:$0xff] }
  0x60   :  { %3295 = vmatpush3.msra.mxu1 %v3702_v50  ;;  %v636_v38 = vsel %vm399_vm2, %v376_v48, %v375_v36  ;;  %v2796_v50 = vld [vmem:[%s5711_s4 + $0x5d8] sm:$0xff]  ;;  %v2717_v36 = vld [vmem:[%s5711_s4 + $0x360] sm:$0xff]  ;;  %v2719_v51 = vld [vmem:[%s5711_s4 + $0x370] sm:$0xff] }
  0x61   :  { %3296 = vmatprep.subr.mxu1 %v3347_v1  ;;  %v378_v17 = vmul.f32 0.04, %v374_v61  ;;  %v637_v33 = vsel %vm401_vm3, %v377_v0, %v636_v38  ;;  %1008 = vmatprep.subr.mxu0 %v2796_v50  ;;  %v2720_v21 = vld [vmem:[%s5711_s4 + $0x378] sm:$0xff]  ;;  %v2714_v61 = vld [vmem:[%s5711_s4 + $0x348] sm:$0xff]  ;;  %v2711_v0 = vld [vmem:[%s5711_s4 + $0x330] sm:$0xff] }
  0x62   :  { %3297 = vmatpush3.msra.mxu1 %v3720_v60  ;;  %v2798_v60 = vld [vmem:[%s5711_s4 + $0x5e8] sm:$0xff]  ;;  %v2712_v48 = vld [vmem:[%s5711_s4 + $0x338] sm:$0xff]  ;;  %v2713_v38 = vld [vmem:[%s5711_s4 + $0x340] sm:$0xff] }
  0x63   :  { %3298 = vmatprep.subr.mxu1 %v3347_v1  ;;  %v638_v42 = vsel %vm403_vm5, %v378_v17, %v637_v33  ;;  %v2706_v17 = vld [vmem:[%s5711_s4 + $0x308] sm:$0xff]  ;;  %v2708_v33 = vld [vmem:[%s5711_s4 + $0x318] sm:$0xff]  ;;  %v2707_v50 = vld [vmem:[%s5711_s4 + $0x310] sm:$0xff] }
  0x64   :  { %3299 = vmatpush3.msra.mxu1 %v3733_v53  ;;  %v2795_v53 = vld [vmem:[%s5711_s4 + $0x5d0] sm:$0xff] }
  0x65   :  { %3300 = vmatprep.subr.mxu1 %v3347_v1  ;;  %1009 = vmatpush1.msra.mxu0 %v2795_v53  ;;  %v906_v53 = vld [vmem:[%s5711_s4 + $0x2d8] sm:$0xff] }
  0x66   :  { %3301 = vmatpush3.msra.mxu1 %v3750_v30  ;;  %v2797_v30 = vld [vmem:[%s5711_s4 + $0x5e0] sm:$0xff] }
  0x67   :  { %3302 = vmatprep.subr.mxu1 %v3347_v1 }
  0x68   :  { %3303 = vmatpush3.msra.mxu1 %v3771_v6  ;;  %v2790_v6 = vld [vmem:[%s5711_s4 + $0x5a8] sm:$0xff] }
  0x69   :  { %3305 = vmatmul.mubr.f32.vlgmr.msra.gmra.mxu1 %v638_v42  ;;  %1079 = vmatprep.subr.mxu1 %v2798_v60  ;;  %v2705_v42 = vld [vmem:[%s5711_s4 + $0x300] sm:$0xff]  ;;  %v2800_v60 = vld [vmem:[%s5711_s4 + $0x5f8] sm:$0xff] }
  0x6a   :  { %1143 = vmatprep.mubr.f32.mxu1 %v3347_v1  ;;  %1080 = vmatpush1.msra.mxu1 %v2797_v30 }
  0x6b   :  { %1010 = vmatprep.subr.mxu0 %v2790_v6  ;;  %1081 = vmatprep.subr.mxu1 %v2792_v47 }
  0x6c   :  { %1011 = vmatpush1.msra.mxu0 %v2789_v11  ;;  %1082 = vmatpush1.msra.mxu1 %v2791_v52 }
  0x6d   :  { %1012 = vmatprep.subr.mxu0 %v2784_v32  ;;  %1083 = vmatprep.subr.mxu1 %v2786_v49 }
  0x6e   :  { %1013 = vmatpush1.msra.mxu0 %v2783_v19  ;;  %1084 = vmatpush1.msra.mxu1 %v2785_v2 }
  0x6f   :  { %1014 = vmatprep.subr.mxu0 %v2778_v28  ;;  %1085 = vmatprep.subr.mxu1 %v2780_v29 }
  0x70   :  { %1015 = vmatpush1.msra.mxu0 %v2777_v14  ;;  %1086 = vmatpush1.msra.mxu1 %v2779_v40 }
  0x71   :  { %1016 = vmatprep.subr.mxu0 %v2772_v12  ;;  %1087 = vmatprep.subr.mxu1 %v2774_v25 }
  0x72   :  { %1017 = vmatpush1.msra.mxu0 %v2771_v43  ;;  %1088 = vmatpush1.msra.mxu1 %v2773_v3 }
  0x73   :  { %1018 = vmatprep.subr.mxu0 %v2766_v59  ;;  %1089 = vmatprep.subr.mxu1 %v2768_v9 }
  0x74   :  { %1019 = vmatpush1.msra.mxu0 %v2765_v24  ;;  %1090 = vmatpush1.msra.mxu1 %v2767_v15 }
  0x75   :  { %1020 = vmatprep.subr.mxu0 %v2760_v44  ;;  %1091 = vmatprep.subr.mxu1 %v2762_v54 }
  0x76   :  { %1021 = vmatpush1.msra.mxu0 %v2759_v27  ;;  %1092 = vmatpush1.msra.mxu1 %v2761_v4 }
  0x77   :  { %1022 = vmatprep.subr.mxu0 %v2754_v56  ;;  %1093 = vmatprep.subr.mxu1 %v2756_v62 }
  0x78   :  { %1023 = vmatpush1.msra.mxu0 %v2753_v57  ;;  %1094 = vmatpush1.msra.mxu1 %v2755_v41 }
  0x79   :  { %1024 = vmatprep.subr.mxu0 %v2748_v35  ;;  %1095 = vmatprep.subr.mxu1 %v2750_v23 }
  0x7a   :  { %1025 = vmatpush1.msra.mxu0 %v2747_v18  ;;  %1096 = vmatpush1.msra.mxu1 %v2749_v31 }
  0x7b   :  { %1026 = vmatprep.subr.mxu0 %v2742_v5  ;;  %1097 = vmatprep.subr.mxu1 %v2744_v63 }
  0x7c   :  { %1027 = vmatpush1.msra.mxu0 %v2741_v55  ;;  %1098 = vmatpush1.msra.mxu1 %v2743_v39 }
  0x7d   :  { %1028 = vmatprep.subr.mxu0 %v2736_v22  ;;  %1099 = vmatprep.subr.mxu1 %v2738_v7 }
  0x7e   :  { %1029 = vmatpush1.msra.mxu0 %v2735_v8  ;;  %1100 = vmatpush1.msra.mxu1 %v2737_v45 }
  0x7f   :  { %1030 = vmatprep.subr.mxu0 %v2730_v13  ;;  %1101 = vmatprep.subr.mxu1 %v2732_v10 }
  0x80   :  { %1031 = vmatpush1.msra.mxu0 %v2729_v20  ;;  %1102 = vmatpush1.msra.mxu1 %v2731_v34 }
  0x81   :  { %1032 = vmatprep.subr.mxu0 %v2724_v26  ;;  %1103 = vmatprep.subr.mxu1 %v2726_v16 }
  0x82   :  { %1033 = vmatpush1.msra.mxu0 %v2723_v58  ;;  %1104 = vmatpush1.msra.mxu1 %v2725_v37 }
  0x83   :  { %1034 = vmatprep.subr.mxu0 %v2718_v46  ;;  %1105 = vmatprep.subr.mxu1 %v2720_v21 }
  0x84   :  { %1035 = vmatpush1.msra.mxu0 %v2717_v36  ;;  %1106 = vmatpush1.msra.mxu1 %v2719_v51 }
  0x85   :  { %1036 = vmatprep.subr.mxu0 %v2712_v48  ;;  %1107 = vmatprep.subr.mxu1 %v2714_v61 }
  0x86   :  { %1037 = vmatpush1.msra.mxu0 %v2711_v0  ;;  %1108 = vmatpush1.msra.mxu1 %v2713_v38 }
  0x87   :  { %1038 = vmatprep.subr.mxu0 %v2706_v17  ;;  %1109 = vmatprep.subr.mxu1 %v2708_v33 }
  0x88   :  { %1039 = vmatpush1.msra.mxu0 %v2705_v42  ;;  %1110 = vmatpush1.msra.mxu1 %v2707_v50 }
  0x89   :  { %1150 = vmatprep.subr.mxu0 %v2800_v60  ;;  %1221 = vmatprep.subr.mxu1 %v906_v53 }
  0xf1   :  { %v4253_v30 = vpop.f32.mrf.mxu0 }
  0xf2   :  { %v719_v52 = vmul.f32 %v4253_v30, %v4253_v30  ;;  %v711_v49 = vsel %vm710_vm6, %v4253_v30, 0.0 }
  0xf3   :  { %v3201_v6 = vpop.f32.mrf.mxu0  ;;  %v712_v14 = vrot.slane %v711_v49, 4 }
  0xf4   :  { %v720_v28 = vsel %vm710_vm6, %v719_v52, 0.0 }
  0xf5   :  { %v721_v3 = vrot.slane %v720_v28, 4  ;;  %v713_v15 = vadd.f32 %v712_v14, %v711_v49 }
  0xf7   :  { %v722_v27 = vadd.f32 %v721_v3, %v720_v28  ;;  %v714_v62 = vrot.slane %v713_v15, 2 }
  0xf9   :  { %v723_v35 = vrot.slane %v722_v27, 2  ;;  %v715_v31 = vadd.f32 %v714_v62, %v713_v15 }
  0xfb   :  { %v724_v55 = vadd.f32 %v723_v35, %v722_v27  ;;  %v716_v7 = vrot.slane %v715_v31, 1 }
  0xfd   :  { %v725_v10 = vrot.slane %v724_v55, 1  ;;  %v717_v46 = vadd.f32 %v716_v7, %v715_v31  ;;  %v900_v7 = vld [vmem:[%s5711_s4 + $0x2a8] sm:$0xff] }
  0xff   :  { %v726_v0 = vadd.f32 %v725_v10, %v724_v55  ;;  %v894_v10 = vld [vmem:[%s5711_s4 + $0x278] sm:$0xff] }
 0x109   :  { %v4255_v47 = vpop.f32.mrf.mxu1 }
 0x10a   :  { %v736_v32 = vmul.f32 %v4255_v47, %v4255_v47  ;;  %v728_v19 = vsel %vm710_vm6, %v4255_v47, 0.0 }
 0x10b   :  { %v3236_v11 = vpop.f32.mrf.mxu1  ;;  %v729_v43 = vrot.slane %v728_v19, 4 }
 0x10c   :  { %v737_v40 = vsel %vm710_vm6, %v736_v32, 0.0 }
 0x10d   :  { %v738_v9 = vrot.slane %v737_v40, 4  ;;  %v730_v44 = vadd.f32 %v729_v43, %v728_v19 }
 0x10f   :  { %v739_v4 = vadd.f32 %v738_v9, %v737_v40  ;;  %v731_v57 = vrot.slane %v730_v44, 2 }
 0x111   :  { %v740_v23 = vrot.slane %v739_v4, 2  ;;  %v732_v5 = vadd.f32 %v731_v57, %v730_v44  ;;  %v784_v44 = vld [vmem:[%s5709_s2] sm:$0x1] }
 0x113   :  { %v741_v39 = vadd.f32 %v740_v23, %v739_v4  ;;  %v733_v8 = vrot.slane %v732_v5, 1 }
 0x115   :  { %v742_v26 = vrot.slane %v741_v39, 1  ;;  %v734_v36 = vadd.f32 %v733_v8, %v732_v5  ;;  %v2793_v8 = vld [vmem:[%s5711_s4 + $0x5c0] sm:$0xff] }
 0x117   :  { %v4265_v2 = vpop.f32.mrf.mxu0  ;;  %v743_v38 = vadd.f32 %v742_v26, %v741_v39  ;;  %v735_v50 = vadd.f32 %v734_v36, %v717_v46  ;;  %v2782_v26 = vld [vmem:[%s5711_s4 + $0x568] sm:$0xff]  ;;  %v2776_v46 = vld [vmem:[%s5711_s4 + $0x538] sm:$0xff]  ;;  %v2775_v36 = vld [vmem:[%s5711_s4 + $0x530] sm:$0xff] }
 0x118   :  { %v753_v29 = vmul.f32 %v4265_v2, %v4265_v2  ;;  %v745_v12 = vsel %vm710_vm6, %v4265_v2, 0.0 }
 0x119   :  { %v3271_v25 = vpop.f32.mrf.mxu0  ;;  %v746_v24 = vrot.slane %v745_v12, 4  ;;  %v744_v11 = vadd.f32 %v743_v38, %v726_v0  ;;  %v2769_v0 = vld [vmem:[%s5711_s4 + $0x500] sm:$0xff] }
 0x11a   :  { %v754_v59 = vsel %vm710_vm6, %v753_v29, 0.0  ;;  %v875_v38 = vld [vmem:[%s5711_s4 + $0x1e0] sm:$0xff] }
 0x11b   :  { %v755_v54 = vrot.slane %v754_v59, 4  ;;  %v747_v56 = vadd.f32 %v746_v24, %v745_v12  ;;  %v792_v24 = vlaneseq }
 0x11d   :  { %v756_v41 = vadd.f32 %v755_v54, %v754_v59  ;;  %v748_v18 = vrot.slane %v747_v56, 2  ;;  %v4276_v15 = vshrl.u32 %v792_v24, 7  ;;  %v2733_v24 = vld [vmem:[%s5711_s4 + $0x3e0] sm:$0xff] }
 0x11f   :  { %v757_v63 = vrot.slane %v756_v41, 2  ;;  %v749_v22 = vadd.f32 %v748_v18, %v747_v56  ;;  %v4282_v54 = vsub.s32 0, %v4276_v15  ;;  %v788_v56 = vld [vmem:[%s5710_s3] sm:$0x1] }
 0x121   :  { %v758_v45 = vadd.f32 %v757_v63, %v756_v41  ;;  %v750_v16 = vrot.slane %v749_v22, 1 }
 0x123   :  { %v759_v51 = vrot.slane %v758_v45, 1  ;;  %v751_v17 = vadd.f32 %v750_v16, %v749_v22  ;;  %v905_v22 = vld [vmem:[%s5711_s4 + $0x2d0] sm:$0xff]  ;;  %v888_v16 = vld [vmem:[%s5711_s4 + $0x248] sm:$0xff] }
 0x125   :  { %v760_v60 = vadd.f32 %v759_v51, %v758_v45  ;;  %v752_v52 = vadd.f32 %v751_v17, %v735_v50  ;;  %v899_v45 = vld [vmem:[%s5711_s4 + $0x2a0] sm:$0xff]  ;;  %v881_v51 = vld [vmem:[%s5711_s4 + $0x210] sm:$0xff]  ;;  %v2764_v17 = vld [vmem:[%s5711_s4 + $0x4d8] sm:$0xff] }
 0x126   :  { %v869_v50 = vld [vmem:[%s5711_s4 + $0x1b0] sm:$0xff] }
 0x127   :  { %v761_v19 = vadd.f32 %v760_v60, %v744_v11  ;;  %v2758_v60 = vld [vmem:[%s5711_s4 + $0x4a8] sm:$0xff]  ;;  %v863_v11 = vld [vmem:[%s5711_s4 + $0x180] sm:$0xff] }
 0x129   :  { %v706_v13 = vpop.f32.mrf.mxu1 }
 0x12a   :  { %v762_v20 = vsel %vm710_vm6, %v706_v13, 0.0  ;;  %v770_v34 = vmul.f32 %v706_v13, %v706_v13 }
 0x12b   :  { %v763_v58 = vrot.slane %v762_v20, 4  ;;  %v3306_v37 = vpop.f32.mrf.mxu1 }
 0x12c   :  { %v771_v21 = vsel %vm710_vm6, %v770_v34, 0.0  ;;  %v893_v34 = vld [vmem:[%s5711_s4 + $0x270] sm:$0xff]  ;;  %v887_v37 = vld [vmem:[%s5711_s4 + $0x240] sm:$0xff] }
 0x12d   :  { %v764_v48 = vadd.f32 %v763_v58, %v762_v20  ;;  %v772_v61 = vrot.slane %v771_v21, 4  ;;  %v2787_v20 = vld [vmem:[%s5711_s4 + $0x590] sm:$0xff]  ;;  %v2781_v58 = vld [vmem:[%s5711_s4 + $0x560] sm:$0xff] }
 0x12f   :  { %v765_v33 = vrot.slane %v764_v48, 2  ;;  %v773_v42 = vadd.f32 %v772_v61, %v771_v21  ;;  %v882_v21 = vld [vmem:[%s5711_s4 + $0x218] sm:$0xff]  ;;  %v876_v61 = vld [vmem:[%s5711_s4 + $0x1e8] sm:$0xff] }
 0x131   :  { %v766_v53 = vadd.f32 %v765_v33, %v764_v48  ;;  %v774_v6 = vrot.slane %v773_v42, 2  ;;  %v2770_v48 = vld [vmem:[%s5711_s4 + $0x508] sm:$0xff]  ;;  %v870_v33 = vld [vmem:[%s5711_s4 + $0x1b8] sm:$0xff] }
 0x133   :  { %v767_v32 = vrot.slane %v766_v53, 1  ;;  %v775_v49 = vadd.f32 %v774_v6, %v773_v42  ;;  %v2763_v42 = vld [vmem:[%s5711_s4 + $0x4d0] sm:$0xff]  ;;  %v2757_v6 = vld [vmem:[%s5711_s4 + $0x4a0] sm:$0xff] }
 0x135   :  { %v768_v28 = vadd.f32 %v767_v32, %v766_v53  ;;  %v776_v29 = vrot.slane %v775_v49, 1  ;;  %v864_v53 = vld [vmem:[%s5711_s4 + $0x188] sm:$0xff]  ;;  %v858_v32 = vld [vmem:[%s5711_s4 + $0x158] sm:$0xff] }
 0x137   :  { %v769_v14 = vadd.f32 %v768_v28, %v752_v52  ;;  %v777_v40 = vadd.f32 %v776_v29, %v775_v49  ;;  %v2752_v52 = vld [vmem:[%s5711_s4 + $0x478] sm:$0xff]  ;;  %v2751_v49 = vld [vmem:[%s5711_s4 + $0x470] sm:$0xff]  ;;  %v2746_v28 = vld [vmem:[%s5711_s4 + $0x448] sm:$0xff] }
 0x138   :  { %v852_v29 = vld [vmem:[%s5711_s4 + $0x128] sm:$0xff] }
 0x139   :  { %v778_v12 = vadd.f32 %v777_v40, %v761_v19  ;;  %v780_v25 = vmul.f32 0.0625, %v769_v14  ;;  %v857_v19 = vld [vmem:[%s5711_s4 + $0x150] sm:$0xff]  ;;  %v2745_v14 = vld [vmem:[%s5711_s4 + $0x440] sm:$0xff] }
 0x13a   :  { %v851_v40 = vld [vmem:[%s5711_s4 + $0x120] sm:$0xff] }
 0x13b   :  { %v781_v43 = vmul.f32 0.0625, %v778_v12  ;;  %v782_v3 = vmul.f32 %v780_v25, %v780_v25  ;;  %v2740_v12 = vld [vmem:[%s5711_s4 + $0x418] sm:$0xff] }
 0x13d   :  { %v783_v59 = vsub.f32 %v781_v43, %v782_v3  ;;  %v2739_v43 = vld [vmem:[%s5711_s4 + $0x410] sm:$0xff] }
 0x13e   :  { %v845_v3 = vld [vmem:[%s5711_s4 + $0xf0] sm:$0xff] }
 0x13f   :  { %v785_v9 = vadd.f32 1e-05, %v783_v59  ;;  %v2734_v59 = vld [vmem:[%s5711_s4 + $0x3e8] sm:$0xff] }
 0x141   :  { %3311 = vrsqrt.f32 %v785_v9  ;;  %v840_v9 = vld [vmem:[%s5711_s4 + $0xc8] sm:$0xff] }
 0x14e   :  { %v3312_v27 = vpop.eup %3311 }
 0x14f   :  { %v787_v4 = vmul.f32 %v3312_v27, %v784_v44  ;;  %v839_v44 = vld [vmem:[%s5711_s4 + $0xc0] sm:$0xff]  ;;  %v2728_v27 = vld [vmem:[%s5711_s4 + $0x3b8] sm:$0xff] }
 0x151   :  { %v789_v62 = vmul.f32 %v787_v4, %v780_v25  ;;  %v4288_v57 = vrot.slane %v787_v4, %v4282_v54  ;;  %v846_v25 = vld [vmem:[%s5711_s4 + $0xf8] sm:$0xff] }
 0x152   :  { %v834_v4 = vld [vmem:[%s5711_s4 + $0x98] sm:$0xff] }
 0x153   :  { %v790_v41 = vsub.f32 %v788_v56, %v789_v62  ;;  %v812_v35 = vmul.f32 %v4288_v57, %v706_v13  ;;  %v809_v23 = vmul.f32 %v4288_v57, %v4265_v2  ;;  %v806_v31 = vmul.f32 %v4288_v57, %v4255_v47  ;;  %v2799_v2 = vld [vmem:[%s5711_s4 + $0x5f0] sm:$0xff]  ;;  %v2794_v47 = vld [vmem:[%s5711_s4 + $0x5c8] sm:$0xff]  ;;  %v2788_v13 = vld [vmem:[%s5711_s4 + $0x598] sm:$0xff] }
 0x154   :  { %v2727_v56 = vld [vmem:[%s5711_s4 + $0x3b0] sm:$0xff] }
 0x155   :  { %v4294_v18 = vrot.slane %v790_v41, %v4282_v54  ;;  %v833_v62 = vld [vmem:[%s5711_s4 + $0x90] sm:$0xff]  ;;  %v2722_v41 = vld [vmem:[%s5711_s4 + $0x388] sm:$0xff] }
 0x157   :  { %v4299_v5 = vadd.f32 %v812_v35, %v4294_v18  ;;  %v807_v63 = vadd.f32 %v806_v31, %v4294_v18  ;;  %v4303_v55 = vadd.f32 %v809_v23, %v4294_v18  ;;  %v828_v35 = vld [vmem:[%s5711_s4 + $0x68] sm:$0xff]  ;;  %v2721_v23 = vld [vmem:[%s5711_s4 + $0x380] sm:$0xff] }
 0x158   :  { %v827_v31 = vld [vmem:[%s5711_s4 + $0x60] sm:$0xff] }
 0x159   :  { %v4305_v39 = vmax.f32 %v807_v63, 0.0  ;;  %v2716_v63 = vld [vmem:[%s5711_s4 + $0x358] sm:$0xff] }
 0x15b   :  { %1073 = vmatmul.mubr.f32.vlgmr.msra.gmra.mxu0 %v4305_v39  ;;  %1144 = vmatmul.mubr.f32.vlgmr.msra.gmra.mxu1 %v4305_v39 }
 0x15c   :  { %1151 = vmatpush1.msra.mxu0 %v2799_v2  ;;  %1222 = vmatpush1.msra.mxu1 %v905_v22  ;;  %v822_v2 = vld [vmem:[%s5711_s4 + $0x38] sm:$0xff]  ;;  %v797_v22 = vmul.f32 %v4288_v57, %v4253_v30  ;;  %v816_v30 = vld [vmem:[%s5711_s4 + $0x8] sm:$0xff] }
 0x15d   :  { %1152 = vmatprep.subr.mxu0 %v2794_v47  ;;  %1223 = vmatprep.subr.mxu1 %v900_v7  ;;  %v2715_v47 = vld [vmem:[%s5711_s4 + $0x350] sm:$0xff] }
 0x15e   :  { %1153 = vmatpush1.msra.mxu0 %v2793_v8  ;;  %1224 = vmatpush1.msra.mxu1 %v899_v45  ;;  %v821_v7 = vld [vmem:[%s5711_s4 + $0x30] sm:$0xff]  ;;  %v2710_v8 = vld [vmem:[%s5711_s4 + $0x328] sm:$0xff]  ;;  %v804_v57 = vadd.f32 %v4294_v18, %v797_v22  ;;  %v2709_v45 = vld [vmem:[%s5711_s4 + $0x320] sm:$0xff] }
 0x15f   :  { %1154 = vmatprep.subr.mxu0 %v2788_v13  ;;  %1225 = vmatprep.subr.mxu1 %v894_v10  ;;  %v815_v13 = vld [vmem:[%s5711_s4] sm:$0xff]  ;;  %v908_v18 = vld [vmem:[%s5711_s4 + $0x2e8] sm:$0xff] }
 0x160   :  { %1155 = vmatpush1.msra.mxu0 %v2787_v20  ;;  %1226 = vmatpush1.msra.mxu1 %v893_v34  ;;  %v4499_v10 = vmax.f32 %v804_v57, 0.0  ;;  %v910_v20 = vld [vmem:[%s5711_s4 + $0x2f8] sm:$0xff]  ;;  %v907_v34 = vld [vmem:[%s5711_s4 + $0x2e0] sm:$0xff] }
 0x161   :  { %1156 = vmatprep.subr.mxu0 %v2782_v26  ;;  %1227 = vmatprep.subr.mxu1 %v888_v16  ;;  %v909_v26 = vld [vmem:[%s5711_s4 + $0x2f0] sm:$0xff]  ;;  %v902_v16 = vld [vmem:[%s5711_s4 + $0x2b8] sm:$0xff]  ;;  %v835_v22 = vld [vmem:[%s5711_s4 + $0xa0] sm:$0xff] }
 0x162   :  { %1157 = vmatpush1.msra.mxu0 %v2781_v58  ;;  %1228 = vmatpush1.msra.mxu1 %v887_v37  ;;  %v904_v58 = vld [vmem:[%s5711_s4 + $0x2c8] sm:$0xff]  ;;  %v901_v37 = vld [vmem:[%s5711_s4 + $0x2b0] sm:$0xff]  ;;  %v831_v57 = vld [vmem:[%s5711_s4 + $0x80] sm:$0xff] }
 0x163   :  { %1158 = vmatprep.subr.mxu0 %v2776_v46  ;;  %1229 = vmatprep.subr.mxu1 %v882_v21  ;;  %v896_v46 = vld [vmem:[%s5711_s4 + $0x288] sm:$0xff]  ;;  %v898_v21 = vld [vmem:[%s5711_s4 + $0x298] sm:$0xff] }
 0x164   :  { %1159 = vmatpush1.msra.mxu0 %v2775_v36  ;;  %1230 = vmatpush1.msra.mxu1 %v881_v51  ;;  %v895_v36 = vld [vmem:[%s5711_s4 + $0x280] sm:$0xff]  ;;  %v897_v51 = vld [vmem:[%s5711_s4 + $0x290] sm:$0xff] }
 0x165   :  { %1160 = vmatprep.subr.mxu0 %v2770_v48  ;;  %1231 = vmatprep.subr.mxu1 %v876_v61  ;;  %v890_v48 = vld [vmem:[%s5711_s4 + $0x258] sm:$0xff]  ;;  %v892_v61 = vld [vmem:[%s5711_s4 + $0x268] sm:$0xff] }
 0x166   :  { %1161 = vmatpush1.msra.mxu0 %v2769_v0  ;;  %1232 = vmatpush1.msra.mxu1 %v875_v38  ;;  %v889_v0 = vld [vmem:[%s5711_s4 + $0x250] sm:$0xff]  ;;  %v891_v38 = vld [vmem:[%s5711_s4 + $0x260] sm:$0xff] }
 0x167   :  { %1162 = vmatprep.subr.mxu0 %v2764_v17  ;;  %1233 = vmatprep.subr.mxu1 %v870_v33  ;;  %v884_v17 = vld [vmem:[%s5711_s4 + $0x228] sm:$0xff]  ;;  %v886_v33 = vld [vmem:[%s5711_s4 + $0x238] sm:$0xff] }
 0x168   :  { %1163 = vmatpush1.msra.mxu0 %v2763_v42  ;;  %1234 = vmatpush1.msra.mxu1 %v869_v50  ;;  %v883_v42 = vld [vmem:[%s5711_s4 + $0x220] sm:$0xff]  ;;  %v885_v50 = vld [vmem:[%s5711_s4 + $0x230] sm:$0xff] }
 0x169   :  { %1164 = vmatprep.subr.mxu0 %v2758_v60  ;;  %1235 = vmatprep.subr.mxu1 %v864_v53  ;;  %v878_v60 = vld [vmem:[%s5711_s4 + $0x1f8] sm:$0xff]  ;;  %v880_v53 = vld [vmem:[%s5711_s4 + $0x208] sm:$0xff] }
 0x16a   :  { %1165 = vmatpush1.msra.mxu0 %v2757_v6  ;;  %1236 = vmatpush1.msra.mxu1 %v863_v11  ;;  %v877_v6 = vld [vmem:[%s5711_s4 + $0x1f0] sm:$0xff]  ;;  %v879_v11 = vld [vmem:[%s5711_s4 + $0x200] sm:$0xff] }
 0x16b   :  { %1166 = vmatprep.subr.mxu0 %v2752_v52  ;;  %1237 = vmatprep.subr.mxu1 %v858_v32  ;;  %v872_v52 = vld [vmem:[%s5711_s4 + $0x1c8] sm:$0xff]  ;;  %v874_v32 = vld [vmem:[%s5711_s4 + $0x1d8] sm:$0xff] }
 0x16c   :  { %1167 = vmatpush1.msra.mxu0 %v2751_v49  ;;  %1238 = vmatpush1.msra.mxu1 %v857_v19  ;;  %v871_v49 = vld [vmem:[%s5711_s4 + $0x1c0] sm:$0xff]  ;;  %v873_v19 = vld [vmem:[%s5711_s4 + $0x1d0] sm:$0xff] }
 0x16d   :  { %1168 = vmatprep.subr.mxu0 %v2746_v28  ;;  %1239 = vmatprep.subr.mxu1 %v852_v29  ;;  %v866_v28 = vld [vmem:[%s5711_s4 + $0x198] sm:$0xff]  ;;  %v868_v29 = vld [vmem:[%s5711_s4 + $0x1a8] sm:$0xff] }
 0x16e   :  { %1169 = vmatpush1.msra.mxu0 %v2745_v14  ;;  %1240 = vmatpush1.msra.mxu1 %v851_v40  ;;  %v865_v14 = vld [vmem:[%s5711_s4 + $0x190] sm:$0xff]  ;;  %v867_v40 = vld [vmem:[%s5711_s4 + $0x1a0] sm:$0xff] }
 0x16f   :  { %1170 = vmatprep.subr.mxu0 %v2740_v12  ;;  %1241 = vmatprep.subr.mxu1 %v846_v25  ;;  %v860_v12 = vld [vmem:[%s5711_s4 + $0x168] sm:$0xff]  ;;  %v862_v25 = vld [vmem:[%s5711_s4 + $0x178] sm:$0xff] }
 0x170   :  { %1171 = vmatpush1.msra.mxu0 %v2739_v43  ;;  %1242 = vmatpush1.msra.mxu1 %v845_v3  ;;  %v859_v43 = vld [vmem:[%s5711_s4 + $0x160] sm:$0xff]  ;;  %v861_v3 = vld [vmem:[%s5711_s4 + $0x170] sm:$0xff] }
 0x171   :  { %1172 = vmatprep.subr.mxu0 %v2734_v59  ;;  %1243 = vmatprep.subr.mxu1 %v840_v9  ;;  %v854_v59 = vld [vmem:[%s5711_s4 + $0x138] sm:$0xff]  ;;  %v856_v9 = vld [vmem:[%s5711_s4 + $0x148] sm:$0xff] }
 0x172   :  { %1173 = vmatpush1.msra.mxu0 %v2733_v24  ;;  %1244 = vmatpush1.msra.mxu1 %v839_v44  ;;  %v853_v24 = vld [vmem:[%s5711_s4 + $0x130] sm:$0xff]  ;;  %v855_v44 = vld [vmem:[%s5711_s4 + $0x140] sm:$0xff] }
 0x173   :  { %1174 = vmatprep.subr.mxu0 %v2728_v27  ;;  %1245 = vmatprep.subr.mxu1 %v834_v4  ;;  %v848_v27 = vld [vmem:[%s5711_s4 + $0x108] sm:$0xff]  ;;  %v850_v4 = vld [vmem:[%s5711_s4 + $0x118] sm:$0xff] }
 0x174   :  { %1175 = vmatpush1.msra.mxu0 %v2727_v56  ;;  %1246 = vmatpush1.msra.mxu1 %v833_v62  ;;  %v847_v56 = vld [vmem:[%s5711_s4 + $0x100] sm:$0xff]  ;;  %v849_v62 = vld [vmem:[%s5711_s4 + $0x110] sm:$0xff] }
 0x175   :  { %1176 = vmatprep.subr.mxu0 %v2722_v41  ;;  %1247 = vmatprep.subr.mxu1 %v828_v35  ;;  %v842_v41 = vld [vmem:[%s5711_s4 + $0xd8] sm:$0xff]  ;;  %v844_v35 = vld [vmem:[%s5711_s4 + $0xe8] sm:$0xff] }
 0x176   :  { %1177 = vmatpush1.msra.mxu0 %v2721_v23  ;;  %1248 = vmatpush1.msra.mxu1 %v827_v31  ;;  %v841_v23 = vld [vmem:[%s5711_s4 + $0xd0] sm:$0xff]  ;;  %v843_v31 = vld [vmem:[%s5711_s4 + $0xe0] sm:$0xff] }
 0x177   :  { %1178 = vmatprep.subr.mxu0 %v2716_v63  ;;  %1249 = vmatprep.subr.mxu1 %v822_v2  ;;  %v836_v63 = vld [vmem:[%s5711_s4 + $0xa8] sm:$0xff]  ;;  %v838_v2 = vld [vmem:[%s5711_s4 + $0xb8] sm:$0xff] }
 0x178   :  { %1179 = vmatpush1.msra.mxu0 %v2715_v47  ;;  %1250 = vmatpush1.msra.mxu1 %v821_v7  ;;  %v837_v47 = vld [vmem:[%s5711_s4 + $0xb0] sm:$0xff]  ;;  %v830_v7 = vld [vmem:[%s5711_s4 + $0x78] sm:$0xff] }
 0x179   :  { %1180 = vmatprep.subr.mxu0 %v2710_v8  ;;  %1251 = vmatprep.subr.mxu1 %v816_v30  ;;  %v832_v8 = vld [vmem:[%s5711_s4 + $0x88] sm:$0xff]  ;;  %v829_v30 = vld [vmem:[%s5711_s4 + $0x70] sm:$0xff] }
 0x17a   :  { %1181 = vmatpush1.msra.mxu0 %v2709_v45  ;;  %1214 = vmatprep.mubr.f32.mxu0 %v3347_v1  ;;  %v824_v45 = vld [vmem:[%s5711_s4 + $0x48] sm:$0xff] }
 0x17b   :  { %1252 = vmatpush1.msra.mxu1 %v815_v13  ;;  %1285 = vmatprep.mubr.f32.mxu1 %v3347_v1  ;;  %v826_v13 = vld [vmem:[%s5711_s4 + $0x58] sm:$0xff] }
 0x17c   :  { %1215 = vmatmul.mubr.f32.vlgmr.msra.gmra.mxu0 %v4305_v39  ;;  %1286 = vmatmul.mubr.f32.vlgmr.msra.gmra.mxu1 %v4499_v10  ;;  %v903_v39 = vld [vmem:[%s5711_s4 + $0x2c0] sm:$0xff] }
 0x17d   :  { %1292 = vmatprep.subr.mxu0 %v908_v18  ;;  %1363 = vmatprep.subr.mxu1 %v910_v20  ;;  %v823_v18 = vld [vmem:[%s5711_s4 + $0x40] sm:$0xff]  ;;  %v825_v20 = vld [vmem:[%s5711_s4 + $0x50] sm:$0xff] }
 0x17e   :  { %1293 = vmatpush1.msra.mxu0 %v907_v34  ;;  %1364 = vmatpush1.msra.mxu1 %v909_v26  ;;  %v818_v34 = vld [vmem:[%s5711_s4 + $0x18] sm:$0xff]  ;;  %v820_v26 = vld [vmem:[%s5711_s4 + $0x28] sm:$0xff] }
 0x17f   :  { %1294 = vmatprep.subr.mxu0 %v902_v16  ;;  %1365 = vmatprep.subr.mxu1 %v904_v58  ;;  %v817_v16 = vld [vmem:[%s5711_s4 + $0x10] sm:$0xff]  ;;  %v819_v58 = vld [vmem:[%s5711_s4 + $0x20] sm:$0xff] }
 0x180   :  { %1295 = vmatpush1.msra.mxu0 %v901_v37  ;;  %1366 = vmatpush1.msra.mxu1 %v903_v39  ;;  %v2892_v37 = vld [vmem:[%s5711_s4 + $0x8d8] sm:$0xff]  ;;  %v2894_v39 = vld [vmem:[%s5711_s4 + $0x8e8] sm:$0xff] }
 0x181   :  { %1296 = vmatprep.subr.mxu0 %v896_v46  ;;  %1367 = vmatprep.subr.mxu1 %v898_v21  ;;  %v2891_v46 = vld [vmem:[%s5711_s4 + $0x8d0] sm:$0xff]  ;;  %v2893_v21 = vld [vmem:[%s5711_s4 + $0x8e0] sm:$0xff] }
 0x182   :  { %1297 = vmatpush1.msra.mxu0 %v895_v36  ;;  %1368 = vmatpush1.msra.mxu1 %v897_v51  ;;  %v2886_v36 = vld [vmem:[%s5711_s4 + $0x8a8] sm:$0xff]  ;;  %v2888_v51 = vld [vmem:[%s5711_s4 + $0x8b8] sm:$0xff] }
 0x183   :  { %1298 = vmatprep.subr.mxu0 %v890_v48  ;;  %1369 = vmatprep.subr.mxu1 %v892_v61  ;;  %v2885_v48 = vld [vmem:[%s5711_s4 + $0x8a0] sm:$0xff]  ;;  %v2887_v61 = vld [vmem:[%s5711_s4 + $0x8b0] sm:$0xff] }
 0x184   :  { %1299 = vmatpush1.msra.mxu0 %v889_v0  ;;  %1370 = vmatpush1.msra.mxu1 %v891_v38  ;;  %v2882_v0 = vld [vmem:[%s5711_s4 + $0x888] sm:$0xff]  ;;  %v2879_v38 = vld [vmem:[%s5711_s4 + $0x870] sm:$0xff] }
 0x185   :  { %1300 = vmatprep.subr.mxu0 %v884_v17  ;;  %1371 = vmatprep.subr.mxu1 %v886_v33  ;;  %v2881_v17 = vld [vmem:[%s5711_s4 + $0x880] sm:$0xff]  ;;  %v2874_v33 = vld [vmem:[%s5711_s4 + $0x848] sm:$0xff] }
 0x186   :  { %1301 = vmatpush1.msra.mxu0 %v883_v42  ;;  %1372 = vmatpush1.msra.mxu1 %v885_v50  ;;  %v2876_v42 = vld [vmem:[%s5711_s4 + $0x858] sm:$0xff]  ;;  %v2873_v50 = vld [vmem:[%s5711_s4 + $0x840] sm:$0xff] }
 0x187   :  { %1302 = vmatprep.subr.mxu0 %v878_v60  ;;  %1373 = vmatprep.subr.mxu1 %v880_v53  ;;  %v2875_v60 = vld [vmem:[%s5711_s4 + $0x850] sm:$0xff]  ;;  %v2868_v53 = vld [vmem:[%s5711_s4 + $0x818] sm:$0xff] }
 0x188   :  { %1303 = vmatpush1.msra.mxu0 %v877_v6  ;;  %1374 = vmatpush1.msra.mxu1 %v879_v11  ;;  %v2870_v6 = vld [vmem:[%s5711_s4 + $0x828] sm:$0xff]  ;;  %v2867_v11 = vld [vmem:[%s5711_s4 + $0x810] sm:$0xff] }
 0x189   :  { %1304 = vmatprep.subr.mxu0 %v872_v52  ;;  %1375 = vmatprep.subr.mxu1 %v874_v32  ;;  %v2869_v52 = vld [vmem:[%s5711_s4 + $0x820] sm:$0xff]  ;;  %v2862_v32 = vld [vmem:[%s5711_s4 + $0x7e8] sm:$0xff] }
 0x18a   :  { %1305 = vmatpush1.msra.mxu0 %v871_v49  ;;  %1376 = vmatpush1.msra.mxu1 %v873_v19  ;;  %v2864_v49 = vld [vmem:[%s5711_s4 + $0x7f8] sm:$0xff]  ;;  %v2861_v19 = vld [vmem:[%s5711_s4 + $0x7e0] sm:$0xff] }
 0x18b   :  { %1306 = vmatprep.subr.mxu0 %v866_v28  ;;  %1377 = vmatprep.subr.mxu1 %v868_v29  ;;  %v2863_v28 = vld [vmem:[%s5711_s4 + $0x7f0] sm:$0xff]  ;;  %v2856_v29 = vld [vmem:[%s5711_s4 + $0x7b8] sm:$0xff] }
 0x18c   :  { %1307 = vmatpush1.msra.mxu0 %v865_v14  ;;  %1378 = vmatpush1.msra.mxu1 %v867_v40  ;;  %v2858_v14 = vld [vmem:[%s5711_s4 + $0x7c8] sm:$0xff]  ;;  %v2855_v40 = vld [vmem:[%s5711_s4 + $0x7b0] sm:$0xff] }
 0x18d   :  { %1308 = vmatprep.subr.mxu0 %v860_v12  ;;  %1379 = vmatprep.subr.mxu1 %v862_v25  ;;  %v2857_v12 = vld [vmem:[%s5711_s4 + $0x7c0] sm:$0xff]  ;;  %v2850_v25 = vld [vmem:[%s5711_s4 + $0x788] sm:$0xff] }
 0x18e   :  { %1309 = vmatpush1.msra.mxu0 %v859_v43  ;;  %1380 = vmatpush1.msra.mxu1 %v861_v3  ;;  %v2852_v43 = vld [vmem:[%s5711_s4 + $0x798] sm:$0xff]  ;;  %v2849_v3 = vld [vmem:[%s5711_s4 + $0x780] sm:$0xff] }
 0x18f   :  { %1310 = vmatprep.subr.mxu0 %v854_v59  ;;  %1381 = vmatprep.subr.mxu1 %v856_v9  ;;  %v2851_v59 = vld [vmem:[%s5711_s4 + $0x790] sm:$0xff]  ;;  %v2844_v9 = vld [vmem:[%s5711_s4 + $0x758] sm:$0xff] }
 0x190   :  { %1311 = vmatpush1.msra.mxu0 %v853_v24  ;;  %1382 = vmatpush1.msra.mxu1 %v855_v44  ;;  %v2846_v24 = vld [vmem:[%s5711_s4 + $0x768] sm:$0xff]  ;;  %v2843_v44 = vld [vmem:[%s5711_s4 + $0x750] sm:$0xff] }
 0x191   :  { %1312 = vmatprep.subr.mxu0 %v848_v27  ;;  %1383 = vmatprep.subr.mxu1 %v850_v4  ;;  %v2845_v27 = vld [vmem:[%s5711_s4 + $0x760] sm:$0xff]  ;;  %v2838_v4 = vld [vmem:[%s5711_s4 + $0x728] sm:$0xff] }
 0x192   :  { %1313 = vmatpush1.msra.mxu0 %v847_v56  ;;  %1384 = vmatpush1.msra.mxu1 %v849_v62  ;;  %v2840_v56 = vld [vmem:[%s5711_s4 + $0x738] sm:$0xff]  ;;  %v2837_v62 = vld [vmem:[%s5711_s4 + $0x720] sm:$0xff] }
 0x193   :  { %1314 = vmatprep.subr.mxu0 %v842_v41  ;;  %1385 = vmatprep.subr.mxu1 %v844_v35  ;;  %v2839_v41 = vld [vmem:[%s5711_s4 + $0x730] sm:$0xff]  ;;  %v2832_v35 = vld [vmem:[%s5711_s4 + $0x6f8] sm:$0xff] }
 0x194   :  { %1315 = vmatpush1.msra.mxu0 %v841_v23  ;;  %1386 = vmatpush1.msra.mxu1 %v843_v31  ;;  %v2834_v23 = vld [vmem:[%s5711_s4 + $0x708] sm:$0xff]  ;;  %v2831_v31 = vld [vmem:[%s5711_s4 + $0x6f0] sm:$0xff] }
 0x195   :  { %1316 = vmatprep.subr.mxu0 %v836_v63  ;;  %1387 = vmatprep.subr.mxu1 %v838_v2  ;;  %v2833_v63 = vld [vmem:[%s5711_s4 + $0x700] sm:$0xff]  ;;  %v2826_v2 = vld [vmem:[%s5711_s4 + $0x6c8] sm:$0xff] }
 0x196   :  { %1317 = vmatpush1.msra.mxu0 %v835_v22  ;;  %1388 = vmatpush1.msra.mxu1 %v837_v47  ;;  %v2828_v22 = vld [vmem:[%s5711_s4 + $0x6d8] sm:$0xff]  ;;  %v2825_v47 = vld [vmem:[%s5711_s4 + $0x6c0] sm:$0xff] }
 0x197   :  { %1318 = vmatprep.subr.mxu0 %v830_v7  ;;  %1389 = vmatprep.subr.mxu1 %v832_v8  ;;  %v2827_v7 = vld [vmem:[%s5711_s4 + $0x6d0] sm:$0xff]  ;;  %v2820_v8 = vld [vmem:[%s5711_s4 + $0x698] sm:$0xff] }
 0x198   :  { %1319 = vmatpush1.msra.mxu0 %v829_v30  ;;  %1390 = vmatpush1.msra.mxu1 %v831_v57  ;;  %v2822_v30 = vld [vmem:[%s5711_s4 + $0x6a8] sm:$0xff]  ;;  %v2819_v57 = vld [vmem:[%s5711_s4 + $0x690] sm:$0xff] }
 0x199   :  { %1320 = vmatprep.subr.mxu0 %v824_v45  ;;  %1391 = vmatprep.subr.mxu1 %v826_v13  ;;  %v2821_v45 = vld [vmem:[%s5711_s4 + $0x6a0] sm:$0xff]  ;;  %v2814_v13 = vld [vmem:[%s5711_s4 + $0x668] sm:$0xff] }
 0x19a   :  { %1321 = vmatpush1.msra.mxu0 %v823_v18  ;;  %1392 = vmatpush1.msra.mxu1 %v825_v20  ;;  %v2816_v18 = vld [vmem:[%s5711_s4 + $0x678] sm:$0xff]  ;;  %v2813_v20 = vld [vmem:[%s5711_s4 + $0x660] sm:$0xff] }
 0x19b   :  { %1322 = vmatprep.subr.mxu0 %v818_v34  ;;  %1393 = vmatprep.subr.mxu1 %v820_v26  ;;  %v2815_v34 = vld [vmem:[%s5711_s4 + $0x670] sm:$0xff]  ;;  %v2808_v26 = vld [vmem:[%s5711_s4 + $0x638] sm:$0xff] }
 0x19c   :  { %1323 = vmatpush1.msra.mxu0 %v817_v16  ;;  %1356 = vmatprep.mubr.f32.mxu0 %v3347_v1  ;;  %v2810_v16 = vld [vmem:[%s5711_s4 + $0x648] sm:$0xff] }
 0x19d   :  { %1394 = vmatpush1.msra.mxu1 %v819_v58  ;;  %1427 = vmatprep.mubr.f32.mxu1 %v3347_v1  ;;  %v2807_v58 = vld [vmem:[%s5711_s4 + $0x630] sm:$0xff] }
 0x19e   :  { %1357 = vmatmul.mubr.f32.vlgmr.msra.gmra.mxu0 %v4499_v10  ;;  %1428 = vmatmul.mubr.f32.vlgmr.msra.gmra.mxu1 %v4499_v10  ;;  %v2880_v10 = vld [vmem:[%s5711_s4 + $0x878] sm:$0xff] }
 0x19f   :  { %1531 = vmatprep.subr.mxu0 %v2892_v37  ;;  %1602 = vmatprep.subr.mxu1 %v2894_v39  ;;  %v2809_v37 = vld [vmem:[%s5711_s4 + $0x640] sm:$0xff]  ;;  %v2802_v39 = vld [vmem:[%s5711_s4 + $0x608] sm:$0xff] }
 0x1a0   :  { %1532 = vmatpush1.msra.mxu0 %v2891_v46  ;;  %1603 = vmatpush1.msra.mxu1 %v2893_v21  ;;  %v2804_v46 = vld [vmem:[%s5711_s4 + $0x618] sm:$0xff]  ;;  %v2801_v21 = vld [vmem:[%s5711_s4 + $0x600] sm:$0xff] }
 0x1a1   :  { %1533 = vmatprep.subr.mxu0 %v2886_v36  ;;  %1604 = vmatprep.subr.mxu1 %v2888_v51  ;;  %v2803_v36 = vld [vmem:[%s5711_s4 + $0x610] sm:$0xff]  ;;  %v4894_v51 = vmax.f32 %v4303_v55, 0.0 }
 0x1a2   :  { %1534 = vmatpush1.msra.mxu0 %v2885_v48  ;;  %1605 = vmatpush1.msra.mxu1 %v2887_v61  ;;  %v2896_v48 = vld [vmem:[%s5711_s4 + $0x8f8] sm:$0xff]  ;;  %v2987_v55 = vld [vmem:[%s5711_s4 + $0xbd0] sm:$0xff] }
 0x1a3   :  { %1535 = vmatprep.subr.mxu0 %v2880_v10  ;;  %1606 = vmatprep.subr.mxu1 %v2882_v0  ;;  %v2988_v61 = vld [vmem:[%s5711_s4 + $0xbd8] sm:$0xff]  ;;  %v2895_v10 = vld [vmem:[%s5711_s4 + $0x8f0] sm:$0xff]  ;;  %v2890_v0 = vld [vmem:[%s5711_s4 + $0x8c8] sm:$0xff] }
 0x1a4   :  { %1536 = vmatpush1.msra.mxu0 %v2879_v38  ;;  %1607 = vmatpush1.msra.mxu1 %v2881_v17  ;;  %v2982_v38 = vld [vmem:[%s5711_s4 + $0xba8] sm:$0xff]  ;;  %v2889_v17 = vld [vmem:[%s5711_s4 + $0x8c0] sm:$0xff] }
 0x1a5   :  { %1537 = vmatprep.subr.mxu0 %v2874_v33  ;;  %1608 = vmatprep.subr.mxu1 %v2876_v42  ;;  %v2981_v33 = vld [vmem:[%s5711_s4 + $0xba0] sm:$0xff]  ;;  %v2884_v42 = vld [vmem:[%s5711_s4 + $0x898] sm:$0xff] }
 0x1a6   :  { %1538 = vmatpush1.msra.mxu0 %v2873_v50  ;;  %1609 = vmatpush1.msra.mxu1 %v2875_v60  ;;  %v2976_v50 = vld [vmem:[%s5711_s4 + $0xb78] sm:$0xff]  ;;  %v2883_v60 = vld [vmem:[%s5711_s4 + $0x890] sm:$0xff] }
 0x1a7   :  { %1539 = vmatprep.subr.mxu0 %v2868_v53  ;;  %1610 = vmatprep.subr.mxu1 %v2870_v6  ;;  %v2975_v53 = vld [vmem:[%s5711_s4 + $0xb70] sm:$0xff]  ;;  %v2878_v6 = vld [vmem:[%s5711_s4 + $0x868] sm:$0xff] }
 0x1a8   :  { %1540 = vmatpush1.msra.mxu0 %v2867_v11  ;;  %1611 = vmatpush1.msra.mxu1 %v2869_v52  ;;  %v2970_v11 = vld [vmem:[%s5711_s4 + $0xb48] sm:$0xff]  ;;  %v2877_v52 = vld [vmem:[%s5711_s4 + $0x860] sm:$0xff] }
 0x1a9   :  { %1541 = vmatprep.subr.mxu0 %v2862_v32  ;;  %1612 = vmatprep.subr.mxu1 %v2864_v49  ;;  %v2969_v32 = vld [vmem:[%s5711_s4 + $0xb40] sm:$0xff]  ;;  %v2872_v49 = vld [vmem:[%s5711_s4 + $0x838] sm:$0xff] }
 0x1aa   :  { %1542 = vmatpush1.msra.mxu0 %v2861_v19  ;;  %1613 = vmatpush1.msra.mxu1 %v2863_v28  ;;  %v2964_v19 = vld [vmem:[%s5711_s4 + $0xb18] sm:$0xff]  ;;  %v2871_v28 = vld [vmem:[%s5711_s4 + $0x830] sm:$0xff] }
 0x1ab   :  { %1543 = vmatprep.subr.mxu0 %v2856_v29  ;;  %1614 = vmatprep.subr.mxu1 %v2858_v14  ;;  %v2963_v29 = vld [vmem:[%s5711_s4 + $0xb10] sm:$0xff]  ;;  %v2866_v14 = vld [vmem:[%s5711_s4 + $0x808] sm:$0xff] }
 0x1ac   :  { %1544 = vmatpush1.msra.mxu0 %v2855_v40  ;;  %1615 = vmatpush1.msra.mxu1 %v2857_v12  ;;  %v2958_v40 = vld [vmem:[%s5711_s4 + $0xae8] sm:$0xff]  ;;  %v2865_v12 = vld [vmem:[%s5711_s4 + $0x800] sm:$0xff] }
 0x1ad   :  { %1545 = vmatprep.subr.mxu0 %v2850_v25  ;;  %1616 = vmatprep.subr.mxu1 %v2852_v43  ;;  %v2957_v25 = vld [vmem:[%s5711_s4 + $0xae0] sm:$0xff]  ;;  %v2860_v43 = vld [vmem:[%s5711_s4 + $0x7d8] sm:$0xff] }
 0x1ae   :  { %1546 = vmatpush1.msra.mxu0 %v2849_v3  ;;  %1617 = vmatpush1.msra.mxu1 %v2851_v59  ;;  %v2952_v3 = vld [vmem:[%s5711_s4 + $0xab8] sm:$0xff]  ;;  %v2859_v59 = vld [vmem:[%s5711_s4 + $0x7d0] sm:$0xff] }
 0x1af   :  { %1547 = vmatprep.subr.mxu0 %v2844_v9  ;;  %1618 = vmatprep.subr.mxu1 %v2846_v24  ;;  %v2951_v9 = vld [vmem:[%s5711_s4 + $0xab0] sm:$0xff]  ;;  %v2854_v24 = vld [vmem:[%s5711_s4 + $0x7a8] sm:$0xff] }
 0x1b0   :  { %1548 = vmatpush1.msra.mxu0 %v2843_v44  ;;  %1619 = vmatpush1.msra.mxu1 %v2845_v27  ;;  %v2946_v44 = vld [vmem:[%s5711_s4 + $0xa88] sm:$0xff]  ;;  %v2853_v27 = vld [vmem:[%s5711_s4 + $0x7a0] sm:$0xff] }
 0x1b1   :  { %1549 = vmatprep.subr.mxu0 %v2838_v4  ;;  %1620 = vmatprep.subr.mxu1 %v2840_v56  ;;  %v2945_v4 = vld [vmem:[%s5711_s4 + $0xa80] sm:$0xff]  ;;  %v2848_v56 = vld [vmem:[%s5711_s4 + $0x778] sm:$0xff] }
 0x1b2   :  { %1550 = vmatpush1.msra.mxu0 %v2837_v62  ;;  %1621 = vmatpush1.msra.mxu1 %v2839_v41  ;;  %v2940_v62 = vld [vmem:[%s5711_s4 + $0xa58] sm:$0xff]  ;;  %v2847_v41 = vld [vmem:[%s5711_s4 + $0x770] sm:$0xff] }
 0x1b3   :  { %1551 = vmatprep.subr.mxu0 %v2832_v35  ;;  %1622 = vmatprep.subr.mxu1 %v2834_v23  ;;  %v2939_v35 = vld [vmem:[%s5711_s4 + $0xa50] sm:$0xff]  ;;  %v2842_v23 = vld [vmem:[%s5711_s4 + $0x748] sm:$0xff] }
 0x1b4   :  { %1552 = vmatpush1.msra.mxu0 %v2831_v31  ;;  %1623 = vmatpush1.msra.mxu1 %v2833_v63  ;;  %v2934_v31 = vld [vmem:[%s5711_s4 + $0xa28] sm:$0xff]  ;;  %v2841_v63 = vld [vmem:[%s5711_s4 + $0x740] sm:$0xff] }
 0x1b5   :  { %1553 = vmatprep.subr.mxu0 %v2826_v2  ;;  %1624 = vmatprep.subr.mxu1 %v2828_v22  ;;  %v2933_v2 = vld [vmem:[%s5711_s4 + $0xa20] sm:$0xff]  ;;  %v2836_v22 = vld [vmem:[%s5711_s4 + $0x718] sm:$0xff] }
 0x1b6   :  { %1554 = vmatpush1.msra.mxu0 %v2825_v47  ;;  %1625 = vmatpush1.msra.mxu1 %v2827_v7  ;;  %v2928_v47 = vld [vmem:[%s5711_s4 + $0x9f8] sm:$0xff]  ;;  %v2835_v7 = vld [vmem:[%s5711_s4 + $0x710] sm:$0xff] }
 0x1b7   :  { %1555 = vmatprep.subr.mxu0 %v2820_v8  ;;  %1626 = vmatprep.subr.mxu1 %v2822_v30  ;;  %v2927_v8 = vld [vmem:[%s5711_s4 + $0x9f0] sm:$0xff]  ;;  %v2830_v30 = vld [vmem:[%s5711_s4 + $0x6e8] sm:$0xff] }
 0x1b8   :  { %1556 = vmatpush1.msra.mxu0 %v2819_v57  ;;  %1627 = vmatpush1.msra.mxu1 %v2821_v45  ;;  %v2922_v57 = vld [vmem:[%s5711_s4 + $0x9c8] sm:$0xff]  ;;  %v2829_v45 = vld [vmem:[%s5711_s4 + $0x6e0] sm:$0xff] }
 0x1b9   :  { %1557 = vmatprep.subr.mxu0 %v2814_v13  ;;  %1628 = vmatprep.subr.mxu1 %v2816_v18  ;;  %v2921_v13 = vld [vmem:[%s5711_s4 + $0x9c0] sm:$0xff]  ;;  %v2824_v18 = vld [vmem:[%s5711_s4 + $0x6b8] sm:$0xff] }
 0x1ba   :  { %1558 = vmatpush1.msra.mxu0 %v2813_v20  ;;  %1629 = vmatpush1.msra.mxu1 %v2815_v34  ;;  %v2916_v20 = vld [vmem:[%s5711_s4 + $0x998] sm:$0xff]  ;;  %v2823_v34 = vld [vmem:[%s5711_s4 + $0x6b0] sm:$0xff] }
 0x1bb   :  { %1559 = vmatprep.subr.mxu0 %v2808_v26  ;;  %1630 = vmatprep.subr.mxu1 %v2810_v16  ;;  %v2915_v26 = vld [vmem:[%s5711_s4 + $0x990] sm:$0xff]  ;;  %v2818_v16 = vld [vmem:[%s5711_s4 + $0x688] sm:$0xff] }
 0x1bc   :  { %1560 = vmatpush1.msra.mxu0 %v2807_v58  ;;  %1631 = vmatpush1.msra.mxu1 %v2809_v37  ;;  %v2910_v58 = vld [vmem:[%s5711_s4 + $0x968] sm:$0xff]  ;;  %v2817_v37 = vld [vmem:[%s5711_s4 + $0x680] sm:$0xff] }
 0x1bd   :  { %1561 = vmatprep.subr.mxu0 %v2802_v39  ;;  %1632 = vmatprep.subr.mxu1 %v2804_v46  ;;  %v2909_v39 = vld [vmem:[%s5711_s4 + $0x960] sm:$0xff]  ;;  %v2812_v46 = vld [vmem:[%s5711_s4 + $0x658] sm:$0xff] }
 0x1be   :  { %1562 = vmatpush1.msra.mxu0 %v2801_v21  ;;  %1595 = vmatprep.mubr.f32.mxu0 %v3347_v1  ;;  %v2904_v21 = vld [vmem:[%s5711_s4 + $0x938] sm:$0xff] }
 0x1bf   :  { %1633 = vmatpush1.msra.mxu1 %v2803_v36  ;;  %1666 = vmatprep.mubr.f32.mxu1 %v3347_v1  ;;  %v2811_v36 = vld [vmem:[%s5711_s4 + $0x650] sm:$0xff] }
 0x1c0   :  { %1596 = vmatmul.mubr.f32.vlgmr.msra.gmra.mxu0 %v4894_v51  ;;  %1667 = vmatmul.mubr.f32.vlgmr.msra.gmra.mxu1 %v4894_v51 }
 0x1c1   :  { %1673 = vmatprep.subr.mxu0 %v2896_v48  ;;  %1847 = vmatprep.subr.mxu1 %v2988_v61  ;;  %v2903_v48 = vld [vmem:[%s5711_s4 + $0x930] sm:$0xff]  ;;  %v2806_v61 = vld [vmem:[%s5711_s4 + $0x628] sm:$0xff] }
 0x1c2   :  { %1674 = vmatpush1.msra.mxu0 %v2895_v10  ;;  %1848 = vmatpush1.msra.mxu1 %v2987_v55  ;;  %v2898_v10 = vld [vmem:[%s5711_s4 + $0x908] sm:$0xff]  ;;  %v2805_v55 = vld [vmem:[%s5711_s4 + $0x620] sm:$0xff] }
 0x1c3   :  { %1675 = vmatprep.subr.mxu0 %v2890_v0  ;;  %1849 = vmatprep.subr.mxu1 %v2982_v38  ;;  %v2897_v0 = vld [vmem:[%s5711_s4 + $0x900] sm:$0xff]  ;;  %v5092_v38 = vmax.f32 %v4299_v5, 0.0  ;;  %v2991_v5 = vld [vmem:[%s5711_s4 + $0xbf0] sm:$0xff] }
 0x1c4   :  { %1676 = vmatpush1.msra.mxu0 %v2889_v17  ;;  %1850 = vmatpush1.msra.mxu1 %v2981_v33  ;;  %v2990_v17 = vld [vmem:[%s5711_s4 + $0xbe8] sm:$0xff]  ;;  %v2992_v33 = vld [vmem:[%s5711_s4 + $0xbf8] sm:$0xff] }
 0x1c5   :  { %1677 = vmatprep.subr.mxu0 %v2884_v42  ;;  %1851 = vmatprep.subr.mxu1 %v2976_v50  ;;  %v2989_v42 = vld [vmem:[%s5711_s4 + $0xbe0] sm:$0xff]  ;;  %v2984_v50 = vld [vmem:[%s5711_s4 + $0xbb8] sm:$0xff] }
 0x1c6   :  { %1678 = vmatpush1.msra.mxu0 %v2883_v60  ;;  %1852 = vmatpush1.msra.mxu1 %v2975_v53  ;;  %v2986_v60 = vld [vmem:[%s5711_s4 + $0xbc8] sm:$0xff]  ;;  %v2983_v53 = vld [vmem:[%s5711_s4 + $0xbb0] sm:$0xff] }
 0x1c7   :  { %1679 = vmatprep.subr.mxu0 %v2878_v6  ;;  %1853 = vmatprep.subr.mxu1 %v2970_v11  ;;  %v2978_v6 = vld [vmem:[%s5711_s4 + $0xb88] sm:$0xff]  ;;  %v2980_v11 = vld [vmem:[%s5711_s4 + $0xb98] sm:$0xff] }
 0x1c8   :  { %1680 = vmatpush1.msra.mxu0 %v2877_v52  ;;  %1854 = vmatpush1.msra.mxu1 %v2969_v32  ;;  %v2977_v52 = vld [vmem:[%s5711_s4 + $0xb80] sm:$0xff]  ;;  %v2979_v32 = vld [vmem:[%s5711_s4 + $0xb90] sm:$0xff] }
 0x1c9   :  { %1681 = vmatprep.subr.mxu0 %v2872_v49  ;;  %1855 = vmatprep.subr.mxu1 %v2964_v19  ;;  %v2972_v49 = vld [vmem:[%s5711_s4 + $0xb58] sm:$0xff]  ;;  %v2974_v19 = vld [vmem:[%s5711_s4 + $0xb68] sm:$0xff] }
 0x1ca   :  { %1682 = vmatpush1.msra.mxu0 %v2871_v28  ;;  %1856 = vmatpush1.msra.mxu1 %v2963_v29  ;;  %v2971_v28 = vld [vmem:[%s5711_s4 + $0xb50] sm:$0xff]  ;;  %v2973_v29 = vld [vmem:[%s5711_s4 + $0xb60] sm:$0xff] }
 0x1cb   :  { %1683 = vmatprep.subr.mxu0 %v2866_v14  ;;  %1857 = vmatprep.subr.mxu1 %v2958_v40  ;;  %v2966_v14 = vld [vmem:[%s5711_s4 + $0xb28] sm:$0xff]  ;;  %v2968_v40 = vld [vmem:[%s5711_s4 + $0xb38] sm:$0xff] }
 0x1cc   :  { %1684 = vmatpush1.msra.mxu0 %v2865_v12  ;;  %1858 = vmatpush1.msra.mxu1 %v2957_v25  ;;  %v2965_v12 = vld [vmem:[%s5711_s4 + $0xb20] sm:$0xff]  ;;  %v2967_v25 = vld [vmem:[%s5711_s4 + $0xb30] sm:$0xff] }
 0x1cd   :  { %1685 = vmatprep.subr.mxu0 %v2860_v43  ;;  %1859 = vmatprep.subr.mxu1 %v2952_v3  ;;  %v2960_v43 = vld [vmem:[%s5711_s4 + $0xaf8] sm:$0xff]  ;;  %v2962_v3 = vld [vmem:[%s5711_s4 + $0xb08] sm:$0xff] }
 0x1ce   :  { %1686 = vmatpush1.msra.mxu0 %v2859_v59  ;;  %1860 = vmatpush1.msra.mxu1 %v2951_v9  ;;  %v2959_v59 = vld [vmem:[%s5711_s4 + $0xaf0] sm:$0xff]  ;;  %v2961_v9 = vld [vmem:[%s5711_s4 + $0xb00] sm:$0xff] }
 0x1cf   :  { %1687 = vmatprep.subr.mxu0 %v2854_v24  ;;  %1861 = vmatprep.subr.mxu1 %v2946_v44  ;;  %v2954_v24 = vld [vmem:[%s5711_s4 + $0xac8] sm:$0xff]  ;;  %v2956_v44 = vld [vmem:[%s5711_s4 + $0xad8] sm:$0xff] }
 0x1d0   :  { %1688 = vmatpush1.msra.mxu0 %v2853_v27  ;;  %1862 = vmatpush1.msra.mxu1 %v2945_v4  ;;  %v2953_v27 = vld [vmem:[%s5711_s4 + $0xac0] sm:$0xff]  ;;  %v2955_v4 = vld [vmem:[%s5711_s4 + $0xad0] sm:$0xff] }
 0x1d1   :  { %1689 = vmatprep.subr.mxu0 %v2848_v56  ;;  %1863 = vmatprep.subr.mxu1 %v2940_v62  ;;  %v2948_v56 = vld [vmem:[%s5711_s4 + $0xa98] sm:$0xff]  ;;  %v2950_v62 = vld [vmem:[%s5711_s4 + $0xaa8] sm:$0xff] }
 0x1d2   :  { %1690 = vmatpush1.msra.mxu0 %v2847_v41  ;;  %1864 = vmatpush1.msra.mxu1 %v2939_v35  ;;  %v2947_v41 = vld [vmem:[%s5711_s4 + $0xa90] sm:$0xff]  ;;  %v2949_v35 = vld [vmem:[%s5711_s4 + $0xaa0] sm:$0xff] }
 0x1d3   :  { %1691 = vmatprep.subr.mxu0 %v2842_v23  ;;  %1865 = vmatprep.subr.mxu1 %v2934_v31  ;;  %v2942_v23 = vld [vmem:[%s5711_s4 + $0xa68] sm:$0xff]  ;;  %v2944_v31 = vld [vmem:[%s5711_s4 + $0xa78] sm:$0xff] }
 0x1d4   :  { %1692 = vmatpush1.msra.mxu0 %v2841_v63  ;;  %1866 = vmatpush1.msra.mxu1 %v2933_v2  ;;  %v2941_v63 = vld [vmem:[%s5711_s4 + $0xa60] sm:$0xff]  ;;  %v2943_v2 = vld [vmem:[%s5711_s4 + $0xa70] sm:$0xff] }
 0x1d5   :  { %1693 = vmatprep.subr.mxu0 %v2836_v22  ;;  %1867 = vmatprep.subr.mxu1 %v2928_v47  ;;  %v2936_v22 = vld [vmem:[%s5711_s4 + $0xa38] sm:$0xff]  ;;  %v2938_v47 = vld [vmem:[%s5711_s4 + $0xa48] sm:$0xff] }
 0x1d6   :  { %1694 = vmatpush1.msra.mxu0 %v2835_v7  ;;  %1868 = vmatpush1.msra.mxu1 %v2927_v8  ;;  %v2935_v7 = vld [vmem:[%s5711_s4 + $0xa30] sm:$0xff]  ;;  %v2937_v8 = vld [vmem:[%s5711_s4 + $0xa40] sm:$0xff] }
 0x1d7   :  { %1695 = vmatprep.subr.mxu0 %v2830_v30  ;;  %1869 = vmatprep.subr.mxu1 %v2922_v57  ;;  %v2930_v30 = vld [vmem:[%s5711_s4 + $0xa08] sm:$0xff]  ;;  %v2932_v57 = vld [vmem:[%s5711_s4 + $0xa18] sm:$0xff] }
 0x1d8   :  { %1696 = vmatpush1.msra.mxu0 %v2829_v45  ;;  %1870 = vmatpush1.msra.mxu1 %v2921_v13  ;;  %v2929_v45 = vld [vmem:[%s5711_s4 + $0xa00] sm:$0xff]  ;;  %v2931_v13 = vld [vmem:[%s5711_s4 + $0xa10] sm:$0xff] }
 0x1d9   :  { %1697 = vmatprep.subr.mxu0 %v2824_v18  ;;  %1871 = vmatprep.subr.mxu1 %v2916_v20  ;;  %v2924_v18 = vld [vmem:[%s5711_s4 + $0x9d8] sm:$0xff]  ;;  %v2926_v20 = vld [vmem:[%s5711_s4 + $0x9e8] sm:$0xff] }
 0x1da   :  { %1698 = vmatpush1.msra.mxu0 %v2823_v34  ;;  %1872 = vmatpush1.msra.mxu1 %v2915_v26  ;;  %v2923_v34 = vld [vmem:[%s5711_s4 + $0x9d0] sm:$0xff]  ;;  %v2925_v26 = vld [vmem:[%s5711_s4 + $0x9e0] sm:$0xff] }
 0x1db   :  { %1699 = vmatprep.subr.mxu0 %v2818_v16  ;;  %1873 = vmatprep.subr.mxu1 %v2910_v58  ;;  %v2918_v16 = vld [vmem:[%s5711_s4 + $0x9a8] sm:$0xff]  ;;  %v2920_v58 = vld [vmem:[%s5711_s4 + $0x9b8] sm:$0xff] }
 0x1dc   :  { %1700 = vmatpush1.msra.mxu0 %v2817_v37  ;;  %1874 = vmatpush1.msra.mxu1 %v2909_v39  ;;  %v2917_v37 = vld [vmem:[%s5711_s4 + $0x9a0] sm:$0xff]  ;;  %v2919_v39 = vld [vmem:[%s5711_s4 + $0x9b0] sm:$0xff] }
 0x1dd   :  { %1701 = vmatprep.subr.mxu0 %v2812_v46  ;;  %1875 = vmatprep.subr.mxu1 %v2904_v21  ;;  %v2912_v46 = vld [vmem:[%s5711_s4 + $0x978] sm:$0xff]  ;;  %v2914_v21 = vld [vmem:[%s5711_s4 + $0x988] sm:$0xff] }
 0x1de   :  { %1702 = vmatpush1.msra.mxu0 %v2811_v36  ;;  %1876 = vmatpush1.msra.mxu1 %v2903_v48  ;;  %v2911_v36 = vld [vmem:[%s5711_s4 + $0x970] sm:$0xff]  ;;  %v2913_v48 = vld [vmem:[%s5711_s4 + $0x980] sm:$0xff] }
 0x1df   :  { %1703 = vmatprep.subr.mxu0 %v2806_v61  ;;  %1877 = vmatprep.subr.mxu1 %v2898_v10  ;;  %v2906_v61 = vld [vmem:[%s5711_s4 + $0x948] sm:$0xff]  ;;  %v2908_v10 = vld [vmem:[%s5711_s4 + $0x958] sm:$0xff] }
 0x1e0   :  { %1704 = vmatpush1.msra.mxu0 %v2805_v55  ;;  %1737 = vmatprep.mubr.f32.mxu0 %v3347_v1  ;;  %v2905_v55 = vld [vmem:[%s5711_s4 + $0x940] sm:$0xff] }
 0x1e1   :  { %1878 = vmatpush1.msra.mxu1 %v2897_v0  ;;  %1911 = vmatprep.mubr.f32.mxu1 %v3347_v1  ;;  %v2907_v0 = vld [vmem:[%s5711_s4 + $0x950] sm:$0xff] }
 0x1e2   :  { %1738 = vmatmul.mubr.f32.vlgmr.msra.gmra.mxu0 %v4894_v51  ;;  %1912 = vmatmul.mubr.f32.vlgmr.msra.gmra.mxu1 %v5092_v38  ;;  %v2985_v51 = vld [vmem:[%s5711_s4 + $0xbc0] sm:$0xff] }
 0x1e3   :  { %1918 = vmatprep.subr.mxu0 %v2990_v17  ;;  %1989 = vmatprep.subr.mxu1 %v2992_v33  ;;  %v2900_v17 = vld [vmem:[%s5711_s4 + $0x918] sm:$0xff]  ;;  %v2902_v33 = vld [vmem:[%s5711_s4 + $0x928] sm:$0xff] }
 0x1e4   :  { %1919 = vmatpush1.msra.mxu0 %v2989_v42  ;;  %1990 = vmatpush1.msra.mxu1 %v2991_v5  ;;  %v2899_v42 = vld [vmem:[%s5711_s4 + $0x910] sm:$0xff]  ;;  %v2901_v5 = vld [vmem:[%s5711_s4 + $0x920] sm:$0xff] }
 0x1e5   :  { %1920 = vmatprep.subr.mxu0 %v2984_v50  ;;  %1991 = vmatprep.subr.mxu1 %v2986_v60  ;;  %v2408_v50 = vld [vmem:[%s5714_s7 + $0xf8] sm:$0xff] }
 0x1e6   :  { %1921 = vmatpush1.msra.mxu0 %v2983_v53  ;;  %1992 = vmatpush1.msra.mxu1 %v2985_v51  ;;  %v2392_v60 = vld [vmem:[%s5714_s7 + $0x78] sm:$0xff]  ;;  %v2391_v51 = vld [vmem:[%s5714_s7 + $0x70] sm:$0xff] }
 0x1e7   :  { %1922 = vmatprep.subr.mxu0 %v2978_v6  ;;  %1993 = vmatprep.subr.mxu1 %v2980_v11  ;;  %v2440_v53 = vld [vmem:[%s5714_s7 + $0x1f8] sm:$0xff]  ;;  %v2439_v6 = vld [vmem:[%s5714_s7 + $0x1f0] sm:$0xff]  ;;  %v2406_v11 = vld [vmem:[%s5714_s7 + $0xe8] sm:$0xff] }
 0x1e8   :  { %1923 = vmatpush1.msra.mxu0 %v2977_v52  ;;  %1994 = vmatpush1.msra.mxu1 %v2979_v32  ;;  %v2423_v52 = vld [vmem:[%s5714_s7 + $0x170] sm:$0xff]  ;;  %v2390_v32 = vld [vmem:[%s5714_s7 + $0x68] sm:$0xff] }
 0x1e9   :  { %1924 = vmatprep.subr.mxu0 %v2972_v49  ;;  %1995 = vmatprep.subr.mxu1 %v2974_v19  ;;  %v2438_v49 = vld [vmem:[%s5714_s7 + $0x1e8] sm:$0xff]  ;;  %v2405_v19 = vld [vmem:[%s5714_s7 + $0xe0] sm:$0xff] }
 0x1ea   :  { %1925 = vmatpush1.msra.mxu0 %v2971_v28  ;;  %1996 = vmatpush1.msra.mxu1 %v2973_v29  ;;  %v2422_v28 = vld [vmem:[%s5714_s7 + $0x168] sm:$0xff]  ;;  %v2389_v29 = vld [vmem:[%s5714_s7 + $0x60] sm:$0xff] }
 0x1eb   :  { %1926 = vmatprep.subr.mxu0 %v2966_v14  ;;  %1997 = vmatprep.subr.mxu1 %v2968_v40  ;;  %v2437_v14 = vld [vmem:[%s5714_s7 + $0x1e0] sm:$0xff]  ;;  %v2404_v40 = vld [vmem:[%s5714_s7 + $0xd8] sm:$0xff] }
 0x1ec   :  { %1927 = vmatpush1.msra.mxu0 %v2965_v12  ;;  %1998 = vmatpush1.msra.mxu1 %v2967_v25  ;;  %v2421_v12 = vld [vmem:[%s5714_s7 + $0x160] sm:$0xff]  ;;  %v2388_v25 = vld [vmem:[%s5714_s7 + $0x58] sm:$0xff] }
 0x1ed   :  { %1928 = vmatprep.subr.mxu0 %v2960_v43  ;;  %1999 = vmatprep.subr.mxu1 %v2962_v3  ;;  %v2436_v43 = vld [vmem:[%s5714_s7 + $0x1d8] sm:$0xff]  ;;  %v2403_v3 = vld [vmem:[%s5714_s7 + $0xd0] sm:$0xff] }
 0x1ee   :  { %1929 = vmatpush1.msra.mxu0 %v2959_v59  ;;  %2000 = vmatpush1.msra.mxu1 %v2961_v9  ;;  %v2420_v59 = vld [vmem:[%s5714_s7 + $0x158] sm:$0xff]  ;;  %v2387_v9 = vld [vmem:[%s5714_s7 + $0x50] sm:$0xff] }
 0x1ef   :  { %1930 = vmatprep.subr.mxu0 %v2954_v24  ;;  %2001 = vmatprep.subr.mxu1 %v2956_v44  ;;  %v2435_v24 = vld [vmem:[%s5714_s7 + $0x1d0] sm:$0xff]  ;;  %v2402_v44 = vld [vmem:[%s5714_s7 + $0xc8] sm:$0xff] }
 0x1f0   :  { %1931 = vmatpush1.msra.mxu0 %v2953_v27  ;;  %2002 = vmatpush1.msra.mxu1 %v2955_v4  ;;  %v2419_v27 = vld [vmem:[%s5714_s7 + $0x150] sm:$0xff]  ;;  %v2386_v4 = vld [vmem:[%s5714_s7 + $0x48] sm:$0xff] }
 0x1f1   :  { %1932 = vmatprep.subr.mxu0 %v2948_v56  ;;  %2003 = vmatprep.subr.mxu1 %v2950_v62  ;;  %v2434_v56 = vld [vmem:[%s5714_s7 + $0x1c8] sm:$0xff]  ;;  %v2401_v62 = vld [vmem:[%s5714_s7 + $0xc0] sm:$0xff] }
 0x1f2   :  { %1933 = vmatpush1.msra.mxu0 %v2947_v41  ;;  %2004 = vmatpush1.msra.mxu1 %v2949_v35  ;;  %v2418_v41 = vld [vmem:[%s5714_s7 + $0x148] sm:$0xff]  ;;  %v2385_v35 = vld [vmem:[%s5714_s7 + $0x40] sm:$0xff] }
 0x1f3   :  { %1934 = vmatprep.subr.mxu0 %v2942_v23  ;;  %2005 = vmatprep.subr.mxu1 %v2944_v31  ;;  %v2433_v23 = vld [vmem:[%s5714_s7 + $0x1c0] sm:$0xff]  ;;  %v2400_v31 = vld [vmem:[%s5714_s7 + $0xb8] sm:$0xff] }
 0x1f4   :  { %1935 = vmatpush1.msra.mxu0 %v2941_v63  ;;  %2006 = vmatpush1.msra.mxu1 %v2943_v2  ;;  %v2417_v63 = vld [vmem:[%s5714_s7 + $0x140] sm:$0xff]  ;;  %v2384_v2 = vld [vmem:[%s5714_s7 + $0x38] sm:$0xff] }
 0x1f5   :  { %1936 = vmatprep.subr.mxu0 %v2936_v22  ;;  %2007 = vmatprep.subr.mxu1 %v2938_v47  ;;  %v2432_v22 = vld [vmem:[%s5714_s7 + $0x1b8] sm:$0xff]  ;;  %v2399_v47 = vld [vmem:[%s5714_s7 + $0xb0] sm:$0xff] }
 0x1f6   :  { %1937 = vmatpush1.msra.mxu0 %v2935_v7  ;;  %2008 = vmatpush1.msra.mxu1 %v2937_v8  ;;  %v2416_v7 = vld [vmem:[%s5714_s7 + $0x138] sm:$0xff]  ;;  %v2383_v8 = vld [vmem:[%s5714_s7 + $0x30] sm:$0xff] }
 0x1f7   :  { %1938 = vmatprep.subr.mxu0 %v2930_v30  ;;  %2009 = vmatprep.subr.mxu1 %v2932_v57  ;;  %v2431_v30 = vld [vmem:[%s5714_s7 + $0x1b0] sm:$0xff]  ;;  %v2398_v57 = vld [vmem:[%s5714_s7 + $0xa8] sm:$0xff] }
 0x1f8   :  { %1939 = vmatpush1.msra.mxu0 %v2929_v45  ;;  %2010 = vmatpush1.msra.mxu1 %v2931_v13  ;;  %v2415_v45 = vld [vmem:[%s5714_s7 + $0x130] sm:$0xff]  ;;  %v2382_v13 = vld [vmem:[%s5714_s7 + $0x28] sm:$0xff] }
 0x1f9   :  { %1940 = vmatprep.subr.mxu0 %v2924_v18  ;;  %2011 = vmatprep.subr.mxu1 %v2926_v20  ;;  %v2430_v18 = vld [vmem:[%s5714_s7 + $0x1a8] sm:$0xff]  ;;  %v2397_v20 = vld [vmem:[%s5714_s7 + $0xa0] sm:$0xff] }
 0x1fa   :  { %1941 = vmatpush1.msra.mxu0 %v2923_v34  ;;  %2012 = vmatpush1.msra.mxu1 %v2925_v26  ;;  %v2414_v34 = vld [vmem:[%s5714_s7 + $0x128] sm:$0xff]  ;;  %v2381_v26 = vld [vmem:[%s5714_s7 + $0x20] sm:$0xff] }
 0x1fb   :  { %1942 = vmatprep.subr.mxu0 %v2918_v16  ;;  %2013 = vmatprep.subr.mxu1 %v2920_v58  ;;  %v2429_v16 = vld [vmem:[%s5714_s7 + $0x1a0] sm:$0xff] }
 0x1fc   :  { %1943 = vmatpush1.msra.mxu0 %v2917_v37  ;;  %2014 = vmatpush1.msra.mxu1 %v2919_v39  ;;  %v2396_v39 = vld [vmem:[%s5714_s7 + $0x98] sm:$0xff] }
 0x1fd   :  { %1944 = vmatprep.subr.mxu0 %v2912_v46  ;;  %2015 = vmatprep.subr.mxu1 %v2914_v21  ;;  %v2413_v46 = vld [vmem:[%s5714_s7 + $0x120] sm:$0xff]  ;;  %v2380_v21 = vld [vmem:[%s5714_s7 + $0x18] sm:$0xff] }
 0x1fe   :  { %1945 = vmatpush1.msra.mxu0 %v2911_v36  ;;  %2016 = vmatpush1.msra.mxu1 %v2913_v48  ;;  %v2428_v36 = vld [vmem:[%s5714_s7 + $0x198] sm:$0xff]  ;;  %v2395_v48 = vld [vmem:[%s5714_s7 + $0x90] sm:$0xff] }
 0x1ff   :  { %1946 = vmatprep.subr.mxu0 %v2906_v61  ;;  %2017 = vmatprep.subr.mxu1 %v2908_v10  ;;  %v2412_v61 = vld [vmem:[%s5714_s7 + $0x118] sm:$0xff]  ;;  %v2379_v10 = vld [vmem:[%s5714_s7 + $0x10] sm:$0xff] }
 0x200   :  { %1947 = vmatpush1.msra.mxu0 %v2905_v55  ;;  %2018 = vmatpush1.msra.mxu1 %v2907_v0  ;;  %v2427_v55 = vld [vmem:[%s5714_s7 + $0x190] sm:$0xff] }
 0x201   :  { %1948 = vmatprep.subr.mxu0 %v2900_v17  ;;  %2019 = vmatprep.subr.mxu1 %v2902_v33  ;;  %v2394_v33 = vld [vmem:[%s5714_s7 + $0x88] sm:$0xff] }
 0x202   :  { %1949 = vmatpush1.msra.mxu0 %v2899_v42  ;;  %1982 = vmatprep.mubr.f32.mxu0 %v3347_v1  ;;  %v2411_v42 = vld [vmem:[%s5714_s7 + $0x110] sm:$0xff] }
 0x203   :  { %2020 = vmatpush1.msra.mxu1 %v2901_v5  ;;  %2053 = vmatprep.mubr.f32.mxu1 %v3347_v1  ;;  %v2407_v1 = vld [vmem:[%s5714_s7 + $0xf0] sm:$0xff]  ;;  %v2378_v5 = vld [vmem:[%s5714_s7 + $0x8] sm:$0xff] }
 0x204   :  { %1983 = vmatmul.mubr.f32.vlgmr.msra.gmra.mxu0 %v5092_v38  ;;  %2054 = vmatmul.mubr.f32.vlgmr.msra.gmra.mxu1 %v5092_v38  ;;  %v2424_v38 = vld [vmem:[%s5714_s7 + $0x178] sm:$0xff] }
 0x205   :  { %3062 = vmatprep.subr.mxu0 %v2408_v50  ;;  %3097 = vmatprep.subr.mxu1 %v2440_v53  ;;  %v2426_v50 = vld [vmem:[%s5714_s7 + $0x188] sm:$0xff] }
 0x206   :  { %3063 = vmatpush3.msra.mxu0 %v2392_v60  ;;  %3098 = vmatpush3.msra.mxu1 %v2424_v38  ;;  %v2410_v38 = vld [vmem:[%s5714_s7 + $0x108] sm:$0xff] }
 0x207   :  { %3064 = vmatprep.subr.mxu0 %v2407_v1  ;;  %3099 = vmatprep.subr.mxu1 %v2439_v6  ;;  %v2393_v1 = vld [vmem:[%s5714_s7 + $0x80] sm:$0xff] }
 0x208   :  { %3065 = vmatpush3.msra.mxu0 %v2391_v51  ;;  %3100 = vmatpush3.msra.mxu1 %v2423_v52  ;;  %v2377_v51 = vld [vmem:[%s5714_s7] sm:$0xff] }
 0x209   :  { %3066 = vmatprep.subr.mxu0 %v2406_v11  ;;  %3101 = vmatprep.subr.mxu1 %v2438_v49  ;;  %v2425_v6 = vld [vmem:[%s5714_s7 + $0x180] sm:$0xff]  ;;  %v2472_v49 = vld [vmem:[%s5714_s7 + $0x2f8] sm:$0xff] }
 0x20a   :  { %3067 = vmatpush3.msra.mxu0 %v2390_v32  ;;  %3102 = vmatpush3.msra.mxu1 %v2422_v28  ;;  %v2409_v32 = vld [vmem:[%s5714_s7 + $0x100] sm:$0xff] }
 0x20b   :  { %3068 = vmatprep.subr.mxu0 %v2405_v19  ;;  %3103 = vmatprep.subr.mxu1 %v2437_v14 }
 0x20c   :  { %3069 = vmatpush3.msra.mxu0 %v2389_v29  ;;  %3104 = vmatpush3.msra.mxu1 %v2421_v12 }
 0x20d   :  { %3070 = vmatprep.subr.mxu0 %v2404_v40  ;;  %3105 = vmatprep.subr.mxu1 %v2436_v43 }
 0x20e   :  { %3071 = vmatpush3.msra.mxu0 %v2388_v25  ;;  %3106 = vmatpush3.msra.mxu1 %v2420_v59 }
 0x20f   :  { %3072 = vmatprep.subr.mxu0 %v2403_v3  ;;  %3107 = vmatprep.subr.mxu1 %v2435_v24 }
 0x210   :  { %3073 = vmatpush3.msra.mxu0 %v2387_v9  ;;  %3108 = vmatpush3.msra.mxu1 %v2419_v27 }
 0x211   :  { %3074 = vmatprep.subr.mxu0 %v2402_v44  ;;  %3109 = vmatprep.subr.mxu1 %v2434_v56 }
 0x212   :  { %3075 = vmatpush3.msra.mxu0 %v2386_v4  ;;  %3110 = vmatpush3.msra.mxu1 %v2418_v41 }
 0x213   :  { %3076 = vmatprep.subr.mxu0 %v2401_v62  ;;  %3111 = vmatprep.subr.mxu1 %v2433_v23 }
 0x214   :  { %3077 = vmatpush3.msra.mxu0 %v2385_v35  ;;  %3112 = vmatpush3.msra.mxu1 %v2417_v63 }
 0x215   :  { %3078 = vmatprep.subr.mxu0 %v2400_v31  ;;  %3113 = vmatprep.subr.mxu1 %v2432_v22 }
 0x216   :  { %3079 = vmatpush3.msra.mxu0 %v2384_v2  ;;  %3114 = vmatpush3.msra.mxu1 %v2416_v7 }
 0x217   :  { %3080 = vmatprep.subr.mxu0 %v2399_v47  ;;  %3115 = vmatprep.subr.mxu1 %v2431_v30 }
 0x218   :  { %3081 = vmatpush3.msra.mxu0 %v2383_v8  ;;  %3116 = vmatpush3.msra.mxu1 %v2415_v45 }
 0x219   :  { %3082 = vmatprep.subr.mxu0 %v2398_v57  ;;  %3117 = vmatprep.subr.mxu1 %v2430_v18 }
 0x21a   :  { %3083 = vmatpush3.msra.mxu0 %v2382_v13  ;;  %3118 = vmatpush3.msra.mxu1 %v2414_v34 }
 0x21b   :  { %v1074_v58 = vpop.f32.mrf.mxu0  ;;  %v5435_v37 = vpop.f32.mrf.mxu1  ;;  %3084 = vmatprep.subr.mxu0 %v2397_v20  ;;  %3119 = vmatprep.subr.mxu1 %v2429_v16 }
 0x21c   :  { %3085 = vmatpush3.msra.mxu0 %v2381_v26  ;;  %3120 = vmatpush3.msra.mxu1 %v2413_v46 }
 0x21d   :  { %3086 = vmatprep.subr.mxu0 %v2396_v39  ;;  %v1076_v0 = vpop.f32.mrf.mxu0  ;;  %v5461_v17 = vpop.f32.mrf.mxu1  ;;  %3121 = vmatprep.subr.mxu1 %v2428_v36 }
 0x21e   :  { %3087 = vmatpush3.msra.mxu0 %v2380_v21  ;;  %3122 = vmatpush3.msra.mxu1 %v2412_v61 }
 0x21f   :  { %3088 = vmatprep.subr.mxu0 %v2395_v48  ;;  %3123 = vmatprep.subr.mxu1 %v2427_v55 }
 0x220   :  { %3089 = vmatpush3.msra.mxu0 %v2379_v10  ;;  %3124 = vmatpush3.msra.mxu1 %v2411_v42 }
 0x221   :  { %3090 = vmatprep.subr.mxu0 %v2394_v33  ;;  %3125 = vmatprep.subr.mxu1 %v2426_v50 }
 0x222   :  { %3091 = vmatpush3.msra.mxu0 %v2378_v5  ;;  %3126 = vmatpush3.msra.mxu1 %v2410_v38 }
 0x223   :  { %3092 = vmatprep.subr.mxu0 %v2393_v1  ;;  %3127 = vmatprep.subr.mxu1 %v2425_v6 }
 0x224   :  { %3093 = vmatpush3.msra.mxu0 %v2377_v51  ;;  %3128 = vmatpush3.msra.mxu1 %v2409_v32 }
 0x225   :  { %3132 = vmatprep.subr.mxu0 %v2472_v49 }
 0x23c   :  { %v5475_v60 = vpop.f32.mrf.mxu0  ;;  %v1287_v53 = vpop.f32.mrf.mxu1 }
 0x23d   :  { %v1288_v59 = vadd.f32 %v1287_v53, %v1074_v58 }
 0x23e   :  { %v1218_v11 = vpop.f32.mrf.mxu0  ;;  %v1289_v52 = vpop.f32.mrf.mxu1 }
 0x23f   :  { %v1290_v3 = vadd.f32 %v1289_v52, %v1076_v0 }
 0x25e   :  { %v1358_v19 = vpop.f32.mrf.mxu0  ;;  %v1429_v28 = vpop.f32.mrf.mxu1 }
 0x25f   :  { %v1359_v10 = vadd.f32 %v1358_v19, %v5435_v37  ;;  %v1430_v55 = vadd.f32 %v1429_v28, %v5475_v60 }
 0x260   :  { %v1360_v29 = vpop.f32.mrf.mxu0  ;;  %v1431_v14 = vpop.f32.mrf.mxu1 }
 0x261   :  { %v1361_v53 = vadd.f32 %v1360_v29, %v5461_v17  ;;  %v1432_v51 = vadd.f32 %v1431_v14, %v1218_v11 }
 0x280   :  { %v1597_v40 = vpop.f32.mrf.mxu0  ;;  %v1668_v12 = vpop.f32.mrf.mxu1 }
 0x281   :  { %v1744_v44 = vadd.f32 %v1597_v40, %v1288_v59  ;;  %v1746_v1 = vadd.f32 %v1668_v12, %v1359_v10 }
 0x282   :  { %v1599_v25 = vpop.f32.mrf.mxu0  ;;  %v1670_v43 = vpop.f32.mrf.mxu1 }
 0x283   :  { %v1745_v24 = vadd.f32 %v1599_v25, %v1290_v3  ;;  %v1747_v32 = vadd.f32 %v1670_v43, %v1361_v53 }
 0x2a2   :  { %v1913_v9 = vpop.f32.mrf.mxu1  ;;  %v1739_v21 = vpop.f32.mrf.mxu0 }
 0x2a3   :  { %v5497_v56 = vadd.f32 %v1913_v9, %v1744_v44  ;;  %v1748_v38 = vadd.f32 %v1739_v21, %v1430_v55 }
 0x2a4   :  { %v1915_v27 = vpop.f32.mrf.mxu1  ;;  %v1741_v42 = vpop.f32.mrf.mxu0 }
 0x2a5   :  { %v5495_v4 = vadd.f32 %v1915_v27, %v1745_v24  ;;  %v2115_v35 = vmul.f32 %v5497_v56, %v5497_v56  ;;  %v2066_v31 = vsel %vm710_vm6, %v5497_v56, 0.0  ;;  %v1749_v19 = vadd.f32 %v1741_v42, %v1432_v51 }
 0x2a6   :  { %v2067_v2 = vrot.slane %v2066_v31, 4 }
 0x2a7   :  { %v2073_v62 = vsel %vm710_vm6, %v5495_v4, 0.0  ;;  %v2116_v41 = vmul.f32 %v5495_v4, %v5495_v4  ;;  %v2121_v22 = vsel %vm710_vm6, %v2115_v35, 0.0 }
 0x2a8   :  { %v2074_v23 = vrot.slane %v2073_v62, 4  ;;  %v2122_v8 = vrot.slane %v2121_v22, 4  ;;  %v2068_v30 = vadd.f32 %v2067_v2, %v2066_v31 }
 0x2a9   :  { %v2128_v63 = vsel %vm710_vm6, %v2116_v41, 0.0 }
 0x2aa   :  { %v2075_v47 = vadd.f32 %v2074_v23, %v2073_v62  ;;  %v2129_v7 = vrot.slane %v2128_v63, 4  ;;  %v2123_v13 = vadd.f32 %v2122_v8, %v2121_v22  ;;  %v2069_v18 = vrot.slane %v2068_v30, 2 }
 0x2ac   :  { %v2076_v57 = vrot.slane %v2075_v47, 2  ;;  %v2130_v45 = vadd.f32 %v2129_v7, %v2128_v63  ;;  %v2124_v26 = vrot.slane %v2123_v13, 2  ;;  %v2070_v16 = vadd.f32 %v2069_v18, %v2068_v30 }
 0x2ae   :  { %v2077_v20 = vadd.f32 %v2076_v57, %v2075_v47  ;;  %v2131_v34 = vrot.slane %v2130_v45, 2  ;;  %v2125_v46 = vadd.f32 %v2124_v26, %v2123_v13  ;;  %v2071_v36 = vrot.slane %v2070_v16, 1 }
 0x2b0   :  { %v2078_v58 = vrot.slane %v2077_v20, 1  ;;  %v2132_v39 = vadd.f32 %v2131_v34, %v2130_v45  ;;  %v2126_v0 = vrot.slane %v2125_v46, 1  ;;  %v2072_v33 = vadd.f32 %v2071_v36, %v2070_v16 }
 0x2b2   :  { %v2079_v48 = vadd.f32 %v2078_v58, %v2077_v20  ;;  %v2133_v61 = vrot.slane %v2132_v39, 1  ;;  %v2127_v49 = vadd.f32 %v2126_v0, %v2125_v46  ;;  %v5518_v60 = vmul.f32 0.25, %v2072_v33 }
 0x2b4   :  { %v5511_v5 = vmul.f32 0.25, %v2079_v48  ;;  %v2134_v50 = vadd.f32 %v2133_v61, %v2132_v39  ;;  %v5538_v44 = vmul.f32 0.25, %v2127_v49  ;;  %v5544_v41 = vmul.f32 %v5518_v60, %v5518_v60 }
 0x2b6   :  { %v5520_v28 = vmul.f32 0.25, %v2134_v50  ;;  %v5524_v25 = vmul.f32 %v5511_v5, %v5511_v5 }
 0x2b8   :  { %v2176_v7 = vsub.f32 %v5520_v28, %v5524_v25 }
 0x2c4   :  { %v1984_v6 = vpop.f32.mrf.mxu0  ;;  %v2055_v52 = vpop.f32.mrf.mxu1 }
 0x2c5   :  { %v5514_v40 = vadd.f32 %v1984_v6, %v1746_v1  ;;  %v5516_v37 = vadd.f32 %v2055_v52, %v1748_v38 }
 0x2c6   :  { %v1986_v17 = vpop.f32.mrf.mxu0  ;;  %v2057_v29 = vpop.f32.mrf.mxu1 }
 0x2c7   :  { %v2080_v11 = vsel %vm710_vm6, %v5514_v40, 0.0  ;;  %v2117_v14 = vmul.f32 %v5514_v40, %v5514_v40  ;;  %v2094_v12 = vsel %vm710_vm6, %v5516_v37, 0.0  ;;  %v2119_v43 = vmul.f32 %v5516_v37, %v5516_v37 }
 0x2c8   :  { %v2081_v3 = vrot.slane %v2080_v11, 4  ;;  %v2095_v59 = vrot.slane %v2094_v12, 4  ;;  %v5534_v9 = vadd.f32 %v1986_v17, %v1747_v32  ;;  %v5536_v24 = vadd.f32 %v2057_v29, %v1749_v19 }
 0x2c9   :  { %v2135_v27 = vsel %vm710_vm6, %v2117_v14, 0.0  ;;  %v2149_v62 = vsel %vm710_vm6, %v2119_v43, 0.0 }
 0x2ca   :  { %v2082_v35 = vadd.f32 %v2081_v3, %v2080_v11  ;;  %v2136_v23 = vrot.slane %v2135_v27, 4  ;;  %v2096_v31 = vadd.f32 %v2095_v59, %v2094_v12  ;;  %v2150_v63 = vrot.slane %v2149_v62, 4 }
 0x2cb   :  { %v2087_v2 = vsel %vm710_vm6, %v5534_v9, 0.0  ;;  %v2118_v22 = vmul.f32 %v5534_v9, %v5534_v9  ;;  %v2101_v47 = vsel %vm710_vm6, %v5536_v24, 0.0  ;;  %v2120_v36 = vmul.f32 %v5536_v24, %v5536_v24 }
 0x2cc   :  { %v2083_v8 = vrot.slane %v2082_v35, 2  ;;  %v2137_v30 = vadd.f32 %v2136_v23, %v2135_v27  ;;  %v2097_v57 = vrot.slane %v2096_v31, 2  ;;  %v2151_v45 = vadd.f32 %v2150_v63, %v2149_v62 }
 0x2cd   :  { %v2088_v13 = vrot.slane %v2087_v2, 4  ;;  %v2142_v18 = vsel %vm710_vm6, %v2118_v22, 0.0  ;;  %v2102_v20 = vrot.slane %v2101_v47, 4  ;;  %v2156_v50 = vsel %vm710_vm6, %v2120_v36, 0.0 }
 0x2ce   :  { %v2084_v34 = vadd.f32 %v2083_v8, %v2082_v35  ;;  %v2138_v26 = vrot.slane %v2137_v30, 2  ;;  %v2098_v16 = vadd.f32 %v2097_v57, %v2096_v31  ;;  %v2143_v58 = vrot.slane %v2142_v18, 4 }
 0x2cf   :  { %v2152_v39 = vrot.slane %v2151_v45, 2  ;;  %v2089_v46 = vadd.f32 %v2088_v13, %v2087_v2  ;;  %v2103_v21 = vadd.f32 %v2102_v20, %v2101_v47  ;;  %v2157_v49 = vrot.slane %v2156_v50, 4 }
 0x2d0   :  { %v2085_v48 = vrot.slane %v2084_v34, 1  ;;  %v2139_v61 = vadd.f32 %v2138_v26, %v2137_v30  ;;  %v2099_v10 = vrot.slane %v2098_v16, 1  ;;  %v2144_v55 = vadd.f32 %v2143_v58, %v2142_v18 }
 0x2d1   :  { %v2153_v0 = vadd.f32 %v2152_v39, %v2151_v45  ;;  %v2090_v33 = vrot.slane %v2089_v46, 2  ;;  %v2104_v42 = vrot.slane %v2103_v21, 2  ;;  %v2158_v12 = vadd.f32 %v2157_v49, %v2156_v50 }
 0x2d2   :  { %v2086_v53 = vadd.f32 %v2085_v48, %v2084_v34  ;;  %v2140_v1 = vrot.slane %v2139_v61, 1  ;;  %v2100_v38 = vadd.f32 %v2099_v10, %v2098_v16  ;;  %v2145_v51 = vrot.slane %v2144_v55, 2 }
 0x2d3   :  { %v2154_v6 = vrot.slane %v2153_v0, 1  ;;  %v2091_v52 = vadd.f32 %v2090_v33, %v2089_v46  ;;  %v2105_v32 = vadd.f32 %v2104_v42, %v2103_v21  ;;  %v2175_v27 = vsub.f32 %v5538_v44, %v5544_v41 }
 0x2d4   :  { %v5558_v19 = vmul.f32 0.25, %v2086_v53  ;;  %v2141_v28 = vadd.f32 %v2140_v1, %v2139_v61  ;;  %v5560_v25 = vmul.f32 0.25, %v2100_v38  ;;  %v2146_v17 = vadd.f32 %v2145_v51, %v2144_v55 }
 0x2d5   :  { %v2155_v29 = vadd.f32 %v2154_v6, %v2153_v0  ;;  %v2092_v11 = vrot.slane %v2091_v52, 1  ;;  %v2106_v14 = vrot.slane %v2105_v32, 1  ;;  %v2159_v23 = vrot.slane %v2158_v12, 2 }
 0x2d6   :  { %v2165_v43 = vmul.f32 0.25, %v2141_v28  ;;  %v2171_v3 = vmul.f32 %v5558_v19, %v5558_v19  ;;  %v2147_v59 = vrot.slane %v2146_v17, 1  ;;  %v2173_v2 = vmul.f32 %v5560_v25, %v5560_v25 }
 0x2d7   :  { %v2093_v62 = vadd.f32 %v2092_v11, %v2091_v52  ;;  %v2107_v35 = vadd.f32 %v2106_v14, %v2105_v32  ;;  %v2167_v63 = vmul.f32 0.25, %v2155_v29  ;;  %v2183_v47 = vadd.f32 1e-05, %v2176_v7  ;;  %v2181_v29 = vld [vmem:[%s5712_s5] sm:$0x3f] }
 0x2d8   :  { %v2177_v31 = vsub.f32 %v2165_v43, %v2171_v3  ;;  %v2148_v22 = vadd.f32 %v2147_v59, %v2146_v17  ;;  %v2160_v57 = vadd.f32 %v2159_v23, %v2158_v12  ;;  %v2182_v13 = vadd.f32 1e-05, %v2175_v27 }
 0x2d9   :  { %v2112_v8 = vmul.f32 0.25, %v2093_v62  ;;  %v2114_v30 = vmul.f32 0.25, %v2107_v35  ;;  %v2179_v26 = vsub.f32 %v2167_v63, %v2173_v2  ;;  %3313 = vrsqrt.f32 %v2183_v47 }
 0x2da   :  { %v2166_v45 = vmul.f32 0.25, %v2148_v22  ;;  %v2161_v20 = vrot.slane %v2160_v57, 1  ;;  %v2184_v34 = vadd.f32 1e-05, %v2177_v31  ;;  %3315 = vrsqrt.f32 %v2182_v13 }
 0x2db   :  { %v2172_v18 = vmul.f32 %v2112_v8, %v2112_v8  ;;  %v2174_v16 = vmul.f32 %v2114_v30, %v2114_v30  ;;  %v2186_v46 = vadd.f32 1e-05, %v2179_v26  ;;  %v3349_v36 = vmov 1966171168  }
 0x2dc   :  { %v2162_v41 = vadd.f32 %v2161_v20, %v2160_v57  ;;  %3317 = vrsqrt.f32 %v2184_v34  ;;  %v2204_v48 = vunpack.c.l.s4 %v3349_v36  ;;  %v2262_v14 = vsub.s32 4, %v4276_v15 }
 0x2dd   :  { %v2178_v44 = vsub.f32 %v2166_v45, %v2172_v18  ;;  %v2266_v12 = vsub.s32 5, %v4276_v15  ;;  %v2250_v43 = vsub.s32 1, %v4276_v15  ;;  %v2254_v3 = vsub.s32 2, %v4276_v15 }
 0x2de   :  { %v2168_v39 = vmul.f32 0.25, %v2162_v41  ;;  %v2205_v61 = vunpack.c.0.s8 %v2204_v48  ;;  %v2258_v59 = vsub.s32 3, %v4276_v15 }
 0x2df   :  { %v2185_v58 = vadd.f32 1e-05, %v2178_v44 }
 0x2e0   :  { %v2180_v7 = vsub.f32 %v2168_v39, %v2174_v16  ;;  %v2208_v33 = vsub.s32 %v2205_v61, %v4276_v15  ;;  %v2458_v15 = vld [vmem:[%s5714_s7 + $0x288] sm:$0xff] }
 0x2e1   :  { %3319 = vrsqrt.f32 %v2185_v58 }
 0x2e2   :  { %v2187_v21 = vadd.f32 1e-05, %v2180_v7  ;;  %3321 = vrsqrt.f32 %v2186_v46 }
 0x2e4   :  { %3323 = vrsqrt.f32 %v2187_v21 }
 0x2e6   :  { %v3314_v10 = vpop.eup %3313 }
 0x2e7   :  { %v3316_v55 = vpop.eup %3315 }
 0x2e8   :  { %v2200_v42 = vcombine.low %v3316_v55, %v3314_v10 }
 0x2e9   :  { %v3318_v0 = vpop.eup %3317 }
 0x2ea   :  { %v2209_v38 = vrot.slane %v2200_v42, %v2208_v33 }
 0x2ee   :  { %v3320_v50 = vpop.eup %3319 }
 0x2ef   :  { %v2201_v53 = vcombine.low %v3318_v0, %v3320_v50  ;;  %v3322_v1 = vpop.eup %3321 }
 0x2f1   :  { %v2216_v51 = vrot.slane %v2201_v53, %v2208_v33  ;;  %v3324_v6 = vpop.eup %3323 }
 0x2f2   :  { %v2202_v52 = vcombine.low %v3322_v1, %v3324_v6  ;;  %v2456_v1 = vld [vmem:[%s5714_s7 + $0x278] sm:$0xff]  ;;  %v2454_v6 = vld [vmem:[%s5714_s7 + $0x268] sm:$0xff] }
 0x2f3   :  { %v2224_v32 = vcombine.low %v2209_v38, %v2216_v51  ;;  %v2455_v38 = vld [vmem:[%s5714_s7 + $0x270] sm:$0xff]  ;;  %v2470_v51 = vld [vmem:[%s5714_s7 + $0x2e8] sm:$0xff] }
 0x2f4   :  { %v2223_v49 = vrot.slane %v2202_v52, %v2208_v33  ;;  %v2469_v52 = vld [vmem:[%s5714_s7 + $0x2e0] sm:$0xff] }
 0x2f5   :  { %v2231_v28 = vrot.slane %v2224_v32, %v2208_v33  ;;  %v2453_v32 = vld [vmem:[%s5714_s7 + $0x260] sm:$0xff] }
 0x2f6   :  { %v2238_v17 = vrot.slane %v2223_v49, %v2208_v33  ;;  %v2468_v49 = vld [vmem:[%s5714_s7 + $0x2d8] sm:$0xff] }
 0x2f8   :  { %v2239_v11 = vcombine.low %v2231_v28, %v2238_v17  ;;  %v2452_v28 = vld [vmem:[%s5714_s7 + $0x258] sm:$0xff]  ;;  %v2467_v17 = vld [vmem:[%s5714_s7 + $0x2d0] sm:$0xff] }
 0x2fa   :  { %v2241_v27 = vmul.f32 %v2239_v11, %v2181_v29  ;;  %v2451_v29 = vld [vmem:[%s5714_s7 + $0x250] sm:$0xff]  ;;  %v2466_v11 = vld [vmem:[%s5714_s7 + $0x2c8] sm:$0xff] }
 0x2fc   :  { %v5579_v62 = vrot.slane %v2241_v27, %v2262_v14  ;;  %v2267_v35 = vrot.slane %v2241_v27, %v2266_v12  ;;  %v2247_v23 = vrot.slane %v2241_v27, %v4282_v54  ;;  %v2251_v31 = vrot.slane %v2241_v27, %v2250_v43 }
 0x2fd   :  { %v2255_v63 = vrot.slane %v2241_v27, %v2254_v3  ;;  %v2259_v2 = vrot.slane %v2241_v27, %v2258_v59  ;;  %v2448_v27 = vld [vmem:[%s5714_s7 + $0x238] sm:$0xff] }
 0x2fe   :  { %v2278_v22 = vmul.f32 %v5579_v62, %v5560_v25  ;;  %v2279_v47 = vmul.f32 %v2267_v35, %v2114_v30  ;;  %v2274_v57 = vmul.f32 %v2247_v23, %v5518_v60  ;;  %v2275_v45 = vmul.f32 %v2251_v31, %v5511_v5  ;;  %v2242_v25 = vld [vmem:[%s5713_s6] sm:$0x3f] }
 0x2ff   :  { %v2276_v13 = vmul.f32 %v2255_v63, %v5558_v19  ;;  %v2277_v18 = vmul.f32 %v2259_v2, %v2112_v8  ;;  %v2329_v5 = vmul.f32 %v2251_v31, %v5495_v4  ;;  %v2331_v19 = vmul.f32 %v2259_v2, %v5534_v9  ;;  %v2462_v31 = vld [vmem:[%s5714_s7 + $0x2a8] sm:$0xff]  ;;  %v2461_v2 = vld [vmem:[%s5714_s7 + $0x2a0] sm:$0xff] }
 0x300   :  { %v2288_v20 = vcombine.low %v2278_v22, %v2279_v47  ;;  %v2286_v34 = vcombine.low %v2274_v57, %v2275_v45  ;;  %v2328_v8 = vmul.f32 %v2247_v23, %v5497_v56  ;;  %v2330_v7 = vmul.f32 %v2255_v63, %v5514_v40  ;;  %v2447_v23 = vld [vmem:[%s5714_s7 + $0x230] sm:$0xff]  ;;  %v2446_v63 = vld [vmem:[%s5714_s7 + $0x228] sm:$0xff]  ;;  %v2445_v22 = vld [vmem:[%s5714_s7 + $0x220] sm:$0xff] }
 0x301   :  { %v2287_v26 = vcombine.low %v2276_v13, %v2277_v18  ;;  %v2333_v10 = vmul.f32 %v2267_v35, %v5536_v24  ;;  %v2463_v35 = vld [vmem:[%s5714_s7 + $0x2b0] sm:$0xff]  ;;  %v2460_v47 = vld [vmem:[%s5714_s7 + $0x298] sm:$0xff] }
 0x302   :  { %v2309_v44 = vrot.slane %v2288_v20, %v2208_v33  ;;  %v2295_v41 = vrot.slane %v2286_v34, %v2208_v33  ;;  %v2444_v57 = vld [vmem:[%s5714_s7 + $0x218] sm:$0xff]  ;;  %v2459_v13 = vld [vmem:[%s5714_s7 + $0x290] sm:$0xff]  ;;  %v2332_v20 = vmul.f32 %v5579_v62, %v5516_v37  ;;  %v2441_v37 = vld [vmem:[%s5714_s7 + $0x200] sm:$0xff] }
 0x303   :  { %v2302_v16 = vrot.slane %v2287_v26, %v2208_v33  ;;  %v2443_v18 = vld [vmem:[%s5714_s7 + $0x210] sm:$0xff]  ;;  %v2457_v26 = vld [vmem:[%s5714_s7 + $0x280] sm:$0xff] }
 0x304   :  { %v2324_v39 = vrot.slane %v2309_v44, %v2208_v33 }
 0x305   :  { %v2310_v58 = vcombine.low %v2295_v41, %v2302_v16 }
 0x307   :  { %v2317_v46 = vrot.slane %v2310_v58, %v2208_v33 }
 0x309   :  { %v2325_v30 = vcombine.low %v2317_v46, %v2324_v39  ;;  %v2993_v39 = vld [vmem:[%s5715_s8] ss:$0 sm:$0xff] }
 0x30b   :  { %v5590_v60 = vsub.f32 %v2242_v25, %v2325_v30 }
 0x30d   :  { %v2342_v21 = vrot.slane %v5590_v60, %v2250_v43  ;;  %v2350_v36 = vrot.slane %v5590_v60, %v2258_v59  ;;  %v2338_v48 = vrot.slane %v5590_v60, %v4282_v54  ;;  %v2346_v61 = vrot.slane %v5590_v60, %v2254_v3  ;;  %v2471_v54 = vld [vmem:[%s5714_s7 + $0x2f0] sm:$0xff]  ;;  %v2465_v43 = vld [vmem:[%s5714_s7 + $0x2c0] sm:$0xff]  ;;  %v2464_v59 = vld [vmem:[%s5714_s7 + $0x2b8] sm:$0xff] }
 0x30e   :  { %v2358_v55 = vrot.slane %v5590_v60, %v2266_v12  ;;  %v2450_v12 = vld [vmem:[%s5714_s7 + $0x248] sm:$0xff]  ;;  %v2449_v3 = vld [vmem:[%s5714_s7 + $0x240] sm:$0xff]  ;;  %v2354_v45 = vrot.slane %v5590_v60, %v2262_v14 }
 0x30f   :  { %v2366_v4 = vadd.f32 %v2342_v21, %v2329_v5  ;;  %v2368_v0 = vadd.f32 %v2350_v36, %v2331_v19  ;;  %v2365_v9 = vadd.f32 %v2338_v48, %v2328_v8  ;;  %v2367_v33 = vadd.f32 %v2346_v61, %v2330_v7  ;;  %v2442_v14 = vld [vmem:[%s5714_s7 + $0x208] sm:$0xff]  ;;  %s2697_s7 = sshll.u32 %s3350_s13, 4  ;;  %s2698_s7 = int_to_ptr.vmem [resolvable:$true] %s2697_s7 }
 0x310   :  { %v2370_v56 = vadd.f32 %v2358_v55, %v2333_v10  ;;  %v2369_v34 = vadd.f32 %v2354_v45, %v2332_v20  ;;  %s3325_s14 = scalar_lea.vmem %s2698_s7, 64  ;;  %p3330_p1 = scmp.lt.s32.totalorder %s2698_s7, %s2698_s7 }
 0x311   :  { %v2372_v42 = vmax.f32 %v2366_v4, 0.0  ;;  %v2374_v40 = vmax.f32 %v2368_v0, 0.0  ;;  %v2371_v50 = vmax.f32 %v2365_v9, 0.0  ;;  %v2373_v53 = vmax.f32 %v2367_v33, 0.0  ;;  %p3326_p0 = scmp.ne.s32.totalorder %s2698_s7, %s3325_s14  ;;  %p3331_p2 = scmp.lt.s32.totalorder %s3325_s14, %s3325_s14 }
 0x312   :  { %v2376_v24 = vmax.f32 %v2370_v56, 0.0  ;;  %v2375_v62 = vmax.f32 %v2369_v34, 0.0 }
 0x313   :  { %2544 = vmatprep.mubr.f32.mxu0 %v2372_v42  ;;  %2614 = vmatprep.mubr.f32.mxu1 %v2374_v40  ;;  %p3332_p3 = por %p3331_p2, %p3330_p1 }
 0x314   :  { %2545 = vmatmul.mubr.f32.vlgmr.msra.gmra.mxu0 %v2371_v50  ;;  %2615 = vmatmul.mubr.f32.vlgmr.msra.gmra.mxu1 %v2373_v53 }
 0x315   :  { %3133 = vmatpush3.msra.mxu0 %v2456_v1  ;;  %2684 = vmatprep.mubr.f32.mxu0 %v2376_v24  ;;  %p3333_p4 = pnand %p3332_p3, %p3326_p0 }
 0x316   :  { %3134 = vmatprep.subr.mxu0 %v2471_v54 }
 0x317   :  { %3135 = vmatpush3.msra.mxu0 %v2455_v38 }
 0x318   :  { %3136 = vmatprep.subr.mxu0 %v2470_v51 }
 0x319   :  { %3137 = vmatpush3.msra.mxu0 %v2454_v6 }
 0x31a   :  { %3138 = vmatprep.subr.mxu0 %v2469_v52 }
 0x31b   :  { %3139 = vmatpush3.msra.mxu0 %v2453_v32 }
 0x31c   :  { %3140 = vmatprep.subr.mxu0 %v2468_v49 }
 0x31d   :  { %3141 = vmatpush3.msra.mxu0 %v2452_v28 }
 0x31e   :  { %3142 = vmatprep.subr.mxu0 %v2467_v17 }
 0x31f   :  { %3143 = vmatpush3.msra.mxu0 %v2451_v29 }
 0x320   :  { %3144 = vmatprep.subr.mxu0 %v2466_v11 }
 0x321   :  { %3145 = vmatpush3.msra.mxu0 %v2450_v12 }
 0x322   :  { %3146 = vmatprep.subr.mxu0 %v2465_v43 }
 0x323   :  { %3147 = vmatpush3.msra.mxu0 %v2449_v3 }
 0x324   :  { %3148 = vmatprep.subr.mxu0 %v2464_v59 }
 0x325   :  { %3149 = vmatpush3.msra.mxu0 %v2448_v27 }
 0x326   :  { %3150 = vmatprep.subr.mxu0 %v2463_v35 }
 0x327   :  { %3151 = vmatpush3.msra.mxu0 %v2447_v23 }
 0x328   :  { %3152 = vmatprep.subr.mxu0 %v2462_v31 }
 0x329   :  { %3153 = vmatpush3.msra.mxu0 %v2446_v63 }
 0x32a   :  { %3154 = vmatprep.subr.mxu0 %v2461_v2 }
 0x32b   :  { %3155 = vmatpush3.msra.mxu0 %v2445_v22 }
 0x32c   :  { %3156 = vmatprep.subr.mxu0 %v2460_v47 }
 0x32d   :  { %3157 = vmatpush3.msra.mxu0 %v2444_v57 }
 0x32e   :  { %3158 = vmatprep.subr.mxu0 %v2459_v13 }
 0x32f   :  { %3159 = vmatpush3.msra.mxu0 %v2443_v18 }
 0x330   :  { %3160 = vmatprep.subr.mxu0 %v2458_v15 }
 0x331   :  { %3161 = vmatpush3.msra.mxu0 %v2442_v14 }
 0x332   :  { %3162 = vmatprep.subr.mxu0 %v2457_v26 }
 0x333   :  { %3163 = vmatpush3.msra.mxu0 %v2441_v37 }
 0x334   :  { %2685 = vmatmul.mubr.f32.vlgmr.msra.gmra.mxu0 %v2375_v62 }
 0x3d4   :  { %v3094_v44 = vpop.f32.mrf.mxu0  ;;  %v3129_v16 = vpop.f32.mrf.mxu1 }
 0x3d6   :  { %v3095_v41 = vpop.f32.mrf.mxu0  ;;  %v3130_v46 = vpop.f32.mrf.mxu1 }
 0x3d7   :  { %v3096_v58 = vadd.f32 %v3095_v41, %v3094_v44  ;;  %v3131_v60 = vadd.f32 %v3130_v46, %v3129_v16 }
 0x3d9   :  { %v2547_v25 = vadd.f32 %v3096_v58, %v2993_v39 }
 0x3db   :  { %v2617_v19 = vadd.f32 %v3131_v60, %v2547_v25 }
 0x3f4   :  { %v3164_v30 = vpop.f32.mrf.mxu0 }
 0x3f6   :  { %v3165_v5 = vpop.f32.mrf.mxu0 }
 0x3f7   :  { %v3166_v8 = vadd.f32 %v3165_v5, %v3164_v30 }
 0x3f9   :  { %v2687_v7 = vadd.f32 %v3166_v8, %v2617_v19 }
 0x3fb   :  { %2690 = vst [vmem:[#allocation2] sm:$0xf] %v2687_v7 }
 0x3fc   :  { %3336 = shalt.err (!%p3333_p4)
}
 0x3fd   :  { %2700 = dma.vmem_to_hbm [thread:$0]  %s2698_s7, 64, %s5716_s9, [#allocation3]  }
 0x3fe   :  { %3345 = dma.done.wait [#allocation3], 64  }
 0x3ff   :  { %3346 = vsyncadd [#allocation3], 4294967232 }
 0x400   :  { %2704 = vsyncpa [#allocation3], 1 }

</bundles_post_ra>
